<compile_context>
chip_gen: v6e
topology: v6e:2x2x1
jax: 0.10.0
libtpu: 0.0.40
codegen_flags: <defaults>
</compile_context>

<pallas_src>
import functools

import jax
import jax.numpy as jnp
from jax.experimental import pallas as pl
from jax.experimental.pallas import tpu as pltpu


# ----------------------------------------------------------------------------
# small helpers
# ----------------------------------------------------------------------------
def _round_up(x, m):
    return (x + m - 1) // m * m


def _pick_tile(dim, candidates):
    for c in candidates:
        if c <= dim and dim % c == 0:
            return c
    return dim


# ----------------------------------------------------------------------------
# Pallas kernels
# ----------------------------------------------------------------------------
def _mm_bias_kernel(a_ref, b_ref, bias_ref, o_ref, acc_ref, *, relu):
    # Tiled matmul with fp32 VMEM accumulator; epilogue fuses folded-BN bias (+ReLU).
    k = pl.program_id(2)

    @pl.when(k == 0)
    def _():
        acc_ref[...] = jnp.zeros_like(acc_ref)

    acc_ref[...] += jnp.dot(a_ref[...], b_ref[...],
                            preferred_element_type=jnp.float32)

    @pl.when(k == pl.num_programs(2) - 1)
    def _():
        y = acc_ref[...] + bias_ref[...]          # fp32 epilogue math (v5e-safe)
        if relu:
            y = jnp.maximum(y, 0.0)
        o_ref[...] = y.astype(o_ref.dtype)


def _mm_bias_res_kernel(a_ref, b_ref, bias_ref, res_ref, o_ref, acc_ref, *, relu):
    # Same as above, plus fused residual add (identity branch of a BasicBlock).
    k = pl.program_id(2)

    @pl.when(k == 0)
    def _():
        acc_ref[...] = jnp.zeros_like(acc_ref)

    acc_ref[...] += jnp.dot(a_ref[...], b_ref[...],
                            preferred_element_type=jnp.float32)

    @pl.when(k == pl.num_programs(2) - 1)
    def _():
        y = acc_ref[...] + bias_ref[...] + res_ref[...].astype(jnp.float32)
        if relu:
            y = jnp.maximum(y, 0.0)
        o_ref[...] = y.astype(o_ref.dtype)


def _max_kernel(x_ref, o_ref):
    # Max over the leading (window-tap) axis: maxpool 3x3.
    m = x_ref[0]
    for i in range(1, x_ref.shape[0]):
        m = jnp.maximum(m, x_ref[i])
    o_ref[...] = m


def _head_kernel(x_ref, w1_ref, b1_ref, w2_ref, b2_ref, o_ref):
    # Fused MLP head: Linear(512,512) + ReLU + Linear(512,feat). Dropout(p=0) == identity.
    h = jnp.dot(x_ref[...], w1_ref[...], preferred_element_type=jnp.float32) + b1_ref[...]
    h = jnp.maximum(h, 0.0)
    y = jnp.dot(h.astype(w2_ref.dtype), w2_ref[...],
                preferred_element_type=jnp.float32) + b2_ref[...]
    o_ref[...] = y


# ----------------------------------------------------------------------------
# fused, tiled matmul wrapper (conv-as-GEMM with BN/bias/ReLU/residual epilogue)
# ----------------------------------------------------------------------------
def fused_matmul(a, b, bias, residual, relu):
    # a: (M, K) bf16, b: (K, N) bf16, bias: (1, N) f32, residual: (M, N) bf16 or None.
    # K and N are multiples of 128 (caller guarantees). Returns (M, N) bf16.
    M, K = a.shape
    _, N = b.shape

    Mpad = _round_up(M, 8)
    if Mpad != M:
        a = jnp.pad(a, ((0, Mpad - M), (0, 0)))
        if residual is not None:
            residual = jnp.pad(residual, ((0, Mpad - M), (0, 0)))

    tm = _pick_tile(Mpad, (512, 256, 128, 64, 32, 16, 8))
    tk = _pick_tile(K, (512, 256, 128))
    tn = _pick_tile(N, (256, 128))
    grid = (Mpad // tm, N // tn, K // tk)

    in_specs = [
        pl.BlockSpec((tm, tk), lambda i, j, k: (i, k)),
        pl.BlockSpec((tk, tn), lambda i, j, k: (k, j)),
        pl.BlockSpec((1, tn), lambda i, j, k: (0, j)),
    ]
    args = [a, b, bias]
    if residual is not None:
        in_specs.append(pl.BlockSpec((tm, tn), lambda i, j, k: (i, j)))
        args.append(residual)
        kernel = functools.partial(_mm_bias_res_kernel, relu=relu)
    else:
        kernel = functools.partial(_mm_bias_kernel, relu=relu)

    bytes_accessed = a.size * 2 + b.size * 2 + Mpad * N * 2 + N * 4
    out = pl.pallas_call(
        kernel,
        out_shape=jax.ShapeDtypeStruct((Mpad, N), jnp.bfloat16),
        grid_spec=pltpu.PrefetchScalarGridSpec(
            num_scalar_prefetch=0,
            grid=grid,
            in_specs=in_specs,
            out_specs=pl.BlockSpec((tm, tn), lambda i, j, k: (i, j)),
            scratch_shapes=[pltpu.VMEM((tm, tn), jnp.float32)],
        ),
        compiler_params=pltpu.CompilerParams(
            dimension_semantics=("parallel", "parallel", "arbitrary"),
            vmem_limit_bytes=32 * 1024 * 1024,
        ),
        cost_estimate=pl.CostEstimate(
            flops=2 * Mpad * N * K, transcendentals=0, bytes_accessed=bytes_accessed),
    )(*args)

    return out[:M] if Mpad != M else out


# ----------------------------------------------------------------------------
# conv / pool building blocks (im2col glue in JAX, compute in Pallas)
# ----------------------------------------------------------------------------
def _im2col(x, kh, kw, stride, pad):
    # x: (B, H, W, C) bf16 NHWC -> (B*oh*ow, kh*kw*C), taps ordered (i-major, j, then c).
    B, H, W, C = x.shape
    xp = jnp.pad(x, ((0, 0), (pad, pad), (pad, pad), (0, 0)))
    Hp, Wp = H + 2 * pad, W + 2 * pad
    oh = (Hp - kh) // stride + 1
    ow = (Wp - kw) // stride + 1
    taps = [xp[:, i:i + stride * oh:stride, j:j + stride * ow:stride, :]
            for i in range(kh) for j in range(kw)]
    patches = jnp.stack(taps, axis=3)                       # (B, oh, ow, kh*kw, C)
    return patches.reshape(B * oh * ow, kh * kw * C), oh, ow


def _fold_bn_into_weight(w_oihw, bn, cin_pad, cout_pad, k_pad):
    # Eval-mode BN fold: y = conv(x, w)*scale + shift  ==  conv(x, w*scale) + shift.
    cout, cin, kh, kw = w_oihw.shape
    scale = bn['gamma'] / jnp.sqrt(bn['var'] + 1e-5)
    shift = bn['beta'] - bn['mean'] * scale
    w = w_oihw * scale[:, None, None, None]
    w = jnp.pad(w, ((0, cout_pad - cout), (0, cin_pad - cin), (0, 0), (0, 0)))
    wmat = jnp.transpose(w, (2, 3, 1, 0)).reshape(kh * kw * cin_pad, cout_pad)
    wmat = jnp.pad(wmat, ((0, k_pad - kh * kw * cin_pad), (0, 0)))
    bias = jnp.pad(shift, (0, cout_pad - cout)).reshape(1, cout_pad)
    return wmat.astype(jnp.bfloat16), bias.astype(jnp.float32)


def conv_bn(x, w_oihw, bn, stride, pad, relu, residual=None):
    # x: (B, H, W, Cin_act) bf16 (channels possibly already 128-padded with zeros)
    # residual: (B, oh, ow, Cout_pad) bf16 or None.  Returns (B, oh, ow, Cout_pad) bf16.
    B, H, W, cin_act = x.shape
    cout, _, kh, kw = w_oihw.shape
    cout_pad = _round_up(cout, 128)
    k_raw = kh * kw * cin_act
    k_pad = _round_up(k_raw, 128)

    patches, oh, ow = _im2col(x, kh, kw, stride, pad)
    if k_pad != k_raw:
        patches = jnp.pad(patches, ((0, 0), (0, k_pad - k_raw)))

    wmat, bias = _fold_bn_into_weight(w_oihw, bn, cin_act, cout_pad, k_pad)

    M = B * oh * ow
    res2d = residual.reshape(M, cout_pad) if residual is not None else None
    out2d = fused_matmul(patches, wmat, bias, res2d, relu)   # (M, Cout_pad) bf16
    return out2d.reshape(B, oh, ow, cout_pad)


def maxpool3x3_s2(x):
    # MaxPool2d(3, stride=2, padding=1). Input is post-ReLU (>= 0), so zero padding is
    # exact (and avoids -inf reaching the zero-weight padded channels).
    B, H, W, C = x.shape
    xp = jnp.pad(x, ((0, 0), (1, 1), (1, 1), (0, 0)))
    Hp, Wp = H + 2, W + 2
    oh = (Hp - 3) // 2 + 1
    ow = (Wp - 3) // 2 + 1
    taps = [xp[:, i:i + 2 * oh:2, j:j + 2 * ow:2, :] for i in range(3) for j in range(3)]
    stacked = jnp.stack(taps, axis=0).reshape(9, B * oh * ow, C)
    out = pl.pallas_call(
        _max_kernel,
        out_shape=jax.ShapeDtypeStruct((B * oh * ow, C), x.dtype),
        grid=(1,),
        in_specs=[pl.BlockSpec((9, B * oh * ow, C), lambda i: (0, 0, 0))],
        out_specs=pl.BlockSpec((B * oh * ow, C), lambda i: (0, 0)),
    )(stacked)
    return out.reshape(B, oh, ow, C)


def basic_block(x, p):
    # BasicBlock with BN folded and residual+ReLU fused into conv2's matmul epilogue:
    # 2 pallas_calls per block (3 with downsample).
    if 'down_conv' in p:
        identity = conv_bn(x, p['down_conv'], p['down_bn'], p['stride'], 0, relu=False)
    else:
        identity = x
    out = conv_bn(x, p['conv1'], p['bn1'], p['stride'], 1, relu=True)
    out = conv_bn(out, p['conv2'], p['bn2'], 1, 1, relu=True, residual=identity)
    return out


def resnet18_trunk(x_nhwc_bf16, params):
    x = conv_bn(x_nhwc_bf16, params['conv1'], params['bn1'], stride=2, pad=3, relu=True)
    x = maxpool3x3_s2(x)
    for p in params['blocks']:
        x = basic_block(x, p)
    # AdaptiveAvgPool2d((1,1)) -> (B, 512); last stage has exactly 512 channels (no pad).
    return jnp.mean(x.astype(jnp.float32), axis=(1, 2))


def head_forward(feats512, hp):
    # Linear(512,512) + Dropout(0.0) + ReLU + Linear(512, feat) fused in one kernel.
    B = feats512.shape[0]
    Bpad = _round_up(B, 8)
    feat = hp['w2'].shape[0]
    feat_pad = _round_up(feat, 128)

    x = jnp.pad(feats512, ((0, Bpad - B), (0, 0))).astype(jnp.bfloat16)
    w1 = jnp.transpose(hp['w1']).astype(jnp.bfloat16)                       # (512, 512)
    b1 = hp['b1'].reshape(1, -1).astype(jnp.float32)
    w2 = jnp.pad(jnp.transpose(hp['w2']),
                 ((0, 0), (0, feat_pad - feat))).astype(jnp.bfloat16)       # (512, feat_pad)
    b2 = jnp.pad(hp['b2'], (0, feat_pad - feat)).reshape(1, feat_pad).astype(jnp.float32)

    out = pl.pallas_call(
        _head_kernel,
        out_shape=jax.ShapeDtypeStruct((Bpad, feat_pad), jnp.float32),
        grid=(1,),
        in_specs=[pl.BlockSpec((Bpad, 512), lambda i: (0, 0)),
                  pl.BlockSpec((512, 512), lambda i: (0, 0)),
                  pl.BlockSpec((1, 512), lambda i: (0, 0)),
                  pl.BlockSpec((512, feat_pad), lambda i: (0, 0)),
                  pl.BlockSpec((1, feat_pad), lambda i: (0, 0))],
        out_specs=pl.BlockSpec((Bpad, feat_pad), lambda i: (0, 0)),
    )(x, w1, b1, w2, b2)
    return out[:B, :feat]


def feature_extractor_forward(images_nchw, params):
    # FeatureExtractor.forward: trunk(images).reshape(B,-1) -> head -> feats
    x = jnp.transpose(images_nchw, (0, 2, 3, 1)).astype(jnp.bfloat16)   # NCHW -> NHWC bf16
    conv_features = resnet18_trunk(x, params['trunk'])                  # (B, 512) f32
    feats = head_forward(conv_features, params['head'])                 # (B, feat_size) f32
    return feats


# ----------------------------------------------------------------------------
# deterministic synthetic parameter init (He-style; BN uses eval-mode stats)
# ----------------------------------------------------------------------------
def _init_conv(key, cout, cin, kh, kw):
    std = (2.0 / (cin * kh * kw)) ** 0.5
    return jax.random.normal(key, (cout, cin, kh, kw), jnp.float32) * std


def _init_bn(c):
    return dict(gamma=jnp.ones((c,), jnp.float32),
                beta=jnp.zeros((c,), jnp.float32),
                mean=jnp.zeros((c,), jnp.float32),
                var=jnp.ones((c,), jnp.float32))


def init_resnet18(key):
    layers = [2, 2, 2, 2]  # resnet18 BasicBlock counts
    params = {}
    key, k = jax.random.split(key)
    params['conv1'] = _init_conv(k, 64, 3, 7, 7)
    params['bn1'] = _init_bn(64)
    blocks = []
    in_c = 64
    for stage, (n_blocks, out_c) in enumerate(zip(layers, (64, 128, 256, 512))):
        for b in range(n_blocks):
            stride = 2 if (stage > 0 and b == 0) else 1
            key, k1, k2, k3 = jax.random.split(key, 4)
            p = dict(stride=stride,
                     conv1=_init_conv(k1, out_c, in_c, 3, 3), bn1=_init_bn(out_c),
                     conv2=_init_conv(k2, out_c, out_c, 3, 3), bn2=_init_bn(out_c))
            if stride != 1 or in_c != out_c:
                p['down_conv'] = _init_conv(k3, out_c, in_c, 1, 1)
                p['down_bn'] = _init_bn(out_c)
            blocks.append(p)
            in_c = out_c
    params['blocks'] = blocks
    return params


if __name__ == "__main__":
    feat_size = 128
    key = jax.random.PRNGKey(0)
    k_img, k_trunk, k_w1, k_w2 = jax.random.split(key, 4)

    # Small deterministic input: batch=2, 3-channel 16x16 image (NCHW, like PyTorch).
    img = jax.random.normal(k_img, (2, 3, 16, 16), jnp.float32)

    params = {
        'trunk': init_resnet18(k_trunk),
        'head': dict(
            w1=jax.random.normal(k_w1, (512, 512), jnp.float32) * (2.0 / 512.0) ** 0.5,
            b1=jnp.zeros((512,), jnp.float32),
            w2=jax.random.normal(k_w2, (feat_size, 512), jnp.float32) * (1.0 / 512.0) ** 0.5,
            b2=jnp.zeros((feat_size,), jnp.float32),
        ),
    }

    # Close over params so Python ints (strides) stay static under jit.
    fwd = jax.jit(lambda im: feature_extractor_forward(im, params))
    feats = jax.block_until_ready(fwd(img))

    assert feats.shape == (2, feat_size)
    assert bool(jnp.all(jnp.isfinite(feats)))
    print("KERNEL_OK")
</pallas_src>

<mosaic_0001>
module attributes {stable_mosaic.version = 11 : i64} {
  func.func @_mm_bias_kernel(%arg0: i32, %arg1: i32, %arg2: i32, %arg3: memref<128x256xbf16, #tpu.memory_space<vmem>>, %arg4: memref<256x128xbf16, #tpu.memory_space<vmem>>, %arg5: memref<1x128xf32, #tpu.memory_space<vmem>>, %arg6: memref<128x128xbf16, #tpu.memory_space<vmem>>, %arg7: memref<128x128xf32, #tpu.memory_space<vmem>>) attributes {dimension_semantics = [#tpu.dimension_semantics<parallel>, #tpu.dimension_semantics<parallel>, #tpu.dimension_semantics<arbitrary>], iteration_bounds = array<i64: 1, 1, 1>, scalar_prefetch = 0 : i64, scratch_operands = 1 : i64, tpu.core_type = #tpu.core_type<tc>, window_params = [{transform_indices = @transform_0, window_bounds = array<i64: 128, 256>}, {transform_indices = @transform_1, window_bounds = array<i64: 256, 128>}, {transform_indices = @transform_2, window_bounds = array<i64: 1, 128>}, {transform_indices = @transform_3, window_bounds = array<i64: 128, 128>}]} {
    %c0_i32 = arith.constant 0 : i32
    %0 = arith.cmpi eq, %arg2, %c0_i32 : i32
    %1 = arith.extui %0 : i1 to i32
    %c0_i32_0 = arith.constant 0 : i32
    %2 = arith.cmpi ne, %1, %c0_i32_0 : i32
    scf.if %2 {
      %cst_10 = arith.constant 0.000000e+00 : f32
      %12 = vector.broadcast %cst_10 : f32 to vector<128x128xf32>
      %c0_11 = arith.constant 0 : index
      %c0_12 = arith.constant 0 : index
      %13 = vector.load %arg7[%c0_11, %c0_12] : memref<128x128xf32, #tpu.memory_space<vmem>>, vector<128x128xf32>
      tpu.vector_store %arg7[%c0_11, %c0_12], %12 {strides = array<i32>} : memref<128x128xf32, #tpu.memory_space<vmem>>, vector<128x128xf32>,
    } else {
    }
    %c0 = arith.constant 0 : index
    %c0_1 = arith.constant 0 : index
    %3 = vector.load %arg7[%c0, %c0_1] : memref<128x128xf32, #tpu.memory_space<vmem>>, vector<128x128xf32>
    %c0_2 = arith.constant 0 : index
    %c0_3 = arith.constant 0 : index
    %4 = vector.load %arg3[%c0_2, %c0_3] : memref<128x256xbf16, #tpu.memory_space<vmem>>, vector<128x256xbf16>
    %c0_4 = arith.constant 0 : index
    %c0_5 = arith.constant 0 : index
    %5 = vector.load %arg4[%c0_4, %c0_5] : memref<256x128xbf16, #tpu.memory_space<vmem>>, vector<256x128xbf16>
    %cst = arith.constant dense<0.000000e+00> : vector<128x128xf32>
    %6 = tpu.matmul %4, %5, %cst {dimension_numbers = #tpu.dot_dimension_numbers<[1], [0], [0], [1], [0, 0, 1, 1], [], []>} : vector<128x256xbf16>, vector<256x128xbf16>, vector<128x128xf32> -> vector<128x128xf32>
    %7 = arith.addf %3, %6 : vector<128x128xf32>
    %c0_6 = arith.constant 0 : index
    %c0_7 = arith.constant 0 : index
    %8 = vector.load %arg7[%c0_6, %c0_7] : memref<128x128xf32, #tpu.memory_space<vmem>>, vector<128x128xf32>
    tpu.vector_store %arg7[%c0_6, %c0_7], %7 {strides = array<i32>} : memref<128x128xf32, #tpu.memory_space<vmem>>, vector<128x128xf32>,
    %c0_i32_8 = arith.constant 0 : i32
    %9 = arith.cmpi eq, %arg2, %c0_i32_8 : i32
    %10 = arith.extui %9 : i1 to i32
    %c0_i32_9 = arith.constant 0 : i32
    %11 = arith.cmpi ne, %10, %c0_i32_9 : i32
    scf.if %11 {
      %c0_10 = arith.constant 0 : index
      %c0_11 = arith.constant 0 : index
      %12 = vector.load %arg7[%c0_10, %c0_11] : memref<128x128xf32, #tpu.memory_space<vmem>>, vector<128x128xf32>
      %c0_12 = arith.constant 0 : index
      %c0_13 = arith.constant 0 : index
      %13 = vector.load %arg5[%c0_12, %c0_13] : memref<1x128xf32, #tpu.memory_space<vmem>>, vector<1x128xf32>
      %14 = vector.broadcast %13 : vector<1x128xf32> to vector<128x128xf32>
      %15 = arith.addf %12, %14 : vector<128x128xf32>
      %cst_14 = arith.constant 0.000000e+00 : f32
      %16 = vector.broadcast %cst_14 : f32 to vector<128x128xf32>
      %17 = arith.maximumf %15, %16 : vector<128x128xf32>
      %18 = arith.truncf %17 : vector<128x128xf32> to vector<128x128xbf16>
      %c0_15 = arith.constant 0 : index
      %c0_16 = arith.constant 0 : index
      %19 = vector.load %arg6[%c0_15, %c0_16] : memref<128x128xbf16, #tpu.memory_space<vmem>>, vector<128x128xbf16>
      tpu.vector_store %arg6[%c0_15, %c0_16], %18 {strides = array<i32>} : memref<128x128xbf16, #tpu.memory_space<vmem>>, vector<128x128xbf16>,
    } else {
    }
    return
  }
  func.func @transform_0(%arg0: i32, %arg1: i32, %arg2: i32) -> (i32, i32) {
    %c0_i32 = arith.constant 0 : i32
    return %arg0, %arg2 : i32, i32
  }
  func.func @transform_1(%arg0: i32, %arg1: i32, %arg2: i32) -> (i32, i32) {
    %c0_i32 = arith.constant 0 : i32
    return %arg2, %arg1 : i32, i32
  }
  func.func @transform_2(%arg0: i32, %arg1: i32, %arg2: i32) -> (i32, i32) {
    %c0_i32 = arith.constant 0 : i32
    %c0_i32_0 = arith.constant 0 : i32
    return %c0_i32, %arg1 : i32, i32
  }
  func.func @transform_3(%arg0: i32, %arg1: i32, %arg2: i32) -> (i32, i32) {
    %c0_i32 = arith.constant 0 : i32
    return %arg0, %arg1 : i32, i32
  }
}

module attributes {stable_mosaic.version = 11 : i64} {
  func.func @_max_kernel(%arg0: i32, %arg1: memref<9x32x128xbf16, #tpu.memory_space<vmem>>, %arg2: memref<32x128xbf16, #tpu.memory_space<vmem>>) attributes {dimension_semantics = [#tpu.dimension_semantics<arbitrary>], iteration_bounds = array<i64: 1>, scalar_prefetch = 0 : i64, scratch_operands = 0 : i64, tpu.core_type = #tpu.core_type<tc>, window_params = [{pipeline_mode = #tpu.pipeline_mode<synchronous>, transform_indices = @transform_0, window_bounds = array<i64: 9, 32, 128>}, {pipeline_mode = #tpu.pipeline_mode<synchronous>, transform_indices = @transform_1, window_bounds = array<i64: 32, 128>}]} {
    %c0 = arith.constant 0 : index
    %c0_0 = arith.constant 0 : index
    %c0_1 = arith.constant 0 : index
    %0 = vector.load %arg1[%c0, %c0_0, %c0_1] : memref<9x32x128xbf16, #tpu.memory_space<vmem>>, vector<1x32x128xbf16>
    %1 = vector.shape_cast %0 : vector<1x32x128xbf16> to vector<32x128xbf16>
    %c1 = arith.constant 1 : index
    %c0_2 = arith.constant 0 : index
    %c0_3 = arith.constant 0 : index
    %2 = vector.load %arg1[%c1, %c0_2, %c0_3] : memref<9x32x128xbf16, #tpu.memory_space<vmem>>, vector<1x32x128xbf16>
    %3 = vector.shape_cast %2 : vector<1x32x128xbf16> to vector<32x128xbf16>
    %4 = arith.maximumf %1, %3 : vector<32x128xbf16>
    %c2 = arith.constant 2 : index
    %c0_4 = arith.constant 0 : index
    %c0_5 = arith.constant 0 : index
    %5 = vector.load %arg1[%c2, %c0_4, %c0_5] : memref<9x32x128xbf16, #tpu.memory_space<vmem>>, vector<1x32x128xbf16>
    %6 = vector.shape_cast %5 : vector<1x32x128xbf16> to vector<32x128xbf16>
    %7 = arith.maximumf %4, %6 : vector<32x128xbf16>
    %c3 = arith.constant 3 : index
    %c0_6 = arith.constant 0 : index
    %c0_7 = arith.constant 0 : index
    %8 = vector.load %arg1[%c3, %c0_6, %c0_7] : memref<9x32x128xbf16, #tpu.memory_space<vmem>>, vector<1x32x128xbf16>
    %9 = vector.shape_cast %8 : vector<1x32x128xbf16> to vector<32x128xbf16>
    %10 = arith.maximumf %7, %9 : vector<32x128xbf16>
    %c4 = arith.constant 4 : index
    %c0_8 = arith.constant 0 : index
    %c0_9 = arith.constant 0 : index
    %11 = vector.load %arg1[%c4, %c0_8, %c0_9] : memref<9x32x128xbf16, #tpu.memory_space<vmem>>, vector<1x32x128xbf16>
    %12 = vector.shape_cast %11 : vector<1x32x128xbf16> to vector<32x128xbf16>
    %13 = arith.maximumf %10, %12 : vector<32x128xbf16>
    %c5 = arith.constant 5 : index
    %c0_10 = arith.constant 0 : index
    %c0_11 = arith.constant 0 : index
    %14 = vector.load %arg1[%c5, %c0_10, %c0_11] : memref<9x32x128xbf16, #tpu.memory_space<vmem>>, vector<1x32x128xbf16>
    %15 = vector.shape_cast %14 : vector<1x32x128xbf16> to vector<32x128xbf16>
    %16 = arith.maximumf %13, %15 : vector<32x128xbf16>
    %c6 = arith.constant 6 : index
    %c0_12 = arith.constant 0 : index
    %c0_13 = arith.constant 0 : index
    %17 = vector.load %arg1[%c6, %c0_12, %c0_13] : memref<9x32x128xbf16, #tpu.memory_space<vmem>>, vector<1x32x128xbf16>
    %18 = vector.shape_cast %17 : vector<1x32x128xbf16> to vector<32x128xbf16>
    %19 = arith.maximumf %16, %18 : vector<32x128xbf16>
    %c7 = arith.constant 7 : index
    %c0_14 = arith.constant 0 : index
    %c0_15 = arith.constant 0 : index
    %20 = vector.load %arg1[%c7, %c0_14, %c0_15] : memref<9x32x128xbf16, #tpu.memory_space<vmem>>, vector<1x32x128xbf16>
    %21 = vector.shape_cast %20 : vector<1x32x128xbf16> to vector<32x128xbf16>
    %22 = arith.maximumf %19, %21 : vector<32x128xbf16>
    %c8 = arith.constant 8 : index
    %c0_16 = arith.constant 0 : index
    %c0_17 = arith.constant 0 : index
    %23 = vector.load %arg1[%c8, %c0_16, %c0_17] : memref<9x32x128xbf16, #tpu.memory_space<vmem>>, vector<1x32x128xbf16>
    %24 = vector.shape_cast %23 : vector<1x32x128xbf16> to vector<32x128xbf16>
    %25 = arith.maximumf %22, %24 : vector<32x128xbf16>
    %c0_18 = arith.constant 0 : index
    %c0_19 = arith.constant 0 : index
    %26 = vector.load %arg2[%c0_18, %c0_19] : memref<32x128xbf16, #tpu.memory_space<vmem>>, vector<32x128xbf16>
    tpu.vector_store %arg2[%c0_18, %c0_19], %25 {strides = array<i32>} : memref<32x128xbf16, #tpu.memory_space<vmem>>, vector<32x128xbf16>,
    return
  }
  func.func @transform_0(%arg0: i32) -> (i32, i32, i32) {
    %c0_i32 = arith.constant 0 : i32
    %c0_i32_0 = arith.constant 0 : i32
    %c0_i32_1 = arith.constant 0 : i32
    %c0_i32_2 = arith.constant 0 : i32
    return %c0_i32, %c0_i32_0, %c0_i32_1 : i32, i32, i32
  }
  func.func @transform_1(%arg0: i32) -> (i32, i32) {
    %c0_i32 = arith.constant 0 : i32
    %c0_i32_0 = arith.constant 0 : i32
    %c0_i32_1 = arith.constant 0 : i32
    return %c0_i32, %c0_i32_0 : i32, i32
  }
}

module attributes {stable_mosaic.version = 11 : i64} {
  func.func @_mm_bias_kernel(%arg0: i32, %arg1: i32, %arg2: i32, %arg3: memref<32x128xbf16, #tpu.memory_space<vmem>>, %arg4: memref<128x128xbf16, #tpu.memory_space<vmem>>, %arg5: memref<1x128xf32, #tpu.memory_space<vmem>>, %arg6: memref<32x128xbf16, #tpu.memory_space<vmem>>, %arg7: memref<32x128xf32, #tpu.memory_space<vmem>>) attributes {dimension_semantics = [#tpu.dimension_semantics<parallel>, #tpu.dimension_semantics<parallel>, #tpu.dimension_semantics<arbitrary>], iteration_bounds = array<i64: 1, 1, 9>, scalar_prefetch = 0 : i64, scratch_operands = 1 : i64, tpu.core_type = #tpu.core_type<tc>, window_params = [{transform_indices = @transform_0, window_bounds = array<i64: 32, 128>}, {transform_indices = @transform_1, window_bounds = array<i64: 128, 128>}, {transform_indices = @transform_2, window_bounds = array<i64: 1, 128>}, {transform_indices = @transform_3, window_bounds = array<i64: 32, 128>}]} {
    %c0_i32 = arith.constant 0 : i32
    %0 = arith.cmpi eq, %arg2, %c0_i32 : i32
    %1 = arith.extui %0 : i1 to i32
    %c0_i32_0 = arith.constant 0 : i32
    %2 = arith.cmpi ne, %1, %c0_i32_0 : i32
    scf.if %2 {
      %cst_9 = arith.constant 0.000000e+00 : f32
      %12 = vector.broadcast %cst_9 : f32 to vector<32x128xf32>
      %c0_10 = arith.constant 0 : index
      %c0_11 = arith.constant 0 : index
      %13 = vector.load %arg7[%c0_10, %c0_11] : memref<32x128xf32, #tpu.memory_space<vmem>>, vector<32x128xf32>
      tpu.vector_store %arg7[%c0_10, %c0_11], %12 {strides = array<i32>} : memref<32x128xf32, #tpu.memory_space<vmem>>, vector<32x128xf32>,
    } else {
    }
    %c0 = arith.constant 0 : index
    %c0_1 = arith.constant 0 : index
    %3 = vector.load %arg7[%c0, %c0_1] : memref<32x128xf32, #tpu.memory_space<vmem>>, vector<32x128xf32>
    %c0_2 = arith.constant 0 : index
    %c0_3 = arith.constant 0 : index
    %4 = vector.load %arg3[%c0_2, %c0_3] : memref<32x128xbf16, #tpu.memory_space<vmem>>, vector<32x128xbf16>
    %c0_4 = arith.constant 0 : index
    %c0_5 = arith.constant 0 : index
    %5 = vector.load %arg4[%c0_4, %c0_5] : memref<128x128xbf16, #tpu.memory_space<vmem>>, vector<128x128xbf16>
    %cst = arith.constant dense<0.000000e+00> : vector<32x128xf32>
    %6 = tpu.matmul %4, %5, %cst {dimension_numbers = #tpu.dot_dimension_numbers<[1], [0], [0], [1], [0, 0, 1, 1], [], []>} : vector<32x128xbf16>, vector<128x128xbf16>, vector<32x128xf32> -> vector<32x128xf32>
    %7 = arith.addf %3, %6 : vector<32x128xf32>
    %c0_6 = arith.constant 0 : index
    %c0_7 = arith.constant 0 : index
    %8 = vector.load %arg7[%c0_6, %c0_7] : memref<32x128xf32, #tpu.memory_space<vmem>>, vector<32x128xf32>
    tpu.vector_store %arg7[%c0_6, %c0_7], %7 {strides = array<i32>} : memref<32x128xf32, #tpu.memory_space<vmem>>, vector<32x128xf32>,
    %c8_i32 = arith.constant 8 : i32
    %9 = arith.cmpi eq, %arg2, %c8_i32 : i32
    %10 = arith.extui %9 : i1 to i32
    %c0_i32_8 = arith.constant 0 : i32
    %11 = arith.cmpi ne, %10, %c0_i32_8 : i32
    scf.if %11 {
      %c0_9 = arith.constant 0 : index
      %c0_10 = arith.constant 0 : index
      %12 = vector.load %arg7[%c0_9, %c0_10] : memref<32x128xf32, #tpu.memory_space<vmem>>, vector<32x128xf32>
      %c0_11 = arith.constant 0 : index
      %c0_12 = arith.constant 0 : index
      %13 = vector.load %arg5[%c0_11, %c0_12] : memref<1x128xf32, #tpu.memory_space<vmem>>, vector<1x128xf32>
      %14 = vector.broadcast %13 : vector<1x128xf32> to vector<32x128xf32>
      %15 = arith.addf %12, %14 : vector<32x128xf32>
      %cst_13 = arith.constant 0.000000e+00 : f32
      %16 = vector.broadcast %cst_13 : f32 to vector<32x128xf32>
      %17 = arith.maximumf %15, %16 : vector<32x128xf32>
      %18 = arith.truncf %17 : vector<32x128xf32> to vector<32x128xbf16>
      %c0_14 = arith.constant 0 : index
      %c0_15 = arith.constant 0 : index
      %19 = vector.load %arg6[%c0_14, %c0_15] : memref<32x128xbf16, #tpu.memory_space<vmem>>, vector<32x128xbf16>
      tpu.vector_store %arg6[%c0_14, %c0_15], %18 {strides = array<i32>} : memref<32x128xbf16, #tpu.memory_space<vmem>>, vector<32x128xbf16>,
    } else {
    }
    return
  }
  func.func @transform_0(%arg0: i32, %arg1: i32, %arg2: i32) -> (i32, i32) {
    %c0_i32 = arith.constant 0 : i32
    return %arg0, %arg2 : i32, i32
  }
  func.func @transform_1(%arg0: i32, %arg1: i32, %arg2: i32) -> (i32, i32) {
    %c0_i32 = arith.constant 0 : i32
    return %arg2, %arg1 : i32, i32
  }
  func.func @transform_2(%arg0: i32, %arg1: i32, %arg2: i32) -> (i32, i32) {
    %c0_i32 = arith.constant 0 : i32
    %c0_i32_0 = arith.constant 0 : i32
    return %c0_i32, %arg1 : i32, i32
  }
  func.func @transform_3(%arg0: i32, %arg1: i32, %arg2: i32) -> (i32, i32) {
    %c0_i32 = arith.constant 0 : i32
    return %arg0, %arg1 : i32, i32
  }
}

module attributes {stable_mosaic.version = 11 : i64} {
  func.func @_mm_bias_res_kernel(%arg0: i32, %arg1: i32, %arg2: i32, %arg3: memref<32x128xbf16, #tpu.memory_space<vmem>>, %arg4: memref<128x128xbf16, #tpu.memory_space<vmem>>, %arg5: memref<1x128xf32, #tpu.memory_space<vmem>>, %arg6: memref<32x128xbf16, #tpu.memory_space<vmem>>, %arg7: memref<32x128xbf16, #tpu.memory_space<vmem>>, %arg8: memref<32x128xf32, #tpu.memory_space<vmem>>) attributes {dimension_semantics = [#tpu.dimension_semantics<parallel>, #tpu.dimension_semantics<parallel>, #tpu.dimension_semantics<arbitrary>], iteration_bounds = array<i64: 1, 1, 9>, scalar_prefetch = 0 : i64, scratch_operands = 1 : i64, tpu.core_type = #tpu.core_type<tc>, window_params = [{transform_indices = @transform_0, window_bounds = array<i64: 32, 128>}, {transform_indices = @transform_1, window_bounds = array<i64: 128, 128>}, {transform_indices = @transform_2, window_bounds = array<i64: 1, 128>}, {transform_indices = @transform_3, window_bounds = array<i64: 32, 128>}, {transform_indices = @transform_4, window_bounds = array<i64: 32, 128>}]} {
    %c0_i32 = arith.constant 0 : i32
    %0 = arith.cmpi eq, %arg2, %c0_i32 : i32
    %1 = arith.extui %0 : i1 to i32
    %c0_i32_0 = arith.constant 0 : i32
    %2 = arith.cmpi ne, %1, %c0_i32_0 : i32
    scf.if %2 {
      %cst_9 = arith.constant 0.000000e+00 : f32
      %12 = vector.broadcast %cst_9 : f32 to vector<32x128xf32>
      %c0_10 = arith.constant 0 : index
      %c0_11 = arith.constant 0 : index
      %13 = vector.load %arg8[%c0_10, %c0_11] : memref<32x128xf32, #tpu.memory_space<vmem>>, vector<32x128xf32>
      tpu.vector_store %arg8[%c0_10, %c0_11], %12 {strides = array<i32>} : memref<32x128xf32, #tpu.memory_space<vmem>>, vector<32x128xf32>,
    } else {
    }
    %c0 = arith.constant 0 : index
    %c0_1 = arith.constant 0 : index
    %3 = vector.load %arg8[%c0, %c0_1] : memref<32x128xf32, #tpu.memory_space<vmem>>, vector<32x128xf32>
    %c0_2 = arith.constant 0 : index
    %c0_3 = arith.constant 0 : index
    %4 = vector.load %arg3[%c0_2, %c0_3] : memref<32x128xbf16, #tpu.memory_space<vmem>>, vector<32x128xbf16>
    %c0_4 = arith.constant 0 : index
    %c0_5 = arith.constant 0 : index
    %5 = vector.load %arg4[%c0_4, %c0_5] : memref<128x128xbf16, #tpu.memory_space<vmem>>, vector<128x128xbf16>
    %cst = arith.constant dense<0.000000e+00> : vector<32x128xf32>
    %6 = tpu.matmul %4, %5, %cst {dimension_numbers = #tpu.dot_dimension_numbers<[1], [0], [0], [1], [0, 0, 1, 1], [], []>} : vector<32x128xbf16>, vector<128x128xbf16>, vector<32x128xf32> -> vector<32x128xf32>
    %7 = arith.addf %3, %6 : vector<32x128xf32>
    %c0_6 = arith.constant 0 : index
    %c0_7 = arith.constant 0 : index
    %8 = vector.load %arg8[%c0_6, %c0_7] : memref<32x128xf32, #tpu.memory_space<vmem>>, vector<32x128xf32>
    tpu.vector_store %arg8[%c0_6, %c0_7], %7 {strides = array<i32>} : memref<32x128xf32, #tpu.memory_space<vmem>>, vector<32x128xf32>,
    %c8_i32 = arith.constant 8 : i32
    %9 = arith.cmpi eq, %arg2, %c8_i32 : i32
    %10 = arith.extui %9 : i1 to i32
    %c0_i32_8 = arith.constant 0 : i32
    %11 = arith.cmpi ne, %10, %c0_i32_8 : i32
    scf.if %11 {
      %c0_9 = arith.constant 0 : index
      %c0_10 = arith.constant 0 : index
      %12 = vector.load %arg8[%c0_9, %c0_10] : memref<32x128xf32, #tpu.memory_space<vmem>>, vector<32x128xf32>
      %c0_11 = arith.constant 0 : index
      %c0_12 = arith.constant 0 : index
      %13 = vector.load %arg5[%c0_11, %c0_12] : memref<1x128xf32, #tpu.memory_space<vmem>>, vector<1x128xf32>
      %14 = vector.broadcast %13 : vector<1x128xf32> to vector<32x128xf32>
      %15 = arith.addf %12, %14 : vector<32x128xf32>
      %c0_13 = arith.constant 0 : index
      %c0_14 = arith.constant 0 : index
      %16 = vector.load %arg6[%c0_13, %c0_14] : memref<32x128xbf16, #tpu.memory_space<vmem>>, vector<32x128xbf16>
      %17 = arith.extf %16 : vector<32x128xbf16> to vector<32x128xf32>
      %18 = arith.addf %15, %17 : vector<32x128xf32>
      %cst_15 = arith.constant 0.000000e+00 : f32
      %19 = vector.broadcast %cst_15 : f32 to vector<32x128xf32>
      %20 = arith.maximumf %18, %19 : vector<32x128xf32>
      %21 = arith.truncf %20 : vector<32x128xf32> to vector<32x128xbf16>
      %c0_16 = arith.constant 0 : index
      %c0_17 = arith.constant 0 : index
      %22 = vector.load %arg7[%c0_16, %c0_17] : memref<32x128xbf16, #tpu.memory_space<vmem>>, vector<32x128xbf16>
      tpu.vector_store %arg7[%c0_16, %c0_17], %21 {strides = array<i32>} : memref<32x128xbf16, #tpu.memory_space<vmem>>, vector<32x128xbf16>,
    } else {
    }
    return
  }
  func.func @transform_0(%arg0: i32, %arg1: i32, %arg2: i32) -> (i32, i32) {
    %c0_i32 = arith.constant 0 : i32
    return %arg0, %arg2 : i32, i32
  }
  func.func @transform_1(%arg0: i32, %arg1: i32, %arg2: i32) -> (i32, i32) {
    %c0_i32 = arith.constant 0 : i32
    return %arg2, %arg1 : i32, i32
  }
  func.func @transform_2(%arg0: i32, %arg1: i32, %arg2: i32) -> (i32, i32) {
    %c0_i32 = arith.constant 0 : i32
    %c0_i32_0 = arith.constant 0 : i32
    return %c0_i32, %arg1 : i32, i32
  }
  func.func @transform_3(%arg0: i32, %arg1: i32, %arg2: i32) -> (i32, i32) {
    %c0_i32 = arith.constant 0 : i32
    return %arg0, %arg1 : i32, i32
  }
  func.func @transform_4(%arg0: i32, %arg1: i32, %arg2: i32) -> (i32, i32) {
    %c0_i32 = arith.constant 0 : i32
    return %arg0, %arg1 : i32, i32
  }
}

module attributes {stable_mosaic.version = 11 : i64} {
  func.func @_mm_bias_kernel(%arg0: i32, %arg1: i32, %arg2: i32, %arg3: memref<8x128xbf16, #tpu.memory_space<vmem>>, %arg4: memref<128x128xbf16, #tpu.memory_space<vmem>>, %arg5: memref<1x128xf32, #tpu.memory_space<vmem>>, %arg6: memref<8x128xbf16, #tpu.memory_space<vmem>>, %arg7: memref<8x128xf32, #tpu.memory_space<vmem>>) attributes {dimension_semantics = [#tpu.dimension_semantics<parallel>, #tpu.dimension_semantics<parallel>, #tpu.dimension_semantics<arbitrary>], iteration_bounds = array<i64: 1, 1, 9>, scalar_prefetch = 0 : i64, scratch_operands = 1 : i64, tpu.core_type = #tpu.core_type<tc>, window_params = [{transform_indices = @transform_0, window_bounds = array<i64: 8, 128>}, {transform_indices = @transform_1, window_bounds = array<i64: 128, 128>}, {transform_indices = @transform_2, window_bounds = array<i64: 1, 128>}, {transform_indices = @transform_3, window_bounds = array<i64: 8, 128>}]} {
    %c0_i32 = arith.constant 0 : i32
    %0 = arith.cmpi eq, %arg2, %c0_i32 : i32
    %1 = arith.extui %0 : i1 to i32
    %c0_i32_0 = arith.constant 0 : i32
    %2 = arith.cmpi ne, %1, %c0_i32_0 : i32
    scf.if %2 {
      %cst_9 = arith.constant 0.000000e+00 : f32
      %12 = vector.broadcast %cst_9 : f32 to vector<8x128xf32>
      %c0_10 = arith.constant 0 : index
      %c0_11 = arith.constant 0 : index
      %13 = vector.load %arg7[%c0_10, %c0_11] : memref<8x128xf32, #tpu.memory_space<vmem>>, vector<8x128xf32>
      tpu.vector_store %arg7[%c0_10, %c0_11], %12 {strides = array<i32>} : memref<8x128xf32, #tpu.memory_space<vmem>>, vector<8x128xf32>,
    } else {
    }
    %c0 = arith.constant 0 : index
    %c0_1 = arith.constant 0 : index
    %3 = vector.load %arg7[%c0, %c0_1] : memref<8x128xf32, #tpu.memory_space<vmem>>, vector<8x128xf32>
    %c0_2 = arith.constant 0 : index
    %c0_3 = arith.constant 0 : index
    %4 = vector.load %arg3[%c0_2, %c0_3] : memref<8x128xbf16, #tpu.memory_space<vmem>>, vector<8x128xbf16>
    %c0_4 = arith.constant 0 : index
    %c0_5 = arith.constant 0 : index
    %5 = vector.load %arg4[%c0_4, %c0_5] : memref<128x128xbf16, #tpu.memory_space<vmem>>, vector<128x128xbf16>
    %cst = arith.constant dense<0.000000e+00> : vector<8x128xf32>
    %6 = tpu.matmul %4, %5, %cst {dimension_numbers = #tpu.dot_dimension_numbers<[1], [0], [0], [1], [0, 0, 1, 1], [], []>} : vector<8x128xbf16>, vector<128x128xbf16>, vector<8x128xf32> -> vector<8x128xf32>
    %7 = arith.addf %3, %6 : vector<8x128xf32>
    %c0_6 = arith.constant 0 : index
    %c0_7 = arith.constant 0 : index
    %8 = vector.load %arg7[%c0_6, %c0_7] : memref<8x128xf32, #tpu.memory_space<vmem>>, vector<8x128xf32>
    tpu.vector_store %arg7[%c0_6, %c0_7], %7 {strides = array<i32>} : memref<8x128xf32, #tpu.memory_space<vmem>>, vector<8x128xf32>,
    %c8_i32 = arith.constant 8 : i32
    %9 = arith.cmpi eq, %arg2, %c8_i32 : i32
    %10 = arith.extui %9 : i1 to i32
    %c0_i32_8 = arith.constant 0 : i32
    %11 = arith.cmpi ne, %10, %c0_i32_8 : i32
    scf.if %11 {
      %c0_9 = arith.constant 0 : index
      %c0_10 = arith.constant 0 : index
      %12 = vector.load %arg7[%c0_9, %c0_10] : memref<8x128xf32, #tpu.memory_space<vmem>>, vector<8x128xf32>
      %c0_11 = arith.constant 0 : index
      %c0_12 = arith.constant 0 : index
      %13 = vector.load %arg5[%c0_11, %c0_12] : memref<1x128xf32, #tpu.memory_space<vmem>>, vector<1x128xf32>
      %14 = vector.broadcast %13 : vector<1x128xf32> to vector<8x128xf32>
      %15 = arith.addf %12, %14 : vector<8x128xf32>
      %cst_13 = arith.constant 0.000000e+00 : f32
      %16 = vector.broadcast %cst_13 : f32 to vector<8x128xf32>
      %17 = arith.maximumf %15, %16 : vector<8x128xf32>
      %18 = arith.truncf %17 : vector<8x128xf32> to vector<8x128xbf16>
      %c0_14 = arith.constant 0 : index
      %c0_15 = arith.constant 0 : index
      %19 = vector.load %arg6[%c0_14, %c0_15] : memref<8x128xbf16, #tpu.memory_space<vmem>>, vector<8x128xbf16>
      tpu.vector_store %arg6[%c0_14, %c0_15], %18 {strides = array<i32>} : memref<8x128xbf16, #tpu.memory_space<vmem>>, vector<8x128xbf16>,
    } else {
    }
    return
  }
  func.func @transform_0(%arg0: i32, %arg1: i32, %arg2: i32) -> (i32, i32) {
    %c0_i32 = arith.constant 0 : i32
    return %arg0, %arg2 : i32, i32
  }
  func.func @transform_1(%arg0: i32, %arg1: i32, %arg2: i32) -> (i32, i32) {
    %c0_i32 = arith.constant 0 : i32
    return %arg2, %arg1 : i32, i32
  }
  func.func @transform_2(%arg0: i32, %arg1: i32, %arg2: i32) -> (i32, i32) {
    %c0_i32 = arith.constant 0 : i32
    %c0_i32_0 = arith.constant 0 : i32
    return %c0_i32, %arg1 : i32, i32
  }
  func.func @transform_3(%arg0: i32, %arg1: i32, %arg2: i32) -> (i32, i32) {
    %c0_i32 = arith.constant 0 : i32
    return %arg0, %arg1 : i32, i32
  }
}

module attributes {stable_mosaic.version = 11 : i64} {
  func.func @_mm_bias_kernel(%arg0: i32, %arg1: i32, %arg2: i32, %arg3: memref<8x128xbf16, #tpu.memory_space<vmem>>, %arg4: memref<128x128xbf16, #tpu.memory_space<vmem>>, %arg5: memref<1x128xf32, #tpu.memory_space<vmem>>, %arg6: memref<8x128xbf16, #tpu.memory_space<vmem>>, %arg7: memref<8x128xf32, #tpu.memory_space<vmem>>) attributes {dimension_semantics = [#tpu.dimension_semantics<parallel>, #tpu.dimension_semantics<parallel>, #tpu.dimension_semantics<arbitrary>], iteration_bounds = array<i64: 1, 1, 1>, scalar_prefetch = 0 : i64, scratch_operands = 1 : i64, tpu.core_type = #tpu.core_type<tc>, window_params = [{transform_indices = @transform_0, window_bounds = array<i64: 8, 128>}, {transform_indices = @transform_1, window_bounds = array<i64: 128, 128>}, {transform_indices = @transform_2, window_bounds = array<i64: 1, 128>}, {transform_indices = @transform_3, window_bounds = array<i64: 8, 128>}]} {
    %c0_i32 = arith.constant 0 : i32
    %0 = arith.cmpi eq, %arg2, %c0_i32 : i32
    %1 = arith.extui %0 : i1 to i32
    %c0_i32_0 = arith.constant 0 : i32
    %2 = arith.cmpi ne, %1, %c0_i32_0 : i32
    scf.if %2 {
      %cst_10 = arith.constant 0.000000e+00 : f32
      %12 = vector.broadcast %cst_10 : f32 to vector<8x128xf32>
      %c0_11 = arith.constant 0 : index
      %c0_12 = arith.constant 0 : index
      %13 = vector.load %arg7[%c0_11, %c0_12] : memref<8x128xf32, #tpu.memory_space<vmem>>, vector<8x128xf32>
      tpu.vector_store %arg7[%c0_11, %c0_12], %12 {strides = array<i32>} : memref<8x128xf32, #tpu.memory_space<vmem>>, vector<8x128xf32>,
    } else {
    }
    %c0 = arith.constant 0 : index
    %c0_1 = arith.constant 0 : index
    %3 = vector.load %arg7[%c0, %c0_1] : memref<8x128xf32, #tpu.memory_space<vmem>>, vector<8x128xf32>
    %c0_2 = arith.constant 0 : index
    %c0_3 = arith.constant 0 : index
    %4 = vector.load %arg3[%c0_2, %c0_3] : memref<8x128xbf16, #tpu.memory_space<vmem>>, vector<8x128xbf16>
    %c0_4 = arith.constant 0 : index
    %c0_5 = arith.constant 0 : index
    %5 = vector.load %arg4[%c0_4, %c0_5] : memref<128x128xbf16, #tpu.memory_space<vmem>>, vector<128x128xbf16>
    %cst = arith.constant dense<0.000000e+00> : vector<8x128xf32>
    %6 = tpu.matmul %4, %5, %cst {dimension_numbers = #tpu.dot_dimension_numbers<[1], [0], [0], [1], [0, 0, 1, 1], [], []>} : vector<8x128xbf16>, vector<128x128xbf16>, vector<8x128xf32> -> vector<8x128xf32>
    %7 = arith.addf %3, %6 : vector<8x128xf32>
    %c0_6 = arith.constant 0 : index
    %c0_7 = arith.constant 0 : index
    %8 = vector.load %arg7[%c0_6, %c0_7] : memref<8x128xf32, #tpu.memory_space<vmem>>, vector<8x128xf32>
    tpu.vector_store %arg7[%c0_6, %c0_7], %7 {strides = array<i32>} : memref<8x128xf32, #tpu.memory_space<vmem>>, vector<8x128xf32>,
    %c0_i32_8 = arith.constant 0 : i32
    %9 = arith.cmpi eq, %arg2, %c0_i32_8 : i32
    %10 = arith.extui %9 : i1 to i32
    %c0_i32_9 = arith.constant 0 : i32
    %11 = arith.cmpi ne, %10, %c0_i32_9 : i32
    scf.if %11 {
      %c0_10 = arith.constant 0 : index
      %c0_11 = arith.constant 0 : index
      %12 = vector.load %arg7[%c0_10, %c0_11] : memref<8x128xf32, #tpu.memory_space<vmem>>, vector<8x128xf32>
      %c0_12 = arith.constant 0 : index
      %c0_13 = arith.constant 0 : index
      %13 = vector.load %arg5[%c0_12, %c0_13] : memref<1x128xf32, #tpu.memory_space<vmem>>, vector<1x128xf32>
      %14 = vector.broadcast %13 : vector<1x128xf32> to vector<8x128xf32>
      %15 = arith.addf %12, %14 : vector<8x128xf32>
      %16 = arith.truncf %15 : vector<8x128xf32> to vector<8x128xbf16>
      %c0_14 = arith.constant 0 : index
      %c0_15 = arith.constant 0 : index
      %17 = vector.load %arg6[%c0_14, %c0_15] : memref<8x128xbf16, #tpu.memory_space<vmem>>, vector<8x128xbf16>
      tpu.vector_store %arg6[%c0_14, %c0_15], %16 {strides = array<i32>} : memref<8x128xbf16, #tpu.memory_space<vmem>>, vector<8x128xbf16>,
    } else {
    }
    return
  }
  func.func @transform_0(%arg0: i32, %arg1: i32, %arg2: i32) -> (i32, i32) {
    %c0_i32 = arith.constant 0 : i32
    return %arg0, %arg2 : i32, i32
  }
  func.func @transform_1(%arg0: i32, %arg1: i32, %arg2: i32) -> (i32, i32) {
    %c0_i32 = arith.constant 0 : i32
    return %arg2, %arg1 : i32, i32
  }
  func.func @transform_2(%arg0: i32, %arg1: i32, %arg2: i32) -> (i32, i32) {
    %c0_i32 = arith.constant 0 : i32
    %c0_i32_0 = arith.constant 0 : i32
    return %c0_i32, %arg1 : i32, i32
  }
  func.func @transform_3(%arg0: i32, %arg1: i32, %arg2: i32) -> (i32, i32) {
    %c0_i32 = arith.constant 0 : i32
    return %arg0, %arg1 : i32, i32
  }
}

module attributes {stable_mosaic.version = 11 : i64} {
  func.func @_mm_bias_res_kernel(%arg0: i32, %arg1: i32, %arg2: i32, %arg3: memref<8x128xbf16, #tpu.memory_space<vmem>>, %arg4: memref<128x128xbf16, #tpu.memory_space<vmem>>, %arg5: memref<1x128xf32, #tpu.memory_space<vmem>>, %arg6: memref<8x128xbf16, #tpu.memory_space<vmem>>, %arg7: memref<8x128xbf16, #tpu.memory_space<vmem>>, %arg8: memref<8x128xf32, #tpu.memory_space<vmem>>) attributes {dimension_semantics = [#tpu.dimension_semantics<parallel>, #tpu.dimension_semantics<parallel>, #tpu.dimension_semantics<arbitrary>], iteration_bounds = array<i64: 1, 1, 9>, scalar_prefetch = 0 : i64, scratch_operands = 1 : i64, tpu.core_type = #tpu.core_type<tc>, window_params = [{transform_indices = @transform_0, window_bounds = array<i64: 8, 128>}, {transform_indices = @transform_1, window_bounds = array<i64: 128, 128>}, {transform_indices = @transform_2, window_bounds = array<i64: 1, 128>}, {transform_indices = @transform_3, window_bounds = array<i64: 8, 128>}, {transform_indices = @transform_4, window_bounds = array<i64: 8, 128>}]} {
    %c0_i32 = arith.constant 0 : i32
    %0 = arith.cmpi eq, %arg2, %c0_i32 : i32
    %1 = arith.extui %0 : i1 to i32
    %c0_i32_0 = arith.constant 0 : i32
    %2 = arith.cmpi ne, %1, %c0_i32_0 : i32
    scf.if %2 {
      %cst_9 = arith.constant 0.000000e+00 : f32
      %12 = vector.broadcast %cst_9 : f32 to vector<8x128xf32>
      %c0_10 = arith.constant 0 : index
      %c0_11 = arith.constant 0 : index
      %13 = vector.load %arg8[%c0_10, %c0_11] : memref<8x128xf32, #tpu.memory_space<vmem>>, vector<8x128xf32>
      tpu.vector_store %arg8[%c0_10, %c0_11], %12 {strides = array<i32>} : memref<8x128xf32, #tpu.memory_space<vmem>>, vector<8x128xf32>,
    } else {
    }
    %c0 = arith.constant 0 : index
    %c0_1 = arith.constant 0 : index
    %3 = vector.load %arg8[%c0, %c0_1] : memref<8x128xf32, #tpu.memory_space<vmem>>, vector<8x128xf32>
    %c0_2 = arith.constant 0 : index
    %c0_3 = arith.constant 0 : index
    %4 = vector.load %arg3[%c0_2, %c0_3] : memref<8x128xbf16, #tpu.memory_space<vmem>>, vector<8x128xbf16>
    %c0_4 = arith.constant 0 : index
    %c0_5 = arith.constant 0 : index
    %5 = vector.load %arg4[%c0_4, %c0_5] : memref<128x128xbf16, #tpu.memory_space<vmem>>, vector<128x128xbf16>
    %cst = arith.constant dense<0.000000e+00> : vector<8x128xf32>
    %6 = tpu.matmul %4, %5, %cst {dimension_numbers = #tpu.dot_dimension_numbers<[1], [0], [0], [1], [0, 0, 1, 1], [], []>} : vector<8x128xbf16>, vector<128x128xbf16>, vector<8x128xf32> -> vector<8x128xf32>
    %7 = arith.addf %3, %6 : vector<8x128xf32>
    %c0_6 = arith.constant 0 : index
    %c0_7 = arith.constant 0 : index
    %8 = vector.load %arg8[%c0_6, %c0_7] : memref<8x128xf32, #tpu.memory_space<vmem>>, vector<8x128xf32>
    tpu.vector_store %arg8[%c0_6, %c0_7], %7 {strides = array<i32>} : memref<8x128xf32, #tpu.memory_space<vmem>>, vector<8x128xf32>,
    %c8_i32 = arith.constant 8 : i32
    %9 = arith.cmpi eq, %arg2, %c8_i32 : i32
    %10 = arith.extui %9 : i1 to i32
    %c0_i32_8 = arith.constant 0 : i32
    %11 = arith.cmpi ne, %10, %c0_i32_8 : i32
    scf.if %11 {
      %c0_9 = arith.constant 0 : index
      %c0_10 = arith.constant 0 : index
      %12 = vector.load %arg8[%c0_9, %c0_10] : memref<8x128xf32, #tpu.memory_space<vmem>>, vector<8x128xf32>
      %c0_11 = arith.constant 0 : index
      %c0_12 = arith.constant 0 : index
      %13 = vector.load %arg5[%c0_11, %c0_12] : memref<1x128xf32, #tpu.memory_space<vmem>>, vector<1x128xf32>
      %14 = vector.broadcast %13 : vector<1x128xf32> to vector<8x128xf32>
      %15 = arith.addf %12, %14 : vector<8x128xf32>
      %c0_13 = arith.constant 0 : index
      %c0_14 = arith.constant 0 : index
      %16 = vector.load %arg6[%c0_13, %c0_14] : memref<8x128xbf16, #tpu.memory_space<vmem>>, vector<8x128xbf16>
      %17 = arith.extf %16 : vector<8x128xbf16> to vector<8x128xf32>
      %18 = arith.addf %15, %17 : vector<8x128xf32>
      %cst_15 = arith.constant 0.000000e+00 : f32
      %19 = vector.broadcast %cst_15 : f32 to vector<8x128xf32>
      %20 = arith.maximumf %18, %19 : vector<8x128xf32>
      %21 = arith.truncf %20 : vector<8x128xf32> to vector<8x128xbf16>
      %c0_16 = arith.constant 0 : index
      %c0_17 = arith.constant 0 : index
      %22 = vector.load %arg7[%c0_16, %c0_17] : memref<8x128xbf16, #tpu.memory_space<vmem>>, vector<8x128xbf16>
      tpu.vector_store %arg7[%c0_16, %c0_17], %21 {strides = array<i32>} : memref<8x128xbf16, #tpu.memory_space<vmem>>, vector<8x128xbf16>,
    } else {
    }
    return
  }
  func.func @transform_0(%arg0: i32, %arg1: i32, %arg2: i32) -> (i32, i32) {
    %c0_i32 = arith.constant 0 : i32
    return %arg0, %arg2 : i32, i32
  }
  func.func @transform_1(%arg0: i32, %arg1: i32, %arg2: i32) -> (i32, i32) {
    %c0_i32 = arith.constant 0 : i32
    return %arg2, %arg1 : i32, i32
  }
  func.func @transform_2(%arg0: i32, %arg1: i32, %arg2: i32) -> (i32, i32) {
    %c0_i32 = arith.constant 0 : i32
    %c0_i32_0 = arith.constant 0 : i32
    return %c0_i32, %arg1 : i32, i32
  }
  func.func @transform_3(%arg0: i32, %arg1: i32, %arg2: i32) -> (i32, i32) {
    %c0_i32 = arith.constant 0 : i32
    return %arg0, %arg1 : i32, i32
  }
  func.func @transform_4(%arg0: i32, %arg1: i32, %arg2: i32) -> (i32, i32) {
    %c0_i32 = arith.constant 0 : i32
    return %arg0, %arg1 : i32, i32
  }
}

module attributes {stable_mosaic.version = 11 : i64} {
  func.func @_mm_bias_kernel(%arg0: i32, %arg1: i32, %arg2: i32, %arg3: memref<8x128xbf16, #tpu.memory_space<vmem>>, %arg4: memref<128x256xbf16, #tpu.memory_space<vmem>>, %arg5: memref<1x256xf32, #tpu.memory_space<vmem>>, %arg6: memref<8x256xbf16, #tpu.memory_space<vmem>>, %arg7: memref<8x256xf32, #tpu.memory_space<vmem>>) attributes {dimension_semantics = [#tpu.dimension_semantics<parallel>, #tpu.dimension_semantics<parallel>, #tpu.dimension_semantics<arbitrary>], iteration_bounds = array<i64: 1, 1, 9>, scalar_prefetch = 0 : i64, scratch_operands = 1 : i64, tpu.core_type = #tpu.core_type<tc>, window_params = [{transform_indices = @transform_0, window_bounds = array<i64: 8, 128>}, {transform_indices = @transform_1, window_bounds = array<i64: 128, 256>}, {transform_indices = @transform_2, window_bounds = array<i64: 1, 256>}, {transform_indices = @transform_3, window_bounds = array<i64: 8, 256>}]} {
    %c0_i32 = arith.constant 0 : i32
    %0 = arith.cmpi eq, %arg2, %c0_i32 : i32
    %1 = arith.extui %0 : i1 to i32
    %c0_i32_0 = arith.constant 0 : i32
    %2 = arith.cmpi ne, %1, %c0_i32_0 : i32
    scf.if %2 {
      %cst_9 = arith.constant 0.000000e+00 : f32
      %12 = vector.broadcast %cst_9 : f32 to vector<8x256xf32>
      %c0_10 = arith.constant 0 : index
      %c0_11 = arith.constant 0 : index
      %13 = vector.load %arg7[%c0_10, %c0_11] : memref<8x256xf32, #tpu.memory_space<vmem>>, vector<8x256xf32>
      tpu.vector_store %arg7[%c0_10, %c0_11], %12 {strides = array<i32>} : memref<8x256xf32, #tpu.memory_space<vmem>>, vector<8x256xf32>,
    } else {
    }
    %c0 = arith.constant 0 : index
    %c0_1 = arith.constant 0 : index
    %3 = vector.load %arg7[%c0, %c0_1] : memref<8x256xf32, #tpu.memory_space<vmem>>, vector<8x256xf32>
    %c0_2 = arith.constant 0 : index
    %c0_3 = arith.constant 0 : index
    %4 = vector.load %arg3[%c0_2, %c0_3] : memref<8x128xbf16, #tpu.memory_space<vmem>>, vector<8x128xbf16>
    %c0_4 = arith.constant 0 : index
    %c0_5 = arith.constant 0 : index
    %5 = vector.load %arg4[%c0_4, %c0_5] : memref<128x256xbf16, #tpu.memory_space<vmem>>, vector<128x256xbf16>
    %cst = arith.constant dense<0.000000e+00> : vector<8x256xf32>
    %6 = tpu.matmul %4, %5, %cst {dimension_numbers = #tpu.dot_dimension_numbers<[1], [0], [0], [1], [0, 0, 1, 1], [], []>} : vector<8x128xbf16>, vector<128x256xbf16>, vector<8x256xf32> -> vector<8x256xf32>
    %7 = arith.addf %3, %6 : vector<8x256xf32>
    %c0_6 = arith.constant 0 : index
    %c0_7 = arith.constant 0 : index
    %8 = vector.load %arg7[%c0_6, %c0_7] : memref<8x256xf32, #tpu.memory_space<vmem>>, vector<8x256xf32>
    tpu.vector_store %arg7[%c0_6, %c0_7], %7 {strides = array<i32>} : memref<8x256xf32, #tpu.memory_space<vmem>>, vector<8x256xf32>,
    %c8_i32 = arith.constant 8 : i32
    %9 = arith.cmpi eq, %arg2, %c8_i32 : i32
    %10 = arith.extui %9 : i1 to i32
    %c0_i32_8 = arith.constant 0 : i32
    %11 = arith.cmpi ne, %10, %c0_i32_8 : i32
    scf.if %11 {
      %c0_9 = arith.constant 0 : index
      %c0_10 = arith.constant 0 : index
      %12 = vector.load %arg7[%c0_9, %c0_10] : memref<8x256xf32, #tpu.memory_space<vmem>>, vector<8x256xf32>
      %c0_11 = arith.constant 0 : index
      %c0_12 = arith.constant 0 : index
      %13 = vector.load %arg5[%c0_11, %c0_12] : memref<1x256xf32, #tpu.memory_space<vmem>>, vector<1x256xf32>
      %14 = vector.broadcast %13 : vector<1x256xf32> to vector<8x256xf32>
      %15 = arith.addf %12, %14 : vector<8x256xf32>
      %cst_13 = arith.constant 0.000000e+00 : f32
      %16 = vector.broadcast %cst_13 : f32 to vector<8x256xf32>
      %17 = arith.maximumf %15, %16 : vector<8x256xf32>
      %18 = arith.truncf %17 : vector<8x256xf32> to vector<8x256xbf16>
      %c0_14 = arith.constant 0 : index
      %c0_15 = arith.constant 0 : index
      %19 = vector.load %arg6[%c0_14, %c0_15] : memref<8x256xbf16, #tpu.memory_space<vmem>>, vector<8x256xbf16>
      tpu.vector_store %arg6[%c0_14, %c0_15], %18 {strides = array<i32>} : memref<8x256xbf16, #tpu.memory_space<vmem>>, vector<8x256xbf16>,
    } else {
    }
    return
  }
  func.func @transform_0(%arg0: i32, %arg1: i32, %arg2: i32) -> (i32, i32) {
    %c0_i32 = arith.constant 0 : i32
    return %arg0, %arg2 : i32, i32
  }
  func.func @transform_1(%arg0: i32, %arg1: i32, %arg2: i32) -> (i32, i32) {
    %c0_i32 = arith.constant 0 : i32
    return %arg2, %arg1 : i32, i32
  }
  func.func @transform_2(%arg0: i32, %arg1: i32, %arg2: i32) -> (i32, i32) {
    %c0_i32 = arith.constant 0 : i32
    %c0_i32_0 = arith.constant 0 : i32
    return %c0_i32, %arg1 : i32, i32
  }
  func.func @transform_3(%arg0: i32, %arg1: i32, %arg2: i32) -> (i32, i32) {
    %c0_i32 = arith.constant 0 : i32
    return %arg0, %arg1 : i32, i32
  }
}

module attributes {stable_mosaic.version = 11 : i64} {
  func.func @_mm_bias_kernel(%arg0: i32, %arg1: i32, %arg2: i32, %arg3: memref<8x128xbf16, #tpu.memory_space<vmem>>, %arg4: memref<128x256xbf16, #tpu.memory_space<vmem>>, %arg5: memref<1x256xf32, #tpu.memory_space<vmem>>, %arg6: memref<8x256xbf16, #tpu.memory_space<vmem>>, %arg7: memref<8x256xf32, #tpu.memory_space<vmem>>) attributes {dimension_semantics = [#tpu.dimension_semantics<parallel>, #tpu.dimension_semantics<parallel>, #tpu.dimension_semantics<arbitrary>], iteration_bounds = array<i64: 1, 1, 1>, scalar_prefetch = 0 : i64, scratch_operands = 1 : i64, tpu.core_type = #tpu.core_type<tc>, window_params = [{transform_indices = @transform_0, window_bounds = array<i64: 8, 128>}, {transform_indices = @transform_1, window_bounds = array<i64: 128, 256>}, {transform_indices = @transform_2, window_bounds = array<i64: 1, 256>}, {transform_indices = @transform_3, window_bounds = array<i64: 8, 256>}]} {
    %c0_i32 = arith.constant 0 : i32
    %0 = arith.cmpi eq, %arg2, %c0_i32 : i32
    %1 = arith.extui %0 : i1 to i32
    %c0_i32_0 = arith.constant 0 : i32
    %2 = arith.cmpi ne, %1, %c0_i32_0 : i32
    scf.if %2 {
      %cst_10 = arith.constant 0.000000e+00 : f32
      %12 = vector.broadcast %cst_10 : f32 to vector<8x256xf32>
      %c0_11 = arith.constant 0 : index
      %c0_12 = arith.constant 0 : index
      %13 = vector.load %arg7[%c0_11, %c0_12] : memref<8x256xf32, #tpu.memory_space<vmem>>, vector<8x256xf32>
      tpu.vector_store %arg7[%c0_11, %c0_12], %12 {strides = array<i32>} : memref<8x256xf32, #tpu.memory_space<vmem>>, vector<8x256xf32>,
    } else {
    }
    %c0 = arith.constant 0 : index
    %c0_1 = arith.constant 0 : index
    %3 = vector.load %arg7[%c0, %c0_1] : memref<8x256xf32, #tpu.memory_space<vmem>>, vector<8x256xf32>
    %c0_2 = arith.constant 0 : index
    %c0_3 = arith.constant 0 : index
    %4 = vector.load %arg3[%c0_2, %c0_3] : memref<8x128xbf16, #tpu.memory_space<vmem>>, vector<8x128xbf16>
    %c0_4 = arith.constant 0 : index
    %c0_5 = arith.constant 0 : index
    %5 = vector.load %arg4[%c0_4, %c0_5] : memref<128x256xbf16, #tpu.memory_space<vmem>>, vector<128x256xbf16>
    %cst = arith.constant dense<0.000000e+00> : vector<8x256xf32>
    %6 = tpu.matmul %4, %5, %cst {dimension_numbers = #tpu.dot_dimension_numbers<[1], [0], [0], [1], [0, 0, 1, 1], [], []>} : vector<8x128xbf16>, vector<128x256xbf16>, vector<8x256xf32> -> vector<8x256xf32>
    %7 = arith.addf %3, %6 : vector<8x256xf32>
    %c0_6 = arith.constant 0 : index
    %c0_7 = arith.constant 0 : index
    %8 = vector.load %arg7[%c0_6, %c0_7] : memref<8x256xf32, #tpu.memory_space<vmem>>, vector<8x256xf32>
    tpu.vector_store %arg7[%c0_6, %c0_7], %7 {strides = array<i32>} : memref<8x256xf32, #tpu.memory_space<vmem>>, vector<8x256xf32>,
    %c0_i32_8 = arith.constant 0 : i32
    %9 = arith.cmpi eq, %arg2, %c0_i32_8 : i32
    %10 = arith.extui %9 : i1 to i32
    %c0_i32_9 = arith.constant 0 : i32
    %11 = arith.cmpi ne, %10, %c0_i32_9 : i32
    scf.if %11 {
      %c0_10 = arith.constant 0 : index
      %c0_11 = arith.constant 0 : index
      %12 = vector.load %arg7[%c0_10, %c0_11] : memref<8x256xf32, #tpu.memory_space<vmem>>, vector<8x256xf32>
      %c0_12 = arith.constant 0 : index
      %c0_13 = arith.constant 0 : index
      %13 = vector.load %arg5[%c0_12, %c0_13] : memref<1x256xf32, #tpu.memory_space<vmem>>, vector<1x256xf32>
      %14 = vector.broadcast %13 : vector<1x256xf32> to vector<8x256xf32>
      %15 = arith.addf %12, %14 : vector<8x256xf32>
      %16 = arith.truncf %15 : vector<8x256xf32> to vector<8x256xbf16>
      %c0_14 = arith.constant 0 : index
      %c0_15 = arith.constant 0 : index
      %17 = vector.load %arg6[%c0_14, %c0_15] : memref<8x256xbf16, #tpu.memory_space<vmem>>, vector<8x256xbf16>
      tpu.vector_store %arg6[%c0_14, %c0_15], %16 {strides = array<i32>} : memref<8x256xbf16, #tpu.memory_space<vmem>>, vector<8x256xbf16>,
    } else {
    }
    return
  }
  func.func @transform_0(%arg0: i32, %arg1: i32, %arg2: i32) -> (i32, i32) {
    %c0_i32 = arith.constant 0 : i32
    return %arg0, %arg2 : i32, i32
  }
  func.func @transform_1(%arg0: i32, %arg1: i32, %arg2: i32) -> (i32, i32) {
    %c0_i32 = arith.constant 0 : i32
    return %arg2, %arg1 : i32, i32
  }
  func.func @transform_2(%arg0: i32, %arg1: i32, %arg2: i32) -> (i32, i32) {
    %c0_i32 = arith.constant 0 : i32
    %c0_i32_0 = arith.constant 0 : i32
    return %c0_i32, %arg1 : i32, i32
  }
  func.func @transform_3(%arg0: i32, %arg1: i32, %arg2: i32) -> (i32, i32) {
    %c0_i32 = arith.constant 0 : i32
    return %arg0, %arg1 : i32, i32
  }
}

module attributes {stable_mosaic.version = 11 : i64} {
  func.func @_mm_bias_res_kernel(%arg0: i32, %arg1: i32, %arg2: i32, %arg3: memref<8x256xbf16, #tpu.memory_space<vmem>>, %arg4: memref<256x256xbf16, #tpu.memory_space<vmem>>, %arg5: memref<1x256xf32, #tpu.memory_space<vmem>>, %arg6: memref<8x256xbf16, #tpu.memory_space<vmem>>, %arg7: memref<8x256xbf16, #tpu.memory_space<vmem>>, %arg8: memref<8x256xf32, #tpu.memory_space<vmem>>) attributes {dimension_semantics = [#tpu.dimension_semantics<parallel>, #tpu.dimension_semantics<parallel>, #tpu.dimension_semantics<arbitrary>], iteration_bounds = array<i64: 1, 1, 9>, scalar_prefetch = 0 : i64, scratch_operands = 1 : i64, tpu.core_type = #tpu.core_type<tc>, window_params = [{transform_indices = @transform_0, window_bounds = array<i64: 8, 256>}, {transform_indices = @transform_1, window_bounds = array<i64: 256, 256>}, {transform_indices = @transform_2, window_bounds = array<i64: 1, 256>}, {transform_indices = @transform_3, window_bounds = array<i64: 8, 256>}, {transform_indices = @transform_4, window_bounds = array<i64: 8, 256>}]} {
    %c0_i32 = arith.constant 0 : i32
    %0 = arith.cmpi eq, %arg2, %c0_i32 : i32
    %1 = arith.extui %0 : i1 to i32
    %c0_i32_0 = arith.constant 0 : i32
    %2 = arith.cmpi ne, %1, %c0_i32_0 : i32
    scf.if %2 {
      %cst_9 = arith.constant 0.000000e+00 : f32
      %12 = vector.broadcast %cst_9 : f32 to vector<8x256xf32>
      %c0_10 = arith.constant 0 : index
      %c0_11 = arith.constant 0 : index
      %13 = vector.load %arg8[%c0_10, %c0_11] : memref<8x256xf32, #tpu.memory_space<vmem>>, vector<8x256xf32>
      tpu.vector_store %arg8[%c0_10, %c0_11], %12 {strides = array<i32>} : memref<8x256xf32, #tpu.memory_space<vmem>>, vector<8x256xf32>,
    } else {
    }
    %c0 = arith.constant 0 : index
    %c0_1 = arith.constant 0 : index
    %3 = vector.load %arg8[%c0, %c0_1] : memref<8x256xf32, #tpu.memory_space<vmem>>, vector<8x256xf32>
    %c0_2 = arith.constant 0 : index
    %c0_3 = arith.constant 0 : index
    %4 = vector.load %arg3[%c0_2, %c0_3] : memref<8x256xbf16, #tpu.memory_space<vmem>>, vector<8x256xbf16>
    %c0_4 = arith.constant 0 : index
    %c0_5 = arith.constant 0 : index
    %5 = vector.load %arg4[%c0_4, %c0_5] : memref<256x256xbf16, #tpu.memory_space<vmem>>, vector<256x256xbf16>
    %cst = arith.constant dense<0.000000e+00> : vector<8x256xf32>
    %6 = tpu.matmul %4, %5, %cst {dimension_numbers = #tpu.dot_dimension_numbers<[1], [0], [0], [1], [0, 0, 1, 1], [], []>} : vector<8x256xbf16>, vector<256x256xbf16>, vector<8x256xf32> -> vector<8x256xf32>
    %7 = arith.addf %3, %6 : vector<8x256xf32>
    %c0_6 = arith.constant 0 : index
    %c0_7 = arith.constant 0 : index
    %8 = vector.load %arg8[%c0_6, %c0_7] : memref<8x256xf32, #tpu.memory_space<vmem>>, vector<8x256xf32>
    tpu.vector_store %arg8[%c0_6, %c0_7], %7 {strides = array<i32>} : memref<8x256xf32, #tpu.memory_space<vmem>>, vector<8x256xf32>,
    %c8_i32 = arith.constant 8 : i32
    %9 = arith.cmpi eq, %arg2, %c8_i32 : i32
    %10 = arith.extui %9 : i1 to i32
    %c0_i32_8 = arith.constant 0 : i32
    %11 = arith.cmpi ne, %10, %c0_i32_8 : i32
    scf.if %11 {
      %c0_9 = arith.constant 0 : index
      %c0_10 = arith.constant 0 : index
      %12 = vector.load %arg8[%c0_9, %c0_10] : memref<8x256xf32, #tpu.memory_space<vmem>>, vector<8x256xf32>
      %c0_11 = arith.constant 0 : index
      %c0_12 = arith.constant 0 : index
      %13 = vector.load %arg5[%c0_11, %c0_12] : memref<1x256xf32, #tpu.memory_space<vmem>>, vector<1x256xf32>
      %14 = vector.broadcast %13 : vector<1x256xf32> to vector<8x256xf32>
      %15 = arith.addf %12, %14 : vector<8x256xf32>
      %c0_13 = arith.constant 0 : index
      %c0_14 = arith.constant 0 : index
      %16 = vector.load %arg6[%c0_13, %c0_14] : memref<8x256xbf16, #tpu.memory_space<vmem>>, vector<8x256xbf16>
      %17 = arith.extf %16 : vector<8x256xbf16> to vector<8x256xf32>
      %18 = arith.addf %15, %17 : vector<8x256xf32>
      %cst_15 = arith.constant 0.000000e+00 : f32
      %19 = vector.broadcast %cst_15 : f32 to vector<8x256xf32>
      %20 = arith.maximumf %18, %19 : vector<8x256xf32>
      %21 = arith.truncf %20 : vector<8x256xf32> to vector<8x256xbf16>
      %c0_16 = arith.constant 0 : index
      %c0_17 = arith.constant 0 : index
      %22 = vector.load %arg7[%c0_16, %c0_17] : memref<8x256xbf16, #tpu.memory_space<vmem>>, vector<8x256xbf16>
      tpu.vector_store %arg7[%c0_16, %c0_17], %21 {strides = array<i32>} : memref<8x256xbf16, #tpu.memory_space<vmem>>, vector<8x256xbf16>,
    } else {
    }
    return
  }
  func.func @transform_0(%arg0: i32, %arg1: i32, %arg2: i32) -> (i32, i32) {
    %c0_i32 = arith.constant 0 : i32
    return %arg0, %arg2 : i32, i32
  }
  func.func @transform_1(%arg0: i32, %arg1: i32, %arg2: i32) -> (i32, i32) {
    %c0_i32 = arith.constant 0 : i32
    return %arg2, %arg1 : i32, i32
  }
  func.func @transform_2(%arg0: i32, %arg1: i32, %arg2: i32) -> (i32, i32) {
    %c0_i32 = arith.constant 0 : i32
    %c0_i32_0 = arith.constant 0 : i32
    return %c0_i32, %arg1 : i32, i32
  }
  func.func @transform_3(%arg0: i32, %arg1: i32, %arg2: i32) -> (i32, i32) {
    %c0_i32 = arith.constant 0 : i32
    return %arg0, %arg1 : i32, i32
  }
  func.func @transform_4(%arg0: i32, %arg1: i32, %arg2: i32) -> (i32, i32) {
    %c0_i32 = arith.constant 0 : i32
    return %arg0, %arg1 : i32, i32
  }
}

module attributes {stable_mosaic.version = 11 : i64} {
  func.func @_mm_bias_kernel(%arg0: i32, %arg1: i32, %arg2: i32, %arg3: memref<8x256xbf16, #tpu.memory_space<vmem>>, %arg4: memref<256x256xbf16, #tpu.memory_space<vmem>>, %arg5: memref<1x256xf32, #tpu.memory_space<vmem>>, %arg6: memref<8x256xbf16, #tpu.memory_space<vmem>>, %arg7: memref<8x256xf32, #tpu.memory_space<vmem>>) attributes {dimension_semantics = [#tpu.dimension_semantics<parallel>, #tpu.dimension_semantics<parallel>, #tpu.dimension_semantics<arbitrary>], iteration_bounds = array<i64: 1, 1, 9>, scalar_prefetch = 0 : i64, scratch_operands = 1 : i64, tpu.core_type = #tpu.core_type<tc>, window_params = [{transform_indices = @transform_0, window_bounds = array<i64: 8, 256>}, {transform_indices = @transform_1, window_bounds = array<i64: 256, 256>}, {transform_indices = @transform_2, window_bounds = array<i64: 1, 256>}, {transform_indices = @transform_3, window_bounds = array<i64: 8, 256>}]} {
    %c0_i32 = arith.constant 0 : i32
    %0 = arith.cmpi eq, %arg2, %c0_i32 : i32
    %1 = arith.extui %0 : i1 to i32
    %c0_i32_0 = arith.constant 0 : i32
    %2 = arith.cmpi ne, %1, %c0_i32_0 : i32
    scf.if %2 {
      %cst_9 = arith.constant 0.000000e+00 : f32
      %12 = vector.broadcast %cst_9 : f32 to vector<8x256xf32>
      %c0_10 = arith.constant 0 : index
      %c0_11 = arith.constant 0 : index
      %13 = vector.load %arg7[%c0_10, %c0_11] : memref<8x256xf32, #tpu.memory_space<vmem>>, vector<8x256xf32>
      tpu.vector_store %arg7[%c0_10, %c0_11], %12 {strides = array<i32>} : memref<8x256xf32, #tpu.memory_space<vmem>>, vector<8x256xf32>,
    } else {
    }
    %c0 = arith.constant 0 : index
    %c0_1 = arith.constant 0 : index
    %3 = vector.load %arg7[%c0, %c0_1] : memref<8x256xf32, #tpu.memory_space<vmem>>, vector<8x256xf32>
    %c0_2 = arith.constant 0 : index
    %c0_3 = arith.constant 0 : index
    %4 = vector.load %arg3[%c0_2, %c0_3] : memref<8x256xbf16, #tpu.memory_space<vmem>>, vector<8x256xbf16>
    %c0_4 = arith.constant 0 : index
    %c0_5 = arith.constant 0 : index
    %5 = vector.load %arg4[%c0_4, %c0_5] : memref<256x256xbf16, #tpu.memory_space<vmem>>, vector<256x256xbf16>
    %cst = arith.constant dense<0.000000e+00> : vector<8x256xf32>
    %6 = tpu.matmul %4, %5, %cst {dimension_numbers = #tpu.dot_dimension_numbers<[1], [0], [0], [1], [0, 0, 1, 1], [], []>} : vector<8x256xbf16>, vector<256x256xbf16>, vector<8x256xf32> -> vector<8x256xf32>
    %7 = arith.addf %3, %6 : vector<8x256xf32>
    %c0_6 = arith.constant 0 : index
    %c0_7 = arith.constant 0 : index
    %8 = vector.load %arg7[%c0_6, %c0_7] : memref<8x256xf32, #tpu.memory_space<vmem>>, vector<8x256xf32>
    tpu.vector_store %arg7[%c0_6, %c0_7], %7 {strides = array<i32>} : memref<8x256xf32, #tpu.memory_space<vmem>>, vector<8x256xf32>,
    %c8_i32 = arith.constant 8 : i32
    %9 = arith.cmpi eq, %arg2, %c8_i32 : i32
    %10 = arith.extui %9 : i1 to i32
    %c0_i32_8 = arith.constant 0 : i32
    %11 = arith.cmpi ne, %10, %c0_i32_8 : i32
    scf.if %11 {
      %c0_9 = arith.constant 0 : index
      %c0_10 = arith.constant 0 : index
      %12 = vector.load %arg7[%c0_9, %c0_10] : memref<8x256xf32, #tpu.memory_space<vmem>>, vector<8x256xf32>
      %c0_11 = arith.constant 0 : index
      %c0_12 = arith.constant 0 : index
      %13 = vector.load %arg5[%c0_11, %c0_12] : memref<1x256xf32, #tpu.memory_space<vmem>>, vector<1x256xf32>
      %14 = vector.broadcast %13 : vector<1x256xf32> to vector<8x256xf32>
      %15 = arith.addf %12, %14 : vector<8x256xf32>
      %cst_13 = arith.constant 0.000000e+00 : f32
      %16 = vector.broadcast %cst_13 : f32 to vector<8x256xf32>
      %17 = arith.maximumf %15, %16 : vector<8x256xf32>
      %18 = arith.truncf %17 : vector<8x256xf32> to vector<8x256xbf16>
      %c0_14 = arith.constant 0 : index
      %c0_15 = arith.constant 0 : index
      %19 = vector.load %arg6[%c0_14, %c0_15] : memref<8x256xbf16, #tpu.memory_space<vmem>>, vector<8x256xbf16>
      tpu.vector_store %arg6[%c0_14, %c0_15], %18 {strides = array<i32>} : memref<8x256xbf16, #tpu.memory_space<vmem>>, vector<8x256xbf16>,
    } else {
    }
    return
  }
  func.func @transform_0(%arg0: i32, %arg1: i32, %arg2: i32) -> (i32, i32) {
    %c0_i32 = arith.constant 0 : i32
    return %arg0, %arg2 : i32, i32
  }
  func.func @transform_1(%arg0: i32, %arg1: i32, %arg2: i32) -> (i32, i32) {
    %c0_i32 = arith.constant 0 : i32
    return %arg2, %arg1 : i32, i32
  }
  func.func @transform_2(%arg0: i32, %arg1: i32, %arg2: i32) -> (i32, i32) {
    %c0_i32 = arith.constant 0 : i32
    %c0_i32_0 = arith.constant 0 : i32
    return %c0_i32, %arg1 : i32, i32
  }
  func.func @transform_3(%arg0: i32, %arg1: i32, %arg2: i32) -> (i32, i32) {
    %c0_i32 = arith.constant 0 : i32
    return %arg0, %arg1 : i32, i32
  }
}

module attributes {stable_mosaic.version = 11 : i64} {
  func.func @_mm_bias_kernel(%arg0: i32, %arg1: i32, %arg2: i32, %arg3: memref<8x256xbf16, #tpu.memory_space<vmem>>, %arg4: memref<256x256xbf16, #tpu.memory_space<vmem>>, %arg5: memref<1x256xf32, #tpu.memory_space<vmem>>, %arg6: memref<8x256xbf16, #tpu.memory_space<vmem>>, %arg7: memref<8x256xf32, #tpu.memory_space<vmem>>) attributes {dimension_semantics = [#tpu.dimension_semantics<parallel>, #tpu.dimension_semantics<parallel>, #tpu.dimension_semantics<arbitrary>], iteration_bounds = array<i64: 1, 2, 9>, scalar_prefetch = 0 : i64, scratch_operands = 1 : i64, tpu.core_type = #tpu.core_type<tc>, window_params = [{transform_indices = @transform_0, window_bounds = array<i64: 8, 256>}, {transform_indices = @transform_1, window_bounds = array<i64: 256, 256>}, {transform_indices = @transform_2, window_bounds = array<i64: 1, 256>}, {transform_indices = @transform_3, window_bounds = array<i64: 8, 256>}]} {
    %c0_i32 = arith.constant 0 : i32
    %0 = arith.cmpi eq, %arg2, %c0_i32 : i32
    %1 = arith.extui %0 : i1 to i32
    %c0_i32_0 = arith.constant 0 : i32
    %2 = arith.cmpi ne, %1, %c0_i32_0 : i32
    scf.if %2 {
      %cst_9 = arith.constant 0.000000e+00 : f32
      %12 = vector.broadcast %cst_9 : f32 to vector<8x256xf32>
      %c0_10 = arith.constant 0 : index
      %c0_11 = arith.constant 0 : index
      %13 = vector.load %arg7[%c0_10, %c0_11] : memref<8x256xf32, #tpu.memory_space<vmem>>, vector<8x256xf32>
      tpu.vector_store %arg7[%c0_10, %c0_11], %12 {strides = array<i32>} : memref<8x256xf32, #tpu.memory_space<vmem>>, vector<8x256xf32>,
    } else {
    }
    %c0 = arith.constant 0 : index
    %c0_1 = arith.constant 0 : index
    %3 = vector.load %arg7[%c0, %c0_1] : memref<8x256xf32, #tpu.memory_space<vmem>>, vector<8x256xf32>
    %c0_2 = arith.constant 0 : index
    %c0_3 = arith.constant 0 : index
    %4 = vector.load %arg3[%c0_2, %c0_3] : memref<8x256xbf16, #tpu.memory_space<vmem>>, vector<8x256xbf16>
    %c0_4 = arith.constant 0 : index
    %c0_5 = arith.constant 0 : index
    %5 = vector.load %arg4[%c0_4, %c0_5] : memref<256x256xbf16, #tpu.memory_space<vmem>>, vector<256x256xbf16>
    %cst = arith.constant dense<0.000000e+00> : vector<8x256xf32>
    %6 = tpu.matmul %4, %5, %cst {dimension_numbers = #tpu.dot_dimension_numbers<[1], [0], [0], [1], [0, 0, 1, 1], [], []>} : vector<8x256xbf16>, vector<256x256xbf16>, vector<8x256xf32> -> vector<8x256xf32>
    %7 = arith.addf %3, %6 : vector<8x256xf32>
    %c0_6 = arith.constant 0 : index
    %c0_7 = arith.constant 0 : index
    %8 = vector.load %arg7[%c0_6, %c0_7] : memref<8x256xf32, #tpu.memory_space<vmem>>, vector<8x256xf32>
    tpu.vector_store %arg7[%c0_6, %c0_7], %7 {strides = array<i32>} : memref<8x256xf32, #tpu.memory_space<vmem>>, vector<8x256xf32>,
    %c8_i32 = arith.constant 8 : i32
    %9 = arith.cmpi eq, %arg2, %c8_i32 : i32
    %10 = arith.extui %9 : i1 to i32
    %c0_i32_8 = arith.constant 0 : i32
    %11 = arith.cmpi ne, %10, %c0_i32_8 : i32
    scf.if %11 {
      %c0_9 = arith.constant 0 : index
      %c0_10 = arith.constant 0 : index
      %12 = vector.load %arg7[%c0_9, %c0_10] : memref<8x256xf32, #tpu.memory_space<vmem>>, vector<8x256xf32>
      %c0_11 = arith.constant 0 : index
      %c0_12 = arith.constant 0 : index
      %13 = vector.load %arg5[%c0_11, %c0_12] : memref<1x256xf32, #tpu.memory_space<vmem>>, vector<1x256xf32>
      %14 = vector.broadcast %13 : vector<1x256xf32> to vector<8x256xf32>
      %15 = arith.addf %12, %14 : vector<8x256xf32>
      %cst_13 = arith.constant 0.000000e+00 : f32
      %16 = vector.broadcast %cst_13 : f32 to vector<8x256xf32>
      %17 = arith.maximumf %15, %16 : vector<8x256xf32>
      %18 = arith.truncf %17 : vector<8x256xf32> to vector<8x256xbf16>
      %c0_14 = arith.constant 0 : index
      %c0_15 = arith.constant 0 : index
      %19 = vector.load %arg6[%c0_14, %c0_15] : memref<8x256xbf16, #tpu.memory_space<vmem>>, vector<8x256xbf16>
      tpu.vector_store %arg6[%c0_14, %c0_15], %18 {strides = array<i32>} : memref<8x256xbf16, #tpu.memory_space<vmem>>, vector<8x256xbf16>,
    } else {
    }
    return
  }
  func.func @transform_0(%arg0: i32, %arg1: i32, %arg2: i32) -> (i32, i32) {
    %c0_i32 = arith.constant 0 : i32
    return %arg0, %arg2 : i32, i32
  }
  func.func @transform_1(%arg0: i32, %arg1: i32, %arg2: i32) -> (i32, i32) {
    %c0_i32 = arith.constant 0 : i32
    return %arg2, %arg1 : i32, i32
  }
  func.func @transform_2(%arg0: i32, %arg1: i32, %arg2: i32) -> (i32, i32) {
    %c0_i32 = arith.constant 0 : i32
    %c0_i32_0 = arith.constant 0 : i32
    return %c0_i32, %arg1 : i32, i32
  }
  func.func @transform_3(%arg0: i32, %arg1: i32, %arg2: i32) -> (i32, i32) {
    %c0_i32 = arith.constant 0 : i32
    return %arg0, %arg1 : i32, i32
  }
}

module attributes {stable_mosaic.version = 11 : i64} {
  func.func @_mm_bias_kernel(%arg0: i32, %arg1: i32, %arg2: i32, %arg3: memref<8x256xbf16, #tpu.memory_space<vmem>>, %arg4: memref<256x256xbf16, #tpu.memory_space<vmem>>, %arg5: memref<1x256xf32, #tpu.memory_space<vmem>>, %arg6: memref<8x256xbf16, #tpu.memory_space<vmem>>, %arg7: memref<8x256xf32, #tpu.memory_space<vmem>>) attributes {dimension_semantics = [#tpu.dimension_semantics<parallel>, #tpu.dimension_semantics<parallel>, #tpu.dimension_semantics<arbitrary>], iteration_bounds = array<i64: 1, 2, 1>, scalar_prefetch = 0 : i64, scratch_operands = 1 : i64, tpu.core_type = #tpu.core_type<tc>, window_params = [{transform_indices = @transform_0, window_bounds = array<i64: 8, 256>}, {transform_indices = @transform_1, window_bounds = array<i64: 256, 256>}, {transform_indices = @transform_2, window_bounds = array<i64: 1, 256>}, {transform_indices = @transform_3, window_bounds = array<i64: 8, 256>}]} {
    %c0_i32 = arith.constant 0 : i32
    %0 = arith.cmpi eq, %arg2, %c0_i32 : i32
    %1 = arith.extui %0 : i1 to i32
    %c0_i32_0 = arith.constant 0 : i32
    %2 = arith.cmpi ne, %1, %c0_i32_0 : i32
    scf.if %2 {
      %cst_10 = arith.constant 0.000000e+00 : f32
      %12 = vector.broadcast %cst_10 : f32 to vector<8x256xf32>
      %c0_11 = arith.constant 0 : index
      %c0_12 = arith.constant 0 : index
      %13 = vector.load %arg7[%c0_11, %c0_12] : memref<8x256xf32, #tpu.memory_space<vmem>>, vector<8x256xf32>
      tpu.vector_store %arg7[%c0_11, %c0_12], %12 {strides = array<i32>} : memref<8x256xf32, #tpu.memory_space<vmem>>, vector<8x256xf32>,
    } else {
    }
    %c0 = arith.constant 0 : index
    %c0_1 = arith.constant 0 : index
    %3 = vector.load %arg7[%c0, %c0_1] : memref<8x256xf32, #tpu.memory_space<vmem>>, vector<8x256xf32>
    %c0_2 = arith.constant 0 : index
    %c0_3 = arith.constant 0 : index
    %4 = vector.load %arg3[%c0_2, %c0_3] : memref<8x256xbf16, #tpu.memory_space<vmem>>, vector<8x256xbf16>
    %c0_4 = arith.constant 0 : index
    %c0_5 = arith.constant 0 : index
    %5 = vector.load %arg4[%c0_4, %c0_5] : memref<256x256xbf16, #tpu.memory_space<vmem>>, vector<256x256xbf16>
    %cst = arith.constant dense<0.000000e+00> : vector<8x256xf32>
    %6 = tpu.matmul %4, %5, %cst {dimension_numbers = #tpu.dot_dimension_numbers<[1], [0], [0], [1], [0, 0, 1, 1], [], []>} : vector<8x256xbf16>, vector<256x256xbf16>, vector<8x256xf32> -> vector<8x256xf32>
    %7 = arith.addf %3, %6 : vector<8x256xf32>
    %c0_6 = arith.constant 0 : index
    %c0_7 = arith.constant 0 : index
    %8 = vector.load %arg7[%c0_6, %c0_7] : memref<8x256xf32, #tpu.memory_space<vmem>>, vector<8x256xf32>
    tpu.vector_store %arg7[%c0_6, %c0_7], %7 {strides = array<i32>} : memref<8x256xf32, #tpu.memory_space<vmem>>, vector<8x256xf32>,
    %c0_i32_8 = arith.constant 0 : i32
    %9 = arith.cmpi eq, %arg2, %c0_i32_8 : i32
    %10 = arith.extui %9 : i1 to i32
    %c0_i32_9 = arith.constant 0 : i32
    %11 = arith.cmpi ne, %10, %c0_i32_9 : i32
    scf.if %11 {
      %c0_10 = arith.constant 0 : index
      %c0_11 = arith.constant 0 : index
      %12 = vector.load %arg7[%c0_10, %c0_11] : memref<8x256xf32, #tpu.memory_space<vmem>>, vector<8x256xf32>
      %c0_12 = arith.constant 0 : index
      %c0_13 = arith.constant 0 : index
      %13 = vector.load %arg5[%c0_12, %c0_13] : memref<1x256xf32, #tpu.memory_space<vmem>>, vector<1x256xf32>
      %14 = vector.broadcast %13 : vector<1x256xf32> to vector<8x256xf32>
      %15 = arith.addf %12, %14 : vector<8x256xf32>
      %16 = arith.truncf %15 : vector<8x256xf32> to vector<8x256xbf16>
      %c0_14 = arith.constant 0 : index
      %c0_15 = arith.constant 0 : index
      %17 = vector.load %arg6[%c0_14, %c0_15] : memref<8x256xbf16, #tpu.memory_space<vmem>>, vector<8x256xbf16>
      tpu.vector_store %arg6[%c0_14, %c0_15], %16 {strides = array<i32>} : memref<8x256xbf16, #tpu.memory_space<vmem>>, vector<8x256xbf16>,
    } else {
    }
    return
  }
  func.func @transform_0(%arg0: i32, %arg1: i32, %arg2: i32) -> (i32, i32) {
    %c0_i32 = arith.constant 0 : i32
    return %arg0, %arg2 : i32, i32
  }
  func.func @transform_1(%arg0: i32, %arg1: i32, %arg2: i32) -> (i32, i32) {
    %c0_i32 = arith.constant 0 : i32
    return %arg2, %arg1 : i32, i32
  }
  func.func @transform_2(%arg0: i32, %arg1: i32, %arg2: i32) -> (i32, i32) {
    %c0_i32 = arith.constant 0 : i32
    %c0_i32_0 = arith.constant 0 : i32
    return %c0_i32, %arg1 : i32, i32
  }
  func.func @transform_3(%arg0: i32, %arg1: i32, %arg2: i32) -> (i32, i32) {
    %c0_i32 = arith.constant 0 : i32
    return %arg0, %arg1 : i32, i32
  }
}

module attributes {stable_mosaic.version = 11 : i64} {
  func.func @_mm_bias_res_kernel(%arg0: i32, %arg1: i32, %arg2: i32, %arg3: memref<8x512xbf16, #tpu.memory_space<vmem>>, %arg4: memref<512x256xbf16, #tpu.memory_space<vmem>>, %arg5: memref<1x256xf32, #tpu.memory_space<vmem>>, %arg6: memref<8x256xbf16, #tpu.memory_space<vmem>>, %arg7: memref<8x256xbf16, #tpu.memory_space<vmem>>, %arg8: memref<8x256xf32, #tpu.memory_space<vmem>>) attributes {dimension_semantics = [#tpu.dimension_semantics<parallel>, #tpu.dimension_semantics<parallel>, #tpu.dimension_semantics<arbitrary>], iteration_bounds = array<i64: 1, 2, 9>, scalar_prefetch = 0 : i64, scratch_operands = 1 : i64, tpu.core_type = #tpu.core_type<tc>, window_params = [{transform_indices = @transform_0, window_bounds = array<i64: 8, 512>}, {transform_indices = @transform_1, window_bounds = array<i64: 512, 256>}, {transform_indices = @transform_2, window_bounds = array<i64: 1, 256>}, {transform_indices = @transform_3, window_bounds = array<i64: 8, 256>}, {transform_indices = @transform_4, window_bounds = array<i64: 8, 256>}]} {
    %c0_i32 = arith.constant 0 : i32
    %0 = arith.cmpi eq, %arg2, %c0_i32 : i32
    %1 = arith.extui %0 : i1 to i32
    %c0_i32_0 = arith.constant 0 : i32
    %2 = arith.cmpi ne, %1, %c0_i32_0 : i32
    scf.if %2 {
      %cst_9 = arith.constant 0.000000e+00 : f32
      %12 = vector.broadcast %cst_9 : f32 to vector<8x256xf32>
      %c0_10 = arith.constant 0 : index
      %c0_11 = arith.constant 0 : index
      %13 = vector.load %arg8[%c0_10, %c0_11] : memref<8x256xf32, #tpu.memory_space<vmem>>, vector<8x256xf32>
      tpu.vector_store %arg8[%c0_10, %c0_11], %12 {strides = array<i32>} : memref<8x256xf32, #tpu.memory_space<vmem>>, vector<8x256xf32>,
    } else {
    }
    %c0 = arith.constant 0 : index
    %c0_1 = arith.constant 0 : index
    %3 = vector.load %arg8[%c0, %c0_1] : memref<8x256xf32, #tpu.memory_space<vmem>>, vector<8x256xf32>
    %c0_2 = arith.constant 0 : index
    %c0_3 = arith.constant 0 : index
    %4 = vector.load %arg3[%c0_2, %c0_3] : memref<8x512xbf16, #tpu.memory_space<vmem>>, vector<8x512xbf16>
    %c0_4 = arith.constant 0 : index
    %c0_5 = arith.constant 0 : index
    %5 = vector.load %arg4[%c0_4, %c0_5] : memref<512x256xbf16, #tpu.memory_space<vmem>>, vector<512x256xbf16>
    %cst = arith.constant dense<0.000000e+00> : vector<8x256xf32>
    %6 = tpu.matmul %4, %5, %cst {dimension_numbers = #tpu.dot_dimension_numbers<[1], [0], [0], [1], [0, 0, 1, 1], [], []>} : vector<8x512xbf16>, vector<512x256xbf16>, vector<8x256xf32> -> vector<8x256xf32>
    %7 = arith.addf %3, %6 : vector<8x256xf32>
    %c0_6 = arith.constant 0 : index
    %c0_7 = arith.constant 0 : index
    %8 = vector.load %arg8[%c0_6, %c0_7] : memref<8x256xf32, #tpu.memory_space<vmem>>, vector<8x256xf32>
    tpu.vector_store %arg8[%c0_6, %c0_7], %7 {strides = array<i32>} : memref<8x256xf32, #tpu.memory_space<vmem>>, vector<8x256xf32>,
    %c8_i32 = arith.constant 8 : i32
    %9 = arith.cmpi eq, %arg2, %c8_i32 : i32
    %10 = arith.extui %9 : i1 to i32
    %c0_i32_8 = arith.constant 0 : i32
    %11 = arith.cmpi ne, %10, %c0_i32_8 : i32
    scf.if %11 {
      %c0_9 = arith.constant 0 : index
      %c0_10 = arith.constant 0 : index
      %12 = vector.load %arg8[%c0_9, %c0_10] : memref<8x256xf32, #tpu.memory_space<vmem>>, vector<8x256xf32>
      %c0_11 = arith.constant 0 : index
      %c0_12 = arith.constant 0 : index
      %13 = vector.load %arg5[%c0_11, %c0_12] : memref<1x256xf32, #tpu.memory_space<vmem>>, vector<1x256xf32>
      %14 = vector.broadcast %13 : vector<1x256xf32> to vector<8x256xf32>
      %15 = arith.addf %12, %14 : vector<8x256xf32>
      %c0_13 = arith.constant 0 : index
      %c0_14 = arith.constant 0 : index
      %16 = vector.load %arg6[%c0_13, %c0_14] : memref<8x256xbf16, #tpu.memory_space<vmem>>, vector<8x256xbf16>
      %17 = arith.extf %16 : vector<8x256xbf16> to vector<8x256xf32>
      %18 = arith.addf %15, %17 : vector<8x256xf32>
      %cst_15 = arith.constant 0.000000e+00 : f32
      %19 = vector.broadcast %cst_15 : f32 to vector<8x256xf32>
      %20 = arith.maximumf %18, %19 : vector<8x256xf32>
      %21 = arith.truncf %20 : vector<8x256xf32> to vector<8x256xbf16>
      %c0_16 = arith.constant 0 : index
      %c0_17 = arith.constant 0 : index
      %22 = vector.load %arg7[%c0_16, %c0_17] : memref<8x256xbf16, #tpu.memory_space<vmem>>, vector<8x256xbf16>
      tpu.vector_store %arg7[%c0_16, %c0_17], %21 {strides = array<i32>} : memref<8x256xbf16, #tpu.memory_space<vmem>>, vector<8x256xbf16>,
    } else {
    }
    return
  }
  func.func @transform_0(%arg0: i32, %arg1: i32, %arg2: i32) -> (i32, i32) {
    %c0_i32 = arith.constant 0 : i32
    return %arg0, %arg2 : i32, i32
  }
  func.func @transform_1(%arg0: i32, %arg1: i32, %arg2: i32) -> (i32, i32) {
    %c0_i32 = arith.constant 0 : i32
    return %arg2, %arg1 : i32, i32
  }
  func.func @transform_2(%arg0: i32, %arg1: i32, %arg2: i32) -> (i32, i32) {
    %c0_i32 = arith.constant 0 : i32
    %c0_i32_0 = arith.constant 0 : i32
    return %c0_i32, %arg1 : i32, i32
  }
  func.func @transform_3(%arg0: i32, %arg1: i32, %arg2: i32) -> (i32, i32) {
    %c0_i32 = arith.constant 0 : i32
    return %arg0, %arg1 : i32, i32
  }
  func.func @transform_4(%arg0: i32, %arg1: i32, %arg2: i32) -> (i32, i32) {
    %c0_i32 = arith.constant 0 : i32
    return %arg0, %arg1 : i32, i32
  }
}

module attributes {stable_mosaic.version = 11 : i64} {
  func.func @_mm_bias_kernel(%arg0: i32, %arg1: i32, %arg2: i32, %arg3: memref<8x512xbf16, #tpu.memory_space<vmem>>, %arg4: memref<512x256xbf16, #tpu.memory_space<vmem>>, %arg5: memref<1x256xf32, #tpu.memory_space<vmem>>, %arg6: memref<8x256xbf16, #tpu.memory_space<vmem>>, %arg7: memref<8x256xf32, #tpu.memory_space<vmem>>) attributes {dimension_semantics = [#tpu.dimension_semantics<parallel>, #tpu.dimension_semantics<parallel>, #tpu.dimension_semantics<arbitrary>], iteration_bounds = array<i64: 1, 2, 9>, scalar_prefetch = 0 : i64, scratch_operands = 1 : i64, tpu.core_type = #tpu.core_type<tc>, window_params = [{transform_indices = @transform_0, window_bounds = array<i64: 8, 512>}, {transform_indices = @transform_1, window_bounds = array<i64: 512, 256>}, {transform_indices = @transform_2, window_bounds = array<i64: 1, 256>}, {transform_indices = @transform_3, window_bounds = array<i64: 8, 256>}]} {
    %c0_i32 = arith.constant 0 : i32
    %0 = arith.cmpi eq, %arg2, %c0_i32 : i32
    %1 = arith.extui %0 : i1 to i32
    %c0_i32_0 = arith.constant 0 : i32
    %2 = arith.cmpi ne, %1, %c0_i32_0 : i32
    scf.if %2 {
      %cst_9 = arith.constant 0.000000e+00 : f32
      %12 = vector.broadcast %cst_9 : f32 to vector<8x256xf32>
      %c0_10 = arith.constant 0 : index
      %c0_11 = arith.constant 0 : index
      %13 = vector.load %arg7[%c0_10, %c0_11] : memref<8x256xf32, #tpu.memory_space<vmem>>, vector<8x256xf32>
      tpu.vector_store %arg7[%c0_10, %c0_11], %12 {strides = array<i32>} : memref<8x256xf32, #tpu.memory_space<vmem>>, vector<8x256xf32>,
    } else {
    }
    %c0 = arith.constant 0 : index
    %c0_1 = arith.constant 0 : index
    %3 = vector.load %arg7[%c0, %c0_1] : memref<8x256xf32, #tpu.memory_space<vmem>>, vector<8x256xf32>
    %c0_2 = arith.constant 0 : index
    %c0_3 = arith.constant 0 : index
    %4 = vector.load %arg3[%c0_2, %c0_3] : memref<8x512xbf16, #tpu.memory_space<vmem>>, vector<8x512xbf16>
    %c0_4 = arith.constant 0 : index
    %c0_5 = arith.constant 0 : index
    %5 = vector.load %arg4[%c0_4, %c0_5] : memref<512x256xbf16, #tpu.memory_space<vmem>>, vector<512x256xbf16>
    %cst = arith.constant dense<0.000000e+00> : vector<8x256xf32>
    %6 = tpu.matmul %4, %5, %cst {dimension_numbers = #tpu.dot_dimension_numbers<[1], [0], [0], [1], [0, 0, 1, 1], [], []>} : vector<8x512xbf16>, vector<512x256xbf16>, vector<8x256xf32> -> vector<8x256xf32>
    %7 = arith.addf %3, %6 : vector<8x256xf32>
    %c0_6 = arith.constant 0 : index
    %c0_7 = arith.constant 0 : index
    %8 = vector.load %arg7[%c0_6, %c0_7] : memref<8x256xf32, #tpu.memory_space<vmem>>, vector<8x256xf32>
    tpu.vector_store %arg7[%c0_6, %c0_7], %7 {strides = array<i32>} : memref<8x256xf32, #tpu.memory_space<vmem>>, vector<8x256xf32>,
    %c8_i32 = arith.constant 8 : i32
    %9 = arith.cmpi eq, %arg2, %c8_i32 : i32
    %10 = arith.extui %9 : i1 to i32
    %c0_i32_8 = arith.constant 0 : i32
    %11 = arith.cmpi ne, %10, %c0_i32_8 : i32
    scf.if %11 {
      %c0_9 = arith.constant 0 : index
      %c0_10 = arith.constant 0 : index
      %12 = vector.load %arg7[%c0_9, %c0_10] : memref<8x256xf32, #tpu.memory_space<vmem>>, vector<8x256xf32>
      %c0_11 = arith.constant 0 : index
      %c0_12 = arith.constant 0 : index
      %13 = vector.load %arg5[%c0_11, %c0_12] : memref<1x256xf32, #tpu.memory_space<vmem>>, vector<1x256xf32>
      %14 = vector.broadcast %13 : vector<1x256xf32> to vector<8x256xf32>
      %15 = arith.addf %12, %14 : vector<8x256xf32>
      %cst_13 = arith.constant 0.000000e+00 : f32
      %16 = vector.broadcast %cst_13 : f32 to vector<8x256xf32>
      %17 = arith.maximumf %15, %16 : vector<8x256xf32>
      %18 = arith.truncf %17 : vector<8x256xf32> to vector<8x256xbf16>
      %c0_14 = arith.constant 0 : index
      %c0_15 = arith.constant 0 : index
      %19 = vector.load %arg6[%c0_14, %c0_15] : memref<8x256xbf16, #tpu.memory_space<vmem>>, vector<8x256xbf16>
      tpu.vector_store %arg6[%c0_14, %c0_15], %18 {strides = array<i32>} : memref<8x256xbf16, #tpu.memory_space<vmem>>, vector<8x256xbf16>,
    } else {
    }
    return
  }
  func.func @transform_0(%arg0: i32, %arg1: i32, %arg2: i32) -> (i32, i32) {
    %c0_i32 = arith.constant 0 : i32
    return %arg0, %arg2 : i32, i32
  }
  func.func @transform_1(%arg0: i32, %arg1: i32, %arg2: i32) -> (i32, i32) {
    %c0_i32 = arith.constant 0 : i32
    return %arg2, %arg1 : i32, i32
  }
  func.func @transform_2(%arg0: i32, %arg1: i32, %arg2: i32) -> (i32, i32) {
    %c0_i32 = arith.constant 0 : i32
    %c0_i32_0 = arith.constant 0 : i32
    return %c0_i32, %arg1 : i32, i32
  }
  func.func @transform_3(%arg0: i32, %arg1: i32, %arg2: i32) -> (i32, i32) {
    %c0_i32 = arith.constant 0 : i32
    return %arg0, %arg1 : i32, i32
  }
}

module attributes {stable_mosaic.version = 11 : i64} {
  func.func @_head_kernel(%arg0: i32, %arg1: memref<8x512xbf16, #tpu.memory_space<vmem>>, %arg2: memref<512x512xbf16, #tpu.memory_space<vmem>>, %arg3: memref<1x512xf32, #tpu.memory_space<vmem>>, %arg4: memref<512x128xbf16, #tpu.memory_space<vmem>>, %arg5: memref<1x128xf32, #tpu.memory_space<vmem>>, %arg6: memref<8x128xf32, #tpu.memory_space<vmem>>) attributes {dimension_semantics = [#tpu.dimension_semantics<arbitrary>], iteration_bounds = array<i64: 1>, scalar_prefetch = 0 : i64, scratch_operands = 0 : i64, tpu.core_type = #tpu.core_type<tc>, window_params = [{pipeline_mode = #tpu.pipeline_mode<synchronous>, transform_indices = @transform_0, window_bounds = array<i64: 8, 512>}, {pipeline_mode = #tpu.pipeline_mode<synchronous>, transform_indices = @transform_1, window_bounds = array<i64: 512, 512>}, {pipeline_mode = #tpu.pipeline_mode<synchronous>, transform_indices = @transform_2, window_bounds = array<i64: 1, 512>}, {pipeline_mode = #tpu.pipeline_mode<synchronous>, transform_indices = @transform_3, window_bounds = array<i64: 512, 128>}, {pipeline_mode = #tpu.pipeline_mode<synchronous>, transform_indices = @transform_4, window_bounds = array<i64: 1, 128>}, {pipeline_mode = #tpu.pipeline_mode<synchronous>, transform_indices = @transform_5, window_bounds = array<i64: 8, 128>}]} {
    %c0 = arith.constant 0 : index
    %c0_0 = arith.constant 0 : index
    %0 = vector.load %arg1[%c0, %c0_0] : memref<8x512xbf16, #tpu.memory_space<vmem>>, vector<8x512xbf16>
    %c0_1 = arith.constant 0 : index
    %c0_2 = arith.constant 0 : index
    %1 = vector.load %arg2[%c0_1, %c0_2] : memref<512x512xbf16, #tpu.memory_space<vmem>>, vector<512x512xbf16>
    %cst = arith.constant dense<0.000000e+00> : vector<8x512xf32>
    %2 = tpu.matmul %0, %1, %cst {dimension_numbers = #tpu.dot_dimension_numbers<[1], [0], [0], [1], [0, 0, 1, 1], [], []>} : vector<8x512xbf16>, vector<512x512xbf16>, vector<8x512xf32> -> vector<8x512xf32>
    %c0_3 = arith.constant 0 : index
    %c0_4 = arith.constant 0 : index
    %3 = vector.load %arg3[%c0_3, %c0_4] : memref<1x512xf32, #tpu.memory_space<vmem>>, vector<1x512xf32>
    %4 = vector.broadcast %3 : vector<1x512xf32> to vector<8x512xf32>
    %5 = arith.addf %2, %4 : vector<8x512xf32>
    %cst_5 = arith.constant 0.000000e+00 : f32
    %6 = vector.broadcast %cst_5 : f32 to vector<8x512xf32>
    %7 = arith.maximumf %5, %6 : vector<8x512xf32>
    %8 = arith.truncf %7 : vector<8x512xf32> to vector<8x512xbf16>
    %c0_6 = arith.constant 0 : index
    %c0_7 = arith.constant 0 : index
    %9 = vector.load %arg4[%c0_6, %c0_7] : memref<512x128xbf16, #tpu.memory_space<vmem>>, vector<512x128xbf16>
    %cst_8 = arith.constant dense<0.000000e+00> : vector<8x128xf32>
    %10 = tpu.matmul %8, %9, %cst_8 {dimension_numbers = #tpu.dot_dimension_numbers<[1], [0], [0], [1], [0, 0, 1, 1], [], []>} : vector<8x512xbf16>, vector<512x128xbf16>, vector<8x128xf32> -> vector<8x128xf32>
    %c0_9 = arith.constant 0 : index
    %c0_10 = arith.constant 0 : index
    %11 = vector.load %arg5[%c0_9, %c0_10] : memref<1x128xf32, #tpu.memory_space<vmem>>, vector<1x128xf32>
    %12 = vector.broadcast %11 : vector<1x128xf32> to vector<8x128xf32>
    %13 = arith.addf %10, %12 : vector<8x128xf32>
    %c0_11 = arith.constant 0 : index
    %c0_12 = arith.constant 0 : index
    %14 = vector.load %arg6[%c0_11, %c0_12] : memref<8x128xf32, #tpu.memory_space<vmem>>, vector<8x128xf32>
    tpu.vector_store %arg6[%c0_11, %c0_12], %13 {strides = array<i32>} : memref<8x128xf32, #tpu.memory_space<vmem>>, vector<8x128xf32>,
    return
  }
  func.func @transform_0(%arg0: i32) -> (i32, i32) {
    %c0_i32 = arith.constant 0 : i32
    %c0_i32_0 = arith.constant 0 : i32
    %c0_i32_1 = arith.constant 0 : i32
    return %c0_i32, %c0_i32_0 : i32, i32
  }
  func.func @transform_1(%arg0: i32) -> (i32, i32) {
    %c0_i32 = arith.constant 0 : i32
    %c0_i32_0 = arith.constant 0 : i32
    %c0_i32_1 = arith.constant 0 : i32
    return %c0_i32, %c0_i32_0 : i32, i32
  }
  func.func @transform_2(%arg0: i32) -> (i32, i32) {
    %c0_i32 = arith.constant 0 : i32
    %c0_i32_0 = arith.constant 0 : i32
    %c0_i32_1 = arith.constant 0 : i32
    return %c0_i32, %c0_i32_0 : i32, i32
  }
  func.func @transform_3(%arg0: i32) -> (i32, i32) {
    %c0_i32 = arith.constant 0 : i32
    %c0_i32_0 = arith.constant 0 : i32
    %c0_i32_1 = arith.constant 0 : i32
    return %c0_i32, %c0_i32_0 : i32, i32
  }
  func.func @transform_4(%arg0: i32) -> (i32, i32) {
    %c0_i32 = arith.constant 0 : i32
    %c0_i32_0 = arith.constant 0 : i32
    %c0_i32_1 = arith.constant 0 : i32
    return %c0_i32, %c0_i32_0 : i32, i32
  }
  func.func @transform_5(%arg0: i32) -> (i32, i32) {
    %c0_i32 = arith.constant 0 : i32
    %c0_i32_0 = arith.constant 0 : i32
    %c0_i32_1 = arith.constant 0 : i32
    return %c0_i32, %c0_i32_0 : i32, i32
  }
}

</mosaic_0001>

<bundles_post_ra>
// kernel: _lambda_.22
= control target key start
LH: loop header
LB: loop body
LE: loop exit
PB: predicated region body
PF: predicated region fallthrough
CT: control target
= control target key end

     0   :  { %s939_s1 = inlined_call_operand.vmem [shape: bf16[256,128], index: 1, kind: input, shape index: {}]   ;;  %s940_s0 = inlined_call_operand.vmem [shape: bf16[128,256], index: 0, kind: input, shape index: {}]   ;;  %s941_s2 = inlined_call_operand.vmem [shape: f32[1,128], index: 2, kind: input, shape index: {}]   ;;  %s942_s3 = inlined_call_operand.vmem [shape: bf16[128,128], index: 3, kind: output, shape index: {}]  }
   0x1   :  { %v738_v0 = vld [vmem:[%s939_s1 + $0x78] sm:$0xff]   ;;  %v740_v2 = vld [vmem:[%s939_s1 + $0x70] sm:$0xff]   ;;  %v742_v4 = vld [vmem:[%s939_s1 + $0x68] sm:$0xff]  }
   0x2   :  { %v739_v1 = vld [vmem:[%s939_s1 + $0x38] sm:$0xff]   ;;  %658 = vmatprep.subr.bf16.mxu0 %v738_v0  ;;  %722 = vmatprep.subr.bf16.mxu1 %v738_v0  ;;  %v741_v3 = vld [vmem:[%s939_s1 + $0x30] sm:$0xff]   ;;  %v743_v5 = vld [vmem:[%s939_s1 + $0x28] sm:$0xff]  }
   0x3   :  { %659 = vmatpush3.bf16.msra.mxu0 %v739_v1  ;;  %730 = vmatpush3.bf16.msra.mxu1 %v739_v1  ;;  %v744_v6 = vld [vmem:[%s939_s1 + $0x60] sm:$0xff]   ;;  %v746_v8 = vld [vmem:[%s939_s1 + $0x58] sm:$0xff]   ;;  %v748_v10 = vld [vmem:[%s939_s1 + $0x50] sm:$0xff]  }
   0x4   :  { %660 = vmatprep.subr.bf16.mxu0 %v740_v2  ;;  %723 = vmatprep.subr.bf16.mxu1 %v740_v2  ;;  %v745_v7 = vld [vmem:[%s939_s1 + $0x20] sm:$0xff]   ;;  %v747_v9 = vld [vmem:[%s939_s1 + $0x18] sm:$0xff]   ;;  %v749_v13 = vld [vmem:[%s939_s1 + $0x10] sm:$0xff]  }
   0x5   :  { %v756_v11 = vld [vmem:[%s940_s0 + $0x4] ss:$8 sps:$4 sm:$0xff]   ;;  %v754_v18 = vld [vmem:[%s940_s0] ss:$8 sps:$4 sm:$0xff]   ;;  %v760_v20 = vld [vmem:[%s940_s0 + $0x14] ss:$8 sps:$4 sm:$0xff]  }
   0x6   :  { %v759_v12 = vld [vmem:[%s940_s0 + $0x44] ss:$8 sps:$4 sm:$0xff]   ;;  %307 = vmatprep.mubr.bf16.mxu0 %v756_v11  ;;  %v757_v19 = vld [vmem:[%s940_s0 + $0x40] ss:$8 sps:$4 sm:$0xff]   ;;  %v762_v21 = vld [vmem:[%s940_s0 + $0x54] ss:$8 sps:$4 sm:$0xff]  }
   0x7   :  { %661 = vmatpush3.bf16.msra.mxu0 %v741_v3  ;;  %731 = vmatpush3.bf16.msra.mxu1 %v741_v3  ;;  %v750_v14 = vld [vmem:[%s939_s1 + $0x48] sm:$0xff]   ;;  %v752_v16 = vld [vmem:[%s939_s1 + $0x40] sm:$0xff]   ;;  %v764_v22 = vld [vmem:[%s940_s0 + $0x10] ss:$8 sps:$4 sm:$0xff]  }
   0x8   :  { %662 = vmatprep.subr.bf16.mxu0 %v742_v4  ;;  %724 = vmatprep.subr.bf16.mxu1 %v742_v4  ;;  %v751_v15 = vld [vmem:[%s939_s1 + $0x8] sm:$0xff]   ;;  %v753_v17 = vld [vmem:[%s939_s1] sm:$0xff]   ;;  %v765_v23 = vld [vmem:[%s940_s0 + $0x50] ss:$8 sps:$4 sm:$0xff]  }
   0x9   :  { %339 = vmatprep.mubr.bf16.mxu1 %v759_v12  ;;  %v766_v24 = vld [vmem:[%s940_s0 + $0x24] ss:$8 sps:$4 sm:$0xff]   ;;  %v770_v26 = vld [vmem:[%s940_s0 + $0x20] ss:$8 sps:$4 sm:$0xff]   ;;  %v772_v28 = vld [vmem:[%s940_s0 + $0x34] ss:$8 sps:$4 sm:$0xff]  }
   0xa   :  { %v768_v25 = vld [vmem:[%s940_s0 + $0x64] ss:$8 sps:$4 sm:$0xff]   ;;  %v771_v27 = vld [vmem:[%s940_s0 + $0x60] ss:$8 sps:$4 sm:$0xff]   ;;  %v774_v29 = vld [vmem:[%s940_s0 + $0x74] ss:$8 sps:$4 sm:$0xff]  }
   0xb   :  { %663 = vmatpush3.bf16.msra.mxu0 %v743_v5  ;;  %732 = vmatpush3.bf16.msra.mxu1 %v743_v5  ;;  %v776_v30 = vld [vmem:[%s940_s0 + $0x30] ss:$8 sps:$4 sm:$0xff]   ;;  %v897_v37 = vld [vmem:[%s941_s2] ss:$0 sm:$0xff] }
   0xc   :  { %664 = vmatprep.subr.bf16.mxu0 %v744_v6  ;;  %725 = vmatprep.subr.bf16.mxu1 %v744_v6  ;;  %v777_v31 = vld [vmem:[%s940_s0 + $0x70] ss:$8 sps:$4 sm:$0xff]  }
   0xf   :  { %665 = vmatpush3.bf16.msra.mxu0 %v745_v7  ;;  %733 = vmatpush3.bf16.msra.mxu1 %v745_v7 }
  0x10   :  { %666 = vmatprep.subr.bf16.mxu0 %v746_v8  ;;  %726 = vmatprep.subr.bf16.mxu1 %v746_v8 }
  0x13   :  { %667 = vmatpush3.bf16.msra.mxu0 %v747_v9  ;;  %734 = vmatpush3.bf16.msra.mxu1 %v747_v9 }
  0x14   :  { %668 = vmatprep.subr.bf16.mxu0 %v748_v10  ;;  %727 = vmatprep.subr.bf16.mxu1 %v748_v10 }
  0x17   :  { %669 = vmatpush3.bf16.msra.mxu0 %v749_v13  ;;  %735 = vmatpush3.bf16.msra.mxu1 %v749_v13 }
  0x18   :  { %670 = vmatprep.subr.bf16.mxu0 %v750_v14  ;;  %728 = vmatprep.subr.bf16.mxu1 %v750_v14 }
  0x1b   :  { %671 = vmatpush3.bf16.msra.mxu0 %v751_v15  ;;  %736 = vmatpush3.bf16.msra.mxu1 %v751_v15 }
  0x1c   :  { %672 = vmatprep.subr.bf16.mxu0 %v752_v16  ;;  %729 = vmatprep.subr.bf16.mxu1 %v752_v16 }
  0x1f   :  { %673 = vmatpush3.bf16.msra.mxu0 %v753_v17  ;;  %737 = vmatpush3.bf16.msra.mxu1 %v753_v17 }
  0x22   :  { %308 = vmatmul.mubr.bf16.vlgmr.msra.gmra.mxu0 %v754_v18  ;;  %340 = vmatmul.mubr.bf16.vlgmr.msra.gmra.mxu1 %v757_v19 }
  0x23   :  { %315 = vmatprep.mubr.bf16.mxu0 %v760_v20  ;;  %347 = vmatprep.mubr.bf16.mxu1 %v762_v21 }
  0x2a   :  { %316 = vmatmul.mubr.bf16.gmra.mxu0 %v764_v22  ;;  %348 = vmatmul.mubr.bf16.gmra.mxu1 %v765_v23 }
  0x2b   :  { %323 = vmatprep.mubr.bf16.mxu0 %v766_v24  ;;  %355 = vmatprep.mubr.bf16.mxu1 %v768_v25 }
  0x32   :  { %324 = vmatmul.mubr.bf16.gmra.mxu0 %v770_v26  ;;  %356 = vmatmul.mubr.bf16.gmra.mxu1 %v771_v27 }
  0x33   :  { %331 = vmatprep.mubr.bf16.mxu0 %v772_v28  ;;  %363 = vmatprep.mubr.bf16.mxu1 %v774_v29 }
  0x3a   :  { %332 = vmatmul.mubr.bf16.gmra.mxu0 %v776_v30  ;;  %364 = vmatmul.mubr.bf16.gmra.mxu1 %v777_v31 }
  0xe2   :  { %v674_v32 = vpop.f32.mrf.mxu0  ;;  %v698_v33 = vpop.f32.mrf.mxu1 }
  0xe4   :  { %v675_v34 = vpop.f32.mrf.mxu0  ;;  %v699_v35 = vpop.f32.mrf.mxu1 }
  0xe5   :  { %v676_v36 = vadd.f32 %v675_v34, %v674_v32  ;;  %v700_v38 = vadd.f32 %v699_v35, %v698_v33 }
  0xe6   :  { %v677_v39 = vpop.f32.mrf.mxu0  ;;  %v701_v40 = vpop.f32.mrf.mxu1 }
  0xe7   :  { %v430_v41 = vadd.f32 %v676_v36, %v897_v37  ;;  %v438_v42 = vadd.f32 %v700_v38, %v897_v37 }
  0xe8   :  { %v678_v43 = vpop.f32.mrf.mxu0  ;;  %v702_v44 = vpop.f32.mrf.mxu1 }
  0xe9   :  { %v679_v45 = vadd.f32 %v678_v43, %v677_v39  ;;  %v703_v46 = vadd.f32 %v702_v44, %v701_v40  ;;  %v446_v51 = vmax.f32 %v430_v41, 0.0  ;;  %v454_v52 = vmax.f32 %v438_v42, 0.0 }
  0xea   :  { %v680_v47 = vpop.f32.mrf.mxu0  ;;  %v704_v48 = vpop.f32.mrf.mxu1 }
  0xeb   :  { %v431_v49 = vadd.f32 %v679_v45, %v897_v37  ;;  %v439_v50 = vadd.f32 %v703_v46, %v897_v37 }
  0xec   :  { %v681_v53 = vpop.f32.mrf.mxu0  ;;  %v705_v54 = vpop.f32.mrf.mxu1 }
  0xed   :  { %v447_v55 = vmax.f32 %v431_v49, 0.0  ;;  %v455_v56 = vmax.f32 %v439_v50, 0.0  ;;  %v682_v57 = vadd.f32 %v681_v53, %v680_v47  ;;  %v706_v58 = vadd.f32 %v705_v54, %v704_v48 }
  0xee   :  { %v683_v59 = vpop.f32.mrf.mxu0  ;;  %v707_v60 = vpop.f32.mrf.mxu1 }
  0xef   :  { %v614_v61 = vpack.c.bf16 %v447_v55, %v446_v51  ;;  %v634_v62 = vpack.c.bf16 %v455_v56, %v454_v52  ;;  %v432_v63 = vadd.f32 %v682_v57, %v897_v37  ;;  %v440_v0 = vadd.f32 %v706_v58, %v897_v37 }
  0xf0   :  { %v684_v1 = vpop.f32.mrf.mxu0  ;;  %v708_v2 = vpop.f32.mrf.mxu1 }
  0xf1   :  { %615 = vst [vmem:[%s942_s3] sm:$0xff] %v614_v61   ;;  %654 = vst [vmem:[%s942_s3 + $0x20] sm:$0xff] %v634_v62   ;;  %v685_v3 = vadd.f32 %v684_v1, %v683_v59  ;;  %v709_v4 = vadd.f32 %v708_v2, %v707_v60  ;;  %v448_v9 = vmax.f32 %v432_v63, 0.0  ;;  %v456_v10 = vmax.f32 %v440_v0, 0.0 }
  0xf2   :  { %v686_v5 = vpop.f32.mrf.mxu0  ;;  %v710_v6 = vpop.f32.mrf.mxu1 }
  0xf3   :  { %v433_v7 = vadd.f32 %v685_v3, %v897_v37  ;;  %v441_v8 = vadd.f32 %v709_v4, %v897_v37 }
  0xf4   :  { %v687_v11 = vpop.f32.mrf.mxu0  ;;  %v711_v12 = vpop.f32.mrf.mxu1 }
  0xf5   :  { %v449_v13 = vmax.f32 %v433_v7, 0.0  ;;  %v457_v14 = vmax.f32 %v441_v8, 0.0  ;;  %v688_v15 = vadd.f32 %v687_v11, %v686_v5  ;;  %v712_v16 = vadd.f32 %v711_v12, %v710_v6 }
  0xf6   :  { %v689_v17 = vpop.f32.mrf.mxu0  ;;  %v713_v18 = vpop.f32.mrf.mxu1 }
  0xf7   :  { %v619_v19 = vpack.c.bf16 %v449_v13, %v448_v9  ;;  %v639_v20 = vpack.c.bf16 %v457_v14, %v456_v10  ;;  %v434_v21 = vadd.f32 %v688_v15, %v897_v37  ;;  %v442_v22 = vadd.f32 %v712_v16, %v897_v37 }
  0xf8   :  { %v690_v23 = vpop.f32.mrf.mxu0  ;;  %v714_v24 = vpop.f32.mrf.mxu1 }
  0xf9   :  { %651 = vst [vmem:[%s942_s3 + $0x8] sm:$0xff] %v619_v19   ;;  %655 = vst [vmem:[%s942_s3 + $0x28] sm:$0xff] %v639_v20   ;;  %v691_v25 = vadd.f32 %v690_v23, %v689_v17  ;;  %v715_v26 = vadd.f32 %v714_v24, %v713_v18  ;;  %v450_v31 = vmax.f32 %v434_v21, 0.0  ;;  %v458_v32 = vmax.f32 %v442_v22, 0.0 }
  0xfa   :  { %v692_v27 = vpop.f32.mrf.mxu0  ;;  %v716_v28 = vpop.f32.mrf.mxu1 }
  0xfb   :  { %v435_v29 = vadd.f32 %v691_v25, %v897_v37  ;;  %v443_v30 = vadd.f32 %v715_v26, %v897_v37 }
  0xfc   :  { %v693_v33 = vpop.f32.mrf.mxu0  ;;  %v717_v34 = vpop.f32.mrf.mxu1 }
  0xfd   :  { %v451_v35 = vmax.f32 %v435_v29, 0.0  ;;  %v459_v36 = vmax.f32 %v443_v30, 0.0  ;;  %v694_v38 = vadd.f32 %v693_v33, %v692_v27  ;;  %v718_v39 = vadd.f32 %v717_v34, %v716_v28 }
  0xfe   :  { %v695_v40 = vpop.f32.mrf.mxu0  ;;  %v719_v41 = vpop.f32.mrf.mxu1 }
  0xff   :  { %v624_v42 = vpack.c.bf16 %v451_v35, %v450_v31  ;;  %v644_v43 = vpack.c.bf16 %v459_v36, %v458_v32  ;;  %v436_v46 = vadd.f32 %v694_v38, %v897_v37  ;;  %v444_v47 = vadd.f32 %v718_v39, %v897_v37 }
 0x100   :  { %v696_v44 = vpop.f32.mrf.mxu0  ;;  %v720_v45 = vpop.f32.mrf.mxu1 }
 0x101   :  { %652 = vst [vmem:[%s942_s3 + $0x10] sm:$0xff] %v624_v42   ;;  %656 = vst [vmem:[%s942_s3 + $0x30] sm:$0xff] %v644_v43   ;;  %v697_v48 = vadd.f32 %v696_v44, %v695_v40  ;;  %v721_v49 = vadd.f32 %v720_v45, %v719_v41  ;;  %v452_v52 = vmax.f32 %v436_v46, 0.0  ;;  %v460_v53 = vmax.f32 %v444_v47, 0.0 }
 0x103   :  { %v437_v50 = vadd.f32 %v697_v48, %v897_v37  ;;  %v445_v51 = vadd.f32 %v721_v49, %v897_v37 }
 0x105   :  { %v453_v54 = vmax.f32 %v437_v50, 0.0  ;;  %v461_v55 = vmax.f32 %v445_v51, 0.0 }
 0x107   :  { %v629_v56 = vpack.c.bf16 %v453_v54, %v452_v52  ;;  %v649_v57 = vpack.c.bf16 %v461_v55, %v460_v53 }
 0x109   :  { %653 = vst [vmem:[%s942_s3 + $0x18] sm:$0xff] %v629_v56   ;;  %657 = vst [vmem:[%s942_s3 + $0x38] sm:$0xff] %v649_v57  }

// kernel: _lambda_.23
= control target key start
LH: loop header
LB: loop body
LE: loop exit
PB: predicated region body
PF: predicated region fallthrough
CT: control target
= control target key end

     0   :  { %s261_s0 = inlined_call_operand.vmem [shape: bf16[9,32,128], index: 0, kind: input, shape index: {}]   ;;  %s262_s1 = inlined_call_operand.vmem [shape: bf16[32,128], index: 1, kind: output, shape index: {}]  }
   0x1   :  { %v8_v0 = vld [vmem:[%s261_s0] sm:$0xf]  ;;  %v9_v1 = vld [vmem:[%s261_s0 + $0x4] sm:$0xf]  ;;  %v92_v2 = vld [vmem:[%s261_s0 + $0x10] sm:$0xf] }
   0x2   :  { %v93_v3 = vld [vmem:[%s261_s0 + $0x14] sm:$0xf]  ;;  %v17_v4 = vmax.bf16 %v92_v2, %v8_v0  ;;  %v96_v5 = vld [vmem:[%s261_s0 + $0x20] sm:$0xf]  ;;  %v97_v6 = vld [vmem:[%s261_s0 + $0x24] sm:$0xf] }
   0x3   :  { %v18_v7 = vmax.bf16 %v93_v3, %v9_v1  ;;  %v100_v8 = vld [vmem:[%s261_s0 + $0x30] sm:$0xf]  ;;  %v101_v10 = vld [vmem:[%s261_s0 + $0x34] sm:$0xf]  ;;  %v104_v12 = vld [vmem:[%s261_s0 + $0x40] sm:$0xf] }
   0x4   :  { %v26_v9 = vmax.bf16 %v96_v5, %v17_v4  ;;  %v105_v14 = vld [vmem:[%s261_s0 + $0x44] sm:$0xf]  ;;  %v108_v15 = vld [vmem:[%s261_s0 + $0x50] sm:$0xf]  ;;  %v109_v16 = vld [vmem:[%s261_s0 + $0x54] sm:$0xf] }
   0x5   :  { %v27_v11 = vmax.bf16 %v97_v6, %v18_v7  ;;  %v10_v18 = vld [vmem:[%s261_s0 + $0x8] sm:$0xf]  ;;  %v11_v19 = vld [vmem:[%s261_s0 + $0xc] sm:$0xf]  ;;  %v94_v20 = vld [vmem:[%s261_s0 + $0x18] sm:$0xf] }
   0x6   :  { %v35_v13 = vmax.bf16 %v100_v8, %v26_v9  ;;  %v95_v22 = vld [vmem:[%s261_s0 + $0x1c] sm:$0xf]  ;;  %v19_v23 = vmax.bf16 %v94_v20, %v10_v18  ;;  %v98_v24 = vld [vmem:[%s261_s0 + $0x28] sm:$0xf]  ;;  %v99_v25 = vld [vmem:[%s261_s0 + $0x2c] sm:$0xf] }
   0x7   :  { %v36_v17 = vmax.bf16 %v101_v10, %v27_v11  ;;  %v112_v27 = vld [vmem:[%s261_s0 + $0x60] sm:$0xf]  ;;  %v20_v28 = vmax.bf16 %v95_v22, %v11_v19  ;;  %v102_v29 = vld [vmem:[%s261_s0 + $0x38] sm:$0xf]  ;;  %v113_v31 = vld [vmem:[%s261_s0 + $0x64] sm:$0xf] }
   0x8   :  { %v44_v21 = vmax.bf16 %v104_v12, %v35_v13  ;;  %v28_v32 = vmax.bf16 %v98_v24, %v19_v23  ;;  %v103_v33 = vld [vmem:[%s261_s0 + $0x3c] sm:$0xf]  ;;  %v116_v35 = vld [vmem:[%s261_s0 + $0x70] sm:$0xf]  ;;  %v106_v37 = vld [vmem:[%s261_s0 + $0x48] sm:$0xf] }
   0x9   :  { %v45_v26 = vmax.bf16 %v105_v14, %v36_v17  ;;  %v29_v36 = vmax.bf16 %v99_v25, %v20_v28  ;;  %v117_v39 = vld [vmem:[%s261_s0 + $0x74] sm:$0xf]  ;;  %v107_v41 = vld [vmem:[%s261_s0 + $0x4c] sm:$0xf]  ;;  %v120_v43 = vld [vmem:[%s261_s0 + $0x80] sm:$0xf] }
   0xa   :  { %v53_v30 = vmax.bf16 %v108_v15, %v44_v21  ;;  %v37_v40 = vmax.bf16 %v102_v29, %v28_v32  ;;  %v110_v45 = vld [vmem:[%s261_s0 + $0x58] sm:$0xf]  ;;  %v121_v47 = vld [vmem:[%s261_s0 + $0x84] sm:$0xf]  ;;  %v111_v49 = vld [vmem:[%s261_s0 + $0x5c] sm:$0xf] }
   0xb   :  { %v54_v34 = vmax.bf16 %v109_v16, %v45_v26  ;;  %v38_v44 = vmax.bf16 %v103_v33, %v29_v36  ;;  %v114_v52 = vld [vmem:[%s261_s0 + $0x68] sm:$0xf]  ;;  %v115_v55 = vld [vmem:[%s261_s0 + $0x6c] sm:$0xf]  ;;  %v118_v58 = vld [vmem:[%s261_s0 + $0x78] sm:$0xf] }
   0xc   :  { %v62_v38 = vmax.bf16 %v112_v27, %v53_v30  ;;  %v46_v48 = vmax.bf16 %v106_v37, %v37_v40  ;;  %v119_v60 = vld [vmem:[%s261_s0 + $0x7c] sm:$0xf]  ;;  %v122_v63 = vld [vmem:[%s261_s0 + $0x88] sm:$0xf]  ;;  %v123_v1 = vld [vmem:[%s261_s0 + $0x8c] sm:$0xf] }
   0xd   :  { %v63_v42 = vmax.bf16 %v113_v31, %v54_v34  ;;  %v47_v51 = vmax.bf16 %v107_v41, %v38_v44 }
   0xe   :  { %v71_v46 = vmax.bf16 %v116_v35, %v62_v38  ;;  %v55_v54 = vmax.bf16 %v110_v45, %v46_v48 }
   0xf   :  { %v72_v50 = vmax.bf16 %v117_v39, %v63_v42  ;;  %v56_v57 = vmax.bf16 %v111_v49, %v47_v51 }
  0x10   :  { %v80_v53 = vmax.bf16 %v120_v43, %v71_v46  ;;  %v64_v59 = vmax.bf16 %v114_v52, %v55_v54 }
  0x11   :  { %v81_v56 = vmax.bf16 %v121_v47, %v72_v50  ;;  %v65_v62 = vmax.bf16 %v115_v55, %v56_v57 }
  0x12   :  { %v73_v0 = vmax.bf16 %v118_v58, %v64_v59 }
  0x13   :  { %v134_v61 = vcombine.low %v80_v53, %v81_v56  ;;  %v74_v2 = vmax.bf16 %v119_v60, %v65_v62 }
  0x14   :  { %v82_v3 = vmax.bf16 %v122_v63, %v73_v0 }
  0x15   :  { %128 = vst [vmem:[%s262_s1] sm:$0xff] %v134_v61   ;;  %v83_v4 = vmax.bf16 %v123_v1, %v74_v2 }
  0x17   :  { %v135_v5 = vcombine.low %v82_v3, %v83_v4 }
  0x19   :  { %136 = vst [vmem:[%s262_s1 + $0x8] sm:$0xff] %v135_v5  }

// kernel: _lambda_.24
= control target key start
LH: loop header
LB: loop body
LE: loop exit
PB: predicated region body
PF: predicated region fallthrough
CT: control target
= control target key end

     0   :  { %s798_s12 = smov 0   ;;  %s800_s13 = smov 0   ;;  %s891_s0 = inlined_call_operand.vmem [shape: bf16[32,1152], index: 0, kind: input, shape index: {}]   ;;  %s892_s1 = inlined_call_operand.vmem [shape: bf16[1152,128], index: 1, kind: input, shape index: {}]   ;;  %s893_s2 = inlined_call_operand.vmem [shape: f32[1,128], index: 2, kind: input, shape index: {}]   ;;  %s894_s3 = inlined_call_operand.vmem [shape: bf16[32,128], index: 3, kind: output, shape index: {}]  }
   0x1   :  { %s802_s14 = smov 0   ;;  %s804_s15 = smov 0  }
   0x2   :  { %s806_s16 = smov 0  }
   0x3 LB: > { %s25_s17 = sadd.s32 1, %s771_s15  ;;  %p48_p1 = scmp.ne.s32.totalorder %s763_s13, %s759_s12  ;;  %s775_s16 = sphi %s806_s16, %s13_s16   ;;  %s771_s15 = sphi %s804_s15, %s898_s15   ;;  %s767_s14 = sphi %s802_s14, %s897_s14   ;;  %s763_s13 = sphi %s800_s13, %s896_s13   ;;  %s759_s12 = sphi %s798_s12, %s895_s12  }
   0x4   : > { %p26_p0 = scmp.ge.s32.totalorder %s25_s17, 9  ;;  %p49_p2 = scmp.eq.s32.totalorder %s775_s16, 0 }
   0x5   : > { %s41_s19 = sadd.s32 1, %s763_s13  ;;  %p613_p5 = scmp.ge.s32.totalorder %s775_s16, 9 }
   0x6   : > { %s900_s17 = smov (%p26_p0, %s25_s17), 0  ;;  %p50_p3 = por %p49_p2, %p48_p1 }
   0x7   : > { %s37_s18 = ssub.s32 %s771_s15, %s900_s17  ;;  %162 = sbr.rel (%p613_p5) target bundleno = 18 (0x12), region = 20 }
   0x8   : > { %p39_p4 = scmp.eq.s32.totalorder %s37_s18, 0 }
   0xa   : > { %s833_s20 = scalar_select %p39_p4, %s763_s13, %s41_s19  }
   0xc   : > { %165 = sbr.rel (!%p50_p3) target bundleno = 18 (0x12), region = 24  ;;  %s167_s21 = sand.u32 (%p50_p3), 1, %s763_s13  }
   0xd   : > { %s615_s22 = sshll.u32 (%p50_p3), %s771_s15, 2  ;;  %s614_s23 = sshll.u32 (%p50_p3), %s167_s21, 4 }
   0xe   : > { %s174_s26 = scalar_lea.vmem (%p50_p3), %s891_s0, %s615_s22  ;;  %s169_s27 = scalar_lea.vmem (%p50_p3), [#allocation3], %s614_s23 }
   0xf   : > { %v191_v0 = vld [vmem:[%s174_s26] sm:$0xf] (%p50_p3)  ;;  %v193_v1 = vld [vmem:[%s174_s26 + $0x24] sm:$0xf] (%p50_p3)  ;;  %v195_v2 = vld [vmem:[%s174_s26 + $0x48] sm:$0xf] (%p50_p3) }
  0x10   : > { %192 = vst [vmem:[%s169_s27] sm:$0xf] (%p50_p3), %v191_v0  ;;  %194 = vst [vmem:[%s169_s27 + $0x4] sm:$0xf] (%p50_p3), %v193_v1  ;;  %v197_v3 = vld [vmem:[%s174_s26 + $0x6c] sm:$0xf] (%p50_p3) }
  0x11   : > { %196 = vst [vmem:[%s169_s27 + $0x8] sm:$0xf] %v195_v2  ;;  %198 = vst [vmem:[%s169_s27 + $0xc] sm:$0xf] %v197_v3 }
  0x12 PF: > { %p616_p6 = scmp.ge.s32.totalorder %s775_s16, 1  ;;  %p241_p7 = scmp.lt.s32.totalorder %s775_s16, 10 }
  0x14   : > { %p242_p8 = pnand %p616_p6, %p241_p7 }
  0x15   : > { %s248_s28 = sand.u32 (!%p242_p8), 1, %s759_s12   ;;  %s618_s29 = sshll.u32 (!%p242_p8), %s767_s14, 4 }
  0x16   : > { %245 = sbr.rel (%p242_p8) target bundleno = 284 (0x11c), region = 69  ;;  %s845_s30 = sshll.u32 (!%p242_p8), %s248_s28, 4 }
  0x17   : > { %p287_p9 = scmp.lt.s32.totalorder (!%p242_p8), %s618_s29, 143  ;;  %s250_s8 = scalar_lea.vmem (!%p242_p8), [#allocation3], %s845_s30 }
  0x18   : > { %p620_p10 = scmp.ne.s32.totalorder (!%p242_p8), %s767_s14, 0 }
  0x1b   : > { %s902_s29 = smov (!%p287_p9, %s618_s29), 143  ;;  %311 = sbr.rel (%p620_p10) target bundleno = 35 (0x23), region = 77 }
  0x1c   : > { %s619_s4 = sshll.u32 %s902_s29, 2 }
  0x1d   : > { %s850_s7 = scalar_lea.vmem %s892_s1, %s619_s4 }
  0x20   : > { %v777_v4 = vmov 0.0  }
  0x21   : > { %312 = vst [vmem:[#allocation2 + $0x10] sm:$0xff] %v777_v4  ;;  %313 = vst [vmem:[#allocation2] sm:$0xff] %v777_v4 }
  0x22   : > { %314 = vst [vmem:[#allocation2 + $0x18] sm:$0xff] %v777_v4  ;;  %315 = vst [vmem:[#allocation2 + $0x8] sm:$0xff] %v777_v4 }
  0x23 PF: > { %v727_v5 = vld [vmem:[%s850_s7 + $0x38] sm:$0xff]   ;;  %v728_v6 = vld [vmem:[%s850_s7 + $0x30] sm:$0xff]   ;;  %v729_v7 = vld [vmem:[%s850_s7 + $0x28] sm:$0xff]   ;;  %p631_p11 = scmp.ne.s32.totalorder %s767_s14, 8 }
  0x24   : > { %666 = vmatprep.subr.bf16.mxu0 %v727_v5  ;;  %v730_v8 = vld [vmem:[%s850_s7 + $0x20] sm:$0xff]   ;;  %v731_v10 = vld [vmem:[%s850_s7 + $0x18] sm:$0xff]   ;;  %v732_v11 = vld [vmem:[%s850_s7 + $0x10] sm:$0xff]  }
  0x25   : > { %667 = vmatpush3.bf16.msra.mxu0 %v727_v5  ;;  %v735_v9 = vld [vmem:[%s250_s8] sm:$0xff]   ;;  %v733_v12 = vld [vmem:[%s850_s7 + $0x8] sm:$0xff]  }
  0x26   : > { %668 = vmatprep.subr.bf16.mxu0 %v728_v6  ;;  %682 = vmatprep.mubr.bf16.mxu0 %v735_v9  ;;  %v734_v13 = vld [vmem:[%s850_s7] sm:$0xff]   ;;  %v736_v14 = vld [vmem:[%s250_s8 + $0x8] sm:$0xff]  }
  0x28   : > { %v316_v17 = vld [vmem:[#allocation2 + $0x10] sm:$0xff]  ;;  %v317_v23 = vld [vmem:[#allocation2] sm:$0xff] }
  0x29   : > { %669 = vmatpush3.bf16.msra.mxu0 %v728_v6  ;;  %v318_v15 = vld [vmem:[#allocation2 + $0x18] sm:$0xff]  ;;  %v319_v20 = vld [vmem:[#allocation2 + $0x8] sm:$0xff] }
  0x2a   : > { %670 = vmatprep.subr.bf16.mxu0 %v729_v7 }
  0x2d   : > { %671 = vmatpush3.bf16.msra.mxu0 %v729_v7 }
  0x2e   : > { %672 = vmatprep.subr.bf16.mxu0 %v730_v8 }
  0x31   : > { %673 = vmatpush3.bf16.msra.mxu0 %v730_v8 }
  0x32   : > { %674 = vmatprep.subr.bf16.mxu0 %v731_v10 }
  0x35   : > { %675 = vmatpush3.bf16.msra.mxu0 %v731_v10 }
  0x36   : > { %676 = vmatprep.subr.bf16.mxu0 %v732_v11 }
  0x39   : > { %677 = vmatpush3.bf16.msra.mxu0 %v732_v11 }
  0x3a   : > { %678 = vmatprep.subr.bf16.mxu0 %v733_v12 }
  0x3d   : > { %679 = vmatpush3.bf16.msra.mxu0 %v733_v12 }
  0x3e   : > { %680 = vmatprep.subr.bf16.mxu0 %v734_v13 }
  0x41   : > { %681 = vmatpush3.bf16.msra.mxu0 %v734_v13 }
  0x44   : > { %683 = vmatmul.mubr.bf16.vlgmr.msra.gmra.mxu0 %v736_v14 }
 0x104   : > { %v684_v16 = vpop.f32.mrf.mxu0 }
 0x105   : > { %v451_v18 = vadd.f32 %v684_v16, %v318_v15 }
 0x106   : > { %v434_v19 = vpop.f32.mrf.mxu0 }
 0x107   : > { %455 = vst [vmem:[#allocation2 + $0x18] sm:$0xff] %v451_v18  ;;  %v449_v21 = vadd.f32 %v434_v19, %v316_v17 }
 0x108   : > { %v685_v22 = vpop.f32.mrf.mxu0 }
 0x109   : > { %453 = vst [vmem:[#allocation2 + $0x10] sm:$0xff] %v449_v21  ;;  %v452_v24 = vadd.f32 %v685_v22, %v319_v20  ;;  %460 = sbr.rel (%p631_p11) target bundleno = 284 (0x11c), region = 81 }
 0x10a   : > { %v437_v25 = vpop.f32.mrf.mxu0 }
 0x10b   : > { %456 = vst [vmem:[#allocation2 + $0x8] sm:$0xff] %v452_v24  ;;  %v450_v26 = vadd.f32 %v437_v25, %v317_v23 }
 0x10d   : > { %454 = vst [vmem:[#allocation2] sm:$0xff] %v450_v26 }
 0x10e   : > { %v632_v29 = vld [vmem:[%s893_s2] ss:$0 sm:$0xff]  ;;  %v463_v32 = vld [vmem:[#allocation2 + $0x18] sm:$0xff] }
 0x10f   : > { %v474_v34 = vadd.f32 %v632_v29, %v463_v32 }
 0x110   : > { %v461_v27 = vld [vmem:[#allocation2 + $0x10] sm:$0xff] }
 0x111   : > { %v472_v30 = vadd.f32 %v632_v29, %v461_v27  ;;  %v478_v38 = vmax.f32 %v474_v34, 0.0 }
 0x112   : > { %v464_v33 = vld [vmem:[#allocation2 + $0x8] sm:$0xff] }
 0x113   : > { %v475_v35 = vadd.f32 %v632_v29, %v464_v33  ;;  %v476_v36 = vmax.f32 %v472_v30, 0.0 }
 0x114   : > { %v462_v28 = vld [vmem:[#allocation2] sm:$0xff] }
 0x115   : > { %v473_v31 = vadd.f32 %v632_v29, %v462_v28  ;;  %v479_v39 = vmax.f32 %v475_v35, 0.0 }
 0x117   : > { %v477_v37 = vmax.f32 %v473_v31, 0.0  ;;  %v653_v41 = vpack.c.bf16 %v479_v39, %v478_v38 }
 0x119   : > { %v648_v40 = vpack.c.bf16 %v477_v37, %v476_v36  ;;  %655 = vst [vmem:[%s894_s3 + $0x8] sm:$0xff] %v653_v41  }
 0x11b   : > { %649 = vst [vmem:[%s894_s3] sm:$0xff] %v648_v40  }
 0x11c PF: > { %s13_s16 = sadd.s32 1, %s775_s16   ;;  %s895_s12 = smov %s763_s13 }
 0x11d   : > { %p10_p12 = scmp.ge.s32.totalorder %s13_s16, 11   ;;  %s896_s13 = smov %s833_s20 }
 0x11e   : > { %s897_s14 = smov %s771_s15  ;;  %s898_s15 = smov %s900_s17 }
 0x11f   :  { %12 = sbr.rel (!%p10_p12) target bundleno = 3 (0x3), region = 122 }

// kernel: _lambda_.25
= control target key start
LH: loop header
LB: loop body
LE: loop exit
PB: predicated region body
PF: predicated region fallthrough
CT: control target
= control target key end

     0   :  { %s903_s15 = smov 0   ;;  %s905_s16 = smov 0   ;;  %s1002_s0 = inlined_call_operand.vmem [shape: bf16[32,1152], index: 0, kind: input, shape index: {}]   ;;  %s1003_s1 = inlined_call_operand.vmem [shape: bf16[1152,128], index: 1, kind: input, shape index: {}]   ;;  %s1004_s2 = inlined_call_operand.vmem [shape: f32[1,128], index: 2, kind: input, shape index: {}]   ;;  %s1005_s3 = inlined_call_operand.vmem [shape: bf16[32,128], index: 3, kind: input, shape index: {}]   ;;  %s1006_s4 = inlined_call_operand.vmem [shape: bf16[32,128], index: 4, kind: output, shape index: {}]  }
   0x1   :  { %s907_s17 = smov 0   ;;  %s909_s18 = smov 0  }
   0x2   :  { %s911_s19 = smov 0  }
   0x3 LB: > { %s26_s20 = sadd.s32 1, %s871_s18  ;;  %p49_p1 = scmp.ne.s32.totalorder %s863_s16, %s859_s15  ;;  %s875_s19 = sphi %s911_s19, %s14_s19   ;;  %s871_s18 = sphi %s909_s18, %s1010_s18   ;;  %s867_s17 = sphi %s907_s17, %s1009_s17   ;;  %s863_s16 = sphi %s905_s16, %s1008_s16   ;;  %s859_s15 = sphi %s903_s15, %s1007_s15  }
   0x4   : > { %p27_p0 = scmp.ge.s32.totalorder %s26_s20, 9  ;;  %p50_p2 = scmp.eq.s32.totalorder %s875_s19, 0 }
   0x5   : > { %s42_s22 = sadd.s32 1, %s863_s16  ;;  %p704_p5 = scmp.ge.s32.totalorder %s875_s19, 9 }
   0x6   : > { %s1012_s20 = smov (%p27_p0, %s26_s20), 0  ;;  %p51_p3 = por %p50_p2, %p49_p1 }
   0x7   : > { %s38_s21 = ssub.s32 %s871_s18, %s1012_s20  ;;  %203 = sbr.rel (%p704_p5) target bundleno = 18 (0x12), region = 24 }
   0x8   : > { %p40_p4 = scmp.eq.s32.totalorder %s38_s21, 0 }
   0xa   : > { %s938_s23 = scalar_select %p40_p4, %s863_s16, %s42_s22  }
   0xc   : > { %206 = sbr.rel (!%p51_p3) target bundleno = 18 (0x12), region = 28  ;;  %s208_s24 = sand.u32 (%p51_p3), 1, %s863_s16  }
   0xd   : > { %s706_s25 = sshll.u32 (%p51_p3), %s871_s18, 2  ;;  %s705_s26 = sshll.u32 (%p51_p3), %s208_s24, 4 }
   0xe   : > { %s215_s29 = scalar_lea.vmem (%p51_p3), %s1002_s0, %s706_s25  ;;  %s210_s30 = scalar_lea.vmem (%p51_p3), [#allocation3], %s705_s26 }
   0xf   : > { %v232_v0 = vld [vmem:[%s215_s29] sm:$0xf] (%p51_p3)  ;;  %v234_v1 = vld [vmem:[%s215_s29 + $0x24] sm:$0xf] (%p51_p3)  ;;  %v236_v2 = vld [vmem:[%s215_s29 + $0x48] sm:$0xf] (%p51_p3) }
  0x10   : > { %233 = vst [vmem:[%s210_s30] sm:$0xf] (%p51_p3), %v232_v0  ;;  %235 = vst [vmem:[%s210_s30 + $0x4] sm:$0xf] (%p51_p3), %v234_v1  ;;  %v238_v3 = vld [vmem:[%s215_s29 + $0x6c] sm:$0xf] (%p51_p3) }
  0x11   : > { %237 = vst [vmem:[%s210_s30 + $0x8] sm:$0xf] %v236_v2  ;;  %239 = vst [vmem:[%s210_s30 + $0xc] sm:$0xf] %v238_v3 }
  0x12 PF: > { %p707_p6 = scmp.ge.s32.totalorder %s875_s19, 1  ;;  %p282_p7 = scmp.lt.s32.totalorder %s875_s19, 10 }
  0x14   : > { %p283_p8 = pnand %p707_p6, %p282_p7 }
  0x15   : > { %s289_s5 = sand.u32 (!%p283_p8), 1, %s859_s15   ;;  %s709_s6 = sshll.u32 (!%p283_p8), %s867_s17, 4 }
  0x16   : > { %286 = sbr.rel (%p283_p8) target bundleno = 286 (0x11e), region = 73  ;;  %s950_s7 = sshll.u32 (!%p283_p8), %s289_s5, 4 }
  0x17   : > { %p338_p9 = scmp.lt.s32.totalorder (!%p283_p8), %s709_s6, 143  ;;  %s291_s12 = scalar_lea.vmem (!%p283_p8), [#allocation3], %s950_s7 }
  0x18   : > { %p711_p10 = scmp.ne.s32.totalorder (!%p283_p8), %s867_s17, 0 }
  0x1b   : > { %s1014_s6 = smov (!%p338_p9, %s709_s6), 143  ;;  %371 = sbr.rel (%p711_p10) target bundleno = 35 (0x23), region = 81 }
  0x1c   : > { %s710_s8 = sshll.u32 %s1014_s6, 2 }
  0x1d   : > { %s955_s11 = scalar_lea.vmem %s1003_s1, %s710_s8 }
  0x20   : > { %v877_v4 = vmov 0.0  }
  0x21   : > { %372 = vst [vmem:[#allocation2 + $0x10] sm:$0xff] %v877_v4  ;;  %373 = vst [vmem:[#allocation2] sm:$0xff] %v877_v4 }
  0x22   : > { %374 = vst [vmem:[#allocation2 + $0x18] sm:$0xff] %v877_v4  ;;  %375 = vst [vmem:[#allocation2 + $0x8] sm:$0xff] %v877_v4 }
  0x23 PF: > { %v827_v5 = vld [vmem:[%s955_s11 + $0x38] sm:$0xff]   ;;  %v828_v6 = vld [vmem:[%s955_s11 + $0x30] sm:$0xff]   ;;  %v829_v7 = vld [vmem:[%s955_s11 + $0x28] sm:$0xff]   ;;  %p722_p11 = scmp.ne.s32.totalorder %s867_s17, 8 }
  0x24   : > { %766 = vmatprep.subr.bf16.mxu0 %v827_v5  ;;  %v830_v8 = vld [vmem:[%s955_s11 + $0x20] sm:$0xff]   ;;  %v831_v10 = vld [vmem:[%s955_s11 + $0x18] sm:$0xff]   ;;  %v832_v11 = vld [vmem:[%s955_s11 + $0x10] sm:$0xff]  }
  0x25   : > { %767 = vmatpush3.bf16.msra.mxu0 %v827_v5  ;;  %v835_v9 = vld [vmem:[%s291_s12] sm:$0xff]   ;;  %v833_v12 = vld [vmem:[%s955_s11 + $0x8] sm:$0xff]  }
  0x26   : > { %768 = vmatprep.subr.bf16.mxu0 %v828_v6  ;;  %782 = vmatprep.mubr.bf16.mxu0 %v835_v9  ;;  %v834_v13 = vld [vmem:[%s955_s11] sm:$0xff]   ;;  %v836_v14 = vld [vmem:[%s291_s12 + $0x8] sm:$0xff]  }
  0x28   : > { %v376_v17 = vld [vmem:[#allocation2 + $0x10] sm:$0xff]  ;;  %v377_v23 = vld [vmem:[#allocation2] sm:$0xff] }
  0x29   : > { %769 = vmatpush3.bf16.msra.mxu0 %v828_v6  ;;  %v378_v15 = vld [vmem:[#allocation2 + $0x18] sm:$0xff]  ;;  %v379_v20 = vld [vmem:[#allocation2 + $0x8] sm:$0xff] }
  0x2a   : > { %770 = vmatprep.subr.bf16.mxu0 %v829_v7 }
  0x2d   : > { %771 = vmatpush3.bf16.msra.mxu0 %v829_v7 }
  0x2e   : > { %772 = vmatprep.subr.bf16.mxu0 %v830_v8 }
  0x31   : > { %773 = vmatpush3.bf16.msra.mxu0 %v830_v8 }
  0x32   : > { %774 = vmatprep.subr.bf16.mxu0 %v831_v10 }
  0x35   : > { %775 = vmatpush3.bf16.msra.mxu0 %v831_v10 }
  0x36   : > { %776 = vmatprep.subr.bf16.mxu0 %v832_v11 }
  0x39   : > { %777 = vmatpush3.bf16.msra.mxu0 %v832_v11 }
  0x3a   : > { %778 = vmatprep.subr.bf16.mxu0 %v833_v12 }
  0x3d   : > { %779 = vmatpush3.bf16.msra.mxu0 %v833_v12 }
  0x3e   : > { %780 = vmatprep.subr.bf16.mxu0 %v834_v13 }
  0x41   : > { %781 = vmatpush3.bf16.msra.mxu0 %v834_v13 }
  0x44   : > { %783 = vmatmul.mubr.bf16.vlgmr.msra.gmra.mxu0 %v836_v14 }
 0x104   : > { %v784_v16 = vpop.f32.mrf.mxu0 }
 0x105   : > { %v511_v18 = vadd.f32 %v784_v16, %v378_v15 }
 0x106   : > { %v494_v19 = vpop.f32.mrf.mxu0 }
 0x107   : > { %515 = vst [vmem:[#allocation2 + $0x18] sm:$0xff] %v511_v18  ;;  %v509_v21 = vadd.f32 %v494_v19, %v376_v17 }
 0x108   : > { %v785_v22 = vpop.f32.mrf.mxu0 }
 0x109   : > { %513 = vst [vmem:[#allocation2 + $0x10] sm:$0xff] %v509_v21  ;;  %v512_v24 = vadd.f32 %v785_v22, %v379_v20  ;;  %520 = sbr.rel (%p722_p11) target bundleno = 286 (0x11e), region = 85 }
 0x10a   : > { %v497_v25 = vpop.f32.mrf.mxu0 }
 0x10b   : > { %516 = vst [vmem:[#allocation2 + $0x8] sm:$0xff] %v512_v24  ;;  %v510_v26 = vadd.f32 %v497_v25, %v377_v23 }
 0x10d   : > { %514 = vst [vmem:[#allocation2] sm:$0xff] %v510_v26 }
 0x10e   : > { %v723_v29 = vld [vmem:[%s1004_s2] ss:$0 sm:$0xff]  ;;  %v523_v33 = vld [vmem:[#allocation2 + $0x18] sm:$0xff]  ;;  %v754_v39 = vld [vmem:[%s1005_s3 + $0x8] sm:$0xff]  }
 0x10f   : > { %v737_v32 = vld [vmem:[%s1005_s3] sm:$0xff]   ;;  %v534_v37 = vadd.f32 %v723_v29, %v523_v33  ;;  %v742_v40 = vunpack.c.l.bf16 %v754_v39  ;;  %v743_v41 = vunpack.c.h.bf16 %v754_v39 }
 0x110   : > { %v521_v27 = vld [vmem:[#allocation2 + $0x10] sm:$0xff]  ;;  %v738_v35 = vunpack.c.l.bf16 %v737_v32  ;;  %v739_v36 = vunpack.c.h.bf16 %v737_v32 }
 0x111   : > { %v532_v30 = vadd.f32 %v723_v29, %v521_v27  ;;  %v546_v44 = vadd.f32 %v742_v40, %v534_v37 }
 0x112   : > { %v524_v34 = vld [vmem:[#allocation2 + $0x8] sm:$0xff] }
 0x113   : > { %v535_v38 = vadd.f32 %v723_v29, %v524_v34  ;;  %v544_v42 = vadd.f32 %v738_v35, %v532_v30  ;;  %v550_v48 = vmax.f32 %v546_v44, 0.0 }
 0x114   : > { %v522_v28 = vld [vmem:[#allocation2] sm:$0xff] }
 0x115   : > { %v533_v31 = vadd.f32 %v723_v29, %v522_v28  ;;  %v547_v45 = vadd.f32 %v743_v41, %v535_v38  ;;  %v548_v46 = vmax.f32 %v544_v42, 0.0 }
 0x117   : > { %v545_v43 = vadd.f32 %v739_v36, %v533_v31  ;;  %v551_v49 = vmax.f32 %v547_v45, 0.0 }
 0x119   : > { %v549_v47 = vmax.f32 %v545_v43, 0.0  ;;  %v752_v51 = vpack.c.bf16 %v551_v49, %v550_v48 }
 0x11b   : > { %v747_v50 = vpack.c.bf16 %v549_v47, %v548_v46  ;;  %755 = vst [vmem:[%s1006_s4 + $0x8] sm:$0xff] %v752_v51  }
 0x11d   : > { %748 = vst [vmem:[%s1006_s4] sm:$0xff] %v747_v50  }
 0x11e PF: > { %s14_s19 = sadd.s32 1, %s875_s19   ;;  %s1007_s15 = smov %s863_s16 }
 0x11f   : > { %p11_p12 = scmp.ge.s32.totalorder %s14_s19, 11   ;;  %s1008_s16 = smov %s938_s23 }
 0x120   : > { %s1009_s17 = smov %s871_s18  ;;  %s1010_s18 = smov %s1012_s20 }
 0x121   :  { %13 = sbr.rel (!%p11_p12) target bundleno = 3 (0x3), region = 129 }

// kernel: _lambda_.29
= control target key start
LH: loop header
LB: loop body
LE: loop exit
PB: predicated region body
PF: predicated region fallthrough
CT: control target
= control target key end

     0   :  { %s622_s12 = smov 0   ;;  %s624_s13 = smov 0   ;;  %s671_s0 = inlined_call_operand.vmem [shape: bf16[8,1152], index: 0, kind: input, shape index: {}]   ;;  %s672_s1 = inlined_call_operand.vmem [shape: bf16[1152,128], index: 1, kind: input, shape index: {}]   ;;  %s673_s2 = inlined_call_operand.vmem [shape: f32[1,128], index: 2, kind: input, shape index: {}]   ;;  %s674_s3 = inlined_call_operand.vmem [shape: bf16[8,128], index: 3, kind: output, shape index: {}]  }
   0x1   :  { %s626_s14 = smov 0  }
   0x2 LB: > { %s25_s15 = sadd.s32 1, %s593_s13  ;;  %p493_p0 = scmp.ge.s32.totalorder %s597_s14, 1  ;;  %s597_s14 = sphi %s626_s14, %s13_s14   ;;  %s593_s13 = sphi %s624_s13, %s676_s13   ;;  %s589_s12 = sphi %s622_s12, %s675_s12  }
   0x3   : > { %p26_p1 = scmp.ge.s32.totalorder %s25_s15, 9  ;;  %p187_p2 = scmp.lt.s32.totalorder %s597_s14, 10 }
   0x5   : > { %s678_s15 = smov (%p26_p1, %s25_s15), 0  ;;  %p188_p3 = pnand %p493_p0, %p187_p2 }
   0x6   : > { %p229_p4 = scmp.lt.s32.totalorder (!%p188_p3), %s589_s12, 8  ;;  %s495_s16 = sshll.u32 (!%p188_p3), %s589_s12, 4 }
   0x7   : > { %191 = sbr.rel (%p188_p3) target bundleno = 263 (0x107), region = 32  ;;  %p236_p5 = scmp.lt.s32.totalorder (!%p188_p3), %s495_s16, 143 }
   0x8   : > { %p497_p6 = scmp.ne.s32.totalorder (!%p188_p3), %s589_s12, 0 }
   0xc   : > { %s230_s17 = scalar_select %p229_p4, %s589_s12, 8 }
   0xd   : > { %s680_s16 = smov (!%p236_p5, %s495_s16), 143  ;;  %258 = sbr.rel (%p497_p6) target bundleno = 20 (0x14), region = 36 }
   0xe   : > { %s494_s18 = sshll.u32 %s230_s17, 2  ;;  %s496_s22 = sshll.u32 %s680_s16, 2 }
   0xf   : > { %s648_s21 = scalar_lea.vmem %s671_s0, %s494_s18  ;;  %s242_s25 = scalar_lea.vmem %s672_s1, %s496_s22 }
  0x12   : > { %v599_v0 = vmov 0.0  }
  0x13   : > { %259 = vst [vmem:[#allocation2] sm:$0xff] %v599_v0 }
  0x14 PF: > { %v567_v1 = vld [vmem:[%s242_s25 + $0x38] sm:$0xff]   ;;  %v600_v2 = vmov 0.0   ;;  %v568_v3 = vld [vmem:[%s242_s25 + $0x30] sm:$0xff]   ;;  %vm601_vm0 = vmmov 0   ;;  %v569_v4 = vld [vmem:[%s242_s25 + $0x28] sm:$0xff]   ;;  %p506_p7 = scmp.ne.s32.totalorder %s589_s12, 8 }
  0x15   : > { %520 = vmatprep.subr.bf16.mxu0 %v600_v2  ;;  %536 = vmatprep.mubr.msk.bf16.mxu0 %vm601_vm0, %v600_v2  ;;  %v570_v5 = vld [vmem:[%s242_s25 + $0x20] sm:$0xff]   ;;  %v571_v6 = vld [vmem:[%s242_s25 + $0x18] sm:$0xff]   ;;  %v572_v7 = vld [vmem:[%s242_s25 + $0x10] sm:$0xff]  }
  0x16   : > { %521 = vmatpush3.bf16.msra.mxu0 %v567_v1  ;;  %v573_v8 = vld [vmem:[%s242_s25 + $0x8] sm:$0xff]   ;;  %v574_v9 = vld [vmem:[%s242_s25] sm:$0xff]  }
  0x17   : > { %522 = vmatprep.subr.bf16.mxu0 %v600_v2  ;;  %v261_v10 = vld [vmem:[%s648_s21] sm:$0xf] }
  0x1a   : > { %523 = vmatpush3.bf16.msra.mxu0 %v568_v3  ;;  %v260_v11 = vld [vmem:[#allocation2] sm:$0xff] }
  0x1b   : > { %524 = vmatprep.subr.bf16.mxu0 %v600_v2 }
  0x1e   : > { %525 = vmatpush3.bf16.msra.mxu0 %v569_v4 }
  0x1f   : > { %526 = vmatprep.subr.bf16.mxu0 %v600_v2 }
  0x22   : > { %527 = vmatpush3.bf16.msra.mxu0 %v570_v5 }
  0x23   : > { %528 = vmatprep.subr.bf16.mxu0 %v600_v2 }
  0x26   : > { %529 = vmatpush3.bf16.msra.mxu0 %v571_v6 }
  0x27   : > { %530 = vmatprep.subr.bf16.mxu0 %v600_v2 }
  0x2a   : > { %531 = vmatpush3.bf16.msra.mxu0 %v572_v7 }
  0x2b   : > { %532 = vmatprep.subr.bf16.mxu0 %v600_v2 }
  0x2e   : > { %533 = vmatpush3.bf16.msra.mxu0 %v573_v8 }
  0x2f   : > { %534 = vmatprep.subr.bf16.mxu0 %v600_v2 }
  0x32   : > { %535 = vmatpush3.bf16.msra.mxu0 %v574_v9 }
  0x35   : > { %537 = vmatmul.mubr.bf16.vlgmr.msra.gmra.mxu0 %v261_v10 }
  0xf5   : > { %v360_v12 = vpop.f32.mrf.mxu0 }
  0xf6   : > { %v366_v13 = vadd.f32 %v360_v12, %v260_v11 }
  0xf7   : > { %v538_v14 = vpop.f32.mrf.mxu0  ;;  %371 = sbr.rel (%p506_p7) target bundleno = 263 (0x107), region = 40 }
  0xf8   : > { %367 = vst [vmem:[#allocation2] sm:$0xff] %v366_v13 }
  0xf9   : > { %v363_v15 = vpop.f32.mrf.mxu0 }
  0xfb   : > { %v539_v16 = vpop.f32.mrf.mxu0 }
  0xfc   : > { %v507_v18 = vld [vmem:[%s673_s2] ss:$0 sm:$0xff] }
  0xff   : > { %v372_v17 = vld [vmem:[#allocation2] sm:$0xff] }
 0x100   : > { %v380_v19 = vadd.f32 %v507_v18, %v372_v17 }
 0x102   : > { %v381_v20 = vmax.f32 %v380_v19, 0.0 }
 0x104   : > { %v382_v21 = vpack.c.bf16 %v381_v20, %v381_v20 }
 0x106   : > { %383 = vst [vmem:[%s674_s3] sm:$0xf] %v382_v21 }
 0x107 PF: > { %s13_s14 = sadd.s32 1, %s597_s14   ;;  %s675_s12 = smov %s593_s13 }
 0x108   : > { %p10_p8 = scmp.ge.s32.totalorder %s13_s14, 11   ;;  %s676_s13 = smov %s678_s15 }
 0x10a   :  { %12 = sbr.rel (!%p10_p8) target bundleno = 2 (0x2), region = 76 }

// kernel: _lambda_.28
= control target key start
LH: loop header
LB: loop body
LE: loop exit
PB: predicated region body
PF: predicated region fallthrough
CT: control target
= control target key end

     0   :  { %v194_v0 = vmov 0.0   ;;  %vm195_vm0 = vmmov 0   ;;  %s249_s1 = inlined_call_operand.vmem [shape: bf16[128,128], index: 1, kind: input, shape index: {}]   ;;  %s250_s0 = inlined_call_operand.vmem [shape: bf16[8,128], index: 0, kind: input, shape index: {}]   ;;  %s251_s2 = inlined_call_operand.vmem [shape: f32[1,128], index: 2, kind: input, shape index: {}]   ;;  %s252_s3 = inlined_call_operand.vmem [shape: bf16[8,128], index: 3, kind: output, shape index: {}]  }
   0x1   :  { %164 = vmatprep.subr.bf16.mxu0 %v194_v0  ;;  %v186_v1 = vld [vmem:[%s249_s1 + $0x38] sm:$0xff]   ;;  %180 = vmatprep.mubr.msk.bf16.mxu0 %vm195_vm0, %v194_v0  ;;  %v187_v2 = vld [vmem:[%s249_s1 + $0x30] sm:$0xff]   ;;  %v188_v3 = vld [vmem:[%s249_s1 + $0x28] sm:$0xff]  }
   0x2   :  { %165 = vmatpush3.bf16.msra.mxu0 %v186_v1  ;;  %v189_v4 = vld [vmem:[%s249_s1 + $0x20] sm:$0xff]   ;;  %v190_v5 = vld [vmem:[%s249_s1 + $0x18] sm:$0xff]   ;;  %v191_v6 = vld [vmem:[%s249_s1 + $0x10] sm:$0xff]  }
   0x3   :  { %166 = vmatprep.subr.bf16.mxu0 %v194_v0  ;;  %v192_v7 = vld [vmem:[%s249_s1 + $0x8] sm:$0xff]   ;;  %v193_v8 = vld [vmem:[%s249_s1] sm:$0xff]  }
   0x4   :  { %v21_v9 = vld [vmem:[%s250_s0] sm:$0xf] }
   0x5   :  { %v154_v10 = vld [vmem:[%s251_s2] ss:$0 sm:$0xff] }
   0x6   :  { %167 = vmatpush3.bf16.msra.mxu0 %v187_v2 }
   0x7   :  { %168 = vmatprep.subr.bf16.mxu0 %v194_v0 }
   0xa   :  { %169 = vmatpush3.bf16.msra.mxu0 %v188_v3 }
   0xb   :  { %170 = vmatprep.subr.bf16.mxu0 %v194_v0 }
   0xe   :  { %171 = vmatpush3.bf16.msra.mxu0 %v189_v4 }
   0xf   :  { %172 = vmatprep.subr.bf16.mxu0 %v194_v0 }
  0x12   :  { %173 = vmatpush3.bf16.msra.mxu0 %v190_v5 }
  0x13   :  { %174 = vmatprep.subr.bf16.mxu0 %v194_v0 }
  0x16   :  { %175 = vmatpush3.bf16.msra.mxu0 %v191_v6 }
  0x17   :  { %176 = vmatprep.subr.bf16.mxu0 %v194_v0 }
  0x1a   :  { %177 = vmatpush3.bf16.msra.mxu0 %v192_v7 }
  0x1b   :  { %178 = vmatprep.subr.bf16.mxu0 %v194_v0 }
  0x1e   :  { %179 = vmatpush3.bf16.msra.mxu0 %v193_v8 }
  0x21   :  { %181 = vmatmul.mubr.bf16.vlgmr.msra.gmra.mxu0 %v21_v9 }
  0xe1   :  { %v120_v11 = vpop.f32.mrf.mxu0 }
  0xe2   :  { %v139_v12 = vadd.f32 %v154_v10, %v120_v11 }
  0xe3   :  { %v182_v13 = vpop.f32.mrf.mxu0 }
  0xe4   :  { %v140_v14 = vpack.c.bf16 %v139_v12, %v139_v12 }
  0xe5   :  { %v123_v15 = vpop.f32.mrf.mxu0 }
  0xe6   :  { %141 = vst [vmem:[%s252_s3] sm:$0xf] %v140_v14 }
  0xe7   :  { %v183_v16 = vpop.f32.mrf.mxu0 }

// kernel: _lambda_.30
= control target key start
LH: loop header
LB: loop body
LE: loop exit
PB: predicated region body
PF: predicated region fallthrough
CT: control target
= control target key end

     0   :  { %s704_s15 = smov 0   ;;  %s706_s16 = smov 0   ;;  %s756_s0 = inlined_call_operand.vmem [shape: bf16[8,1152], index: 0, kind: input, shape index: {}]   ;;  %s757_s1 = inlined_call_operand.vmem [shape: bf16[1152,128], index: 1, kind: input, shape index: {}]   ;;  %s758_s2 = inlined_call_operand.vmem [shape: f32[1,128], index: 2, kind: input, shape index: {}]   ;;  %s759_s3 = inlined_call_operand.vmem [shape: bf16[8,128], index: 3, kind: input, shape index: {}]   ;;  %s760_s4 = inlined_call_operand.vmem [shape: bf16[8,128], index: 4, kind: output, shape index: {}]  }
   0x1   :  { %s708_s17 = smov 0  }
   0x2 LB: > { %s26_s18 = sadd.s32 1, %s670_s16  ;;  %p570_p0 = scmp.ge.s32.totalorder %s674_s17, 1  ;;  %s674_s17 = sphi %s708_s17, %s14_s17   ;;  %s670_s16 = sphi %s706_s16, %s762_s16   ;;  %s666_s15 = sphi %s704_s15, %s761_s15  }
   0x3   : > { %p27_p1 = scmp.ge.s32.totalorder %s26_s18, 9  ;;  %p226_p2 = scmp.lt.s32.totalorder %s674_s17, 10 }
   0x5   : > { %s764_s18 = smov (%p27_p1, %s26_s18), 0  ;;  %p227_p3 = pnand %p570_p0, %p226_p2 }
   0x6   : > { %p277_p4 = scmp.lt.s32.totalorder (!%p227_p3), %s666_s15, 8  ;;  %s572_s19 = sshll.u32 (!%p227_p3), %s666_s15, 4 }
   0x7   : > { %230 = sbr.rel (%p227_p3) target bundleno = 265 (0x109), region = 36  ;;  %p284_p5 = scmp.lt.s32.totalorder (!%p227_p3), %s572_s19, 143 }
   0x8   : > { %p574_p6 = scmp.ne.s32.totalorder (!%p227_p3), %s666_s15, 0 }
   0xc   : > { %s278_s20 = scalar_select %p277_p4, %s666_s15, 8 }
   0xd   : > { %s766_s19 = smov (!%p284_p5, %s572_s19), 143  ;;  %313 = sbr.rel (%p574_p6) target bundleno = 20 (0x14), region = 40 }
   0xe   : > { %s571_s21 = sshll.u32 %s278_s20, 2  ;;  %s573_s25 = sshll.u32 %s766_s19, 2 }
   0xf   : > { %s730_s24 = scalar_lea.vmem %s756_s0, %s571_s21  ;;  %s290_s28 = scalar_lea.vmem %s757_s1, %s573_s25 }
  0x12   : > { %v676_v0 = vmov 0.0  }
  0x13   : > { %314 = vst [vmem:[#allocation2] sm:$0xff] %v676_v0 }
  0x14 PF: > { %v644_v1 = vld [vmem:[%s290_s28 + $0x38] sm:$0xff]   ;;  %v677_v2 = vmov 0.0   ;;  %v645_v3 = vld [vmem:[%s290_s28 + $0x30] sm:$0xff]   ;;  %vm678_vm0 = vmmov 0   ;;  %v646_v4 = vld [vmem:[%s290_s28 + $0x28] sm:$0xff]   ;;  %p583_p7 = scmp.ne.s32.totalorder %s666_s15, 8 }
  0x15   : > { %597 = vmatprep.subr.bf16.mxu0 %v677_v2  ;;  %613 = vmatprep.mubr.msk.bf16.mxu0 %vm678_vm0, %v677_v2  ;;  %v647_v5 = vld [vmem:[%s290_s28 + $0x20] sm:$0xff]   ;;  %v648_v6 = vld [vmem:[%s290_s28 + $0x18] sm:$0xff]   ;;  %v649_v7 = vld [vmem:[%s290_s28 + $0x10] sm:$0xff]  }
  0x16   : > { %598 = vmatpush3.bf16.msra.mxu0 %v644_v1  ;;  %v650_v8 = vld [vmem:[%s290_s28 + $0x8] sm:$0xff]   ;;  %v651_v9 = vld [vmem:[%s290_s28] sm:$0xff]  }
  0x17   : > { %599 = vmatprep.subr.bf16.mxu0 %v677_v2  ;;  %v316_v10 = vld [vmem:[%s730_s24] sm:$0xf] }
  0x1a   : > { %600 = vmatpush3.bf16.msra.mxu0 %v645_v3  ;;  %v315_v11 = vld [vmem:[#allocation2] sm:$0xff] }
  0x1b   : > { %601 = vmatprep.subr.bf16.mxu0 %v677_v2 }
  0x1e   : > { %602 = vmatpush3.bf16.msra.mxu0 %v646_v4 }
  0x1f   : > { %603 = vmatprep.subr.bf16.mxu0 %v677_v2 }
  0x22   : > { %604 = vmatpush3.bf16.msra.mxu0 %v647_v5 }
  0x23   : > { %605 = vmatprep.subr.bf16.mxu0 %v677_v2 }
  0x26   : > { %606 = vmatpush3.bf16.msra.mxu0 %v648_v6 }
  0x27   : > { %607 = vmatprep.subr.bf16.mxu0 %v677_v2 }
  0x2a   : > { %608 = vmatpush3.bf16.msra.mxu0 %v649_v7 }
  0x2b   : > { %609 = vmatprep.subr.bf16.mxu0 %v677_v2 }
  0x2e   : > { %610 = vmatpush3.bf16.msra.mxu0 %v650_v8 }
  0x2f   : > { %611 = vmatprep.subr.bf16.mxu0 %v677_v2 }
  0x32   : > { %612 = vmatpush3.bf16.msra.mxu0 %v651_v9 }
  0x35   : > { %614 = vmatmul.mubr.bf16.vlgmr.msra.gmra.mxu0 %v316_v10 }
  0xf5   : > { %v415_v12 = vpop.f32.mrf.mxu0 }
  0xf6   : > { %v421_v13 = vadd.f32 %v415_v12, %v315_v11 }
  0xf7   : > { %v615_v14 = vpop.f32.mrf.mxu0  ;;  %426 = sbr.rel (%p583_p7) target bundleno = 265 (0x109), region = 44 }
  0xf8   : > { %422 = vst [vmem:[#allocation2] sm:$0xff] %v421_v13 }
  0xf9   : > { %v418_v15 = vpop.f32.mrf.mxu0 }
  0xfb   : > { %v616_v16 = vpop.f32.mrf.mxu0 }
  0xfc   : > { %v584_v18 = vld [vmem:[%s758_s2] ss:$0 sm:$0xff] }
  0xfd   : > { %v436_v19 = vld [vmem:[%s759_s3] sm:$0xf] }
  0xfe   : > { %v437_v21 = vunpack.c.l.bf16 %v436_v19 }
  0xff   : > { %v427_v17 = vld [vmem:[#allocation2] sm:$0xff] }
 0x100   : > { %v435_v20 = vadd.f32 %v584_v18, %v427_v17 }
 0x102   : > { %v438_v22 = vadd.f32 %v437_v21, %v435_v20 }
 0x104   : > { %v439_v23 = vmax.f32 %v438_v22, 0.0 }
 0x106   : > { %v440_v24 = vpack.c.bf16 %v439_v23, %v439_v23 }
 0x108   : > { %441 = vst [vmem:[%s760_s4] sm:$0xf] %v440_v24 }
 0x109 PF: > { %s14_s17 = sadd.s32 1, %s674_s17   ;;  %s761_s15 = smov %s670_s16 }
 0x10a   : > { %p11_p8 = scmp.ge.s32.totalorder %s14_s17, 11   ;;  %s762_s16 = smov %s764_s18 }
 0x10c   :  { %13 = sbr.rel (!%p11_p8) target bundleno = 2 (0x2), region = 83 }

// kernel: _lambda_.34
= control target key start
LH: loop header
LB: loop body
LE: loop exit
PB: predicated region body
PF: predicated region fallthrough
CT: control target
= control target key end

     0   :  { %s701_s12 = smov 0   ;;  %s703_s13 = smov 0   ;;  %s768_s0 = inlined_call_operand.vmem [shape: bf16[8,1152], index: 0, kind: input, shape index: {}]   ;;  %s769_s1 = inlined_call_operand.vmem [shape: bf16[1152,256], index: 1, kind: input, shape index: {}]   ;;  %s770_s2 = inlined_call_operand.vmem [shape: f32[1,256], index: 2, kind: input, shape index: {}]   ;;  %s771_s3 = inlined_call_operand.vmem [shape: bf16[8,256], index: 3, kind: output, shape index: {}]  }
   0x1   :  { %s705_s14 = smov 0  }
   0x2 LB: > { %s25_s15 = sadd.s32 1, %s673_s13  ;;  %p575_p0 = scmp.ge.s32.totalorder %s677_s14, 1  ;;  %s677_s14 = sphi %s705_s14, %s13_s14   ;;  %s673_s13 = sphi %s703_s13, %s773_s13   ;;  %s669_s12 = sphi %s701_s12, %s772_s12  }
   0x3   : > { %p26_p1 = scmp.ge.s32.totalorder %s25_s15, 9  ;;  %p192_p2 = scmp.lt.s32.totalorder %s677_s14, 10 }
   0x5   : > { %s775_s15 = smov (%p26_p1, %s25_s15), 0  ;;  %p193_p3 = pnand %p575_p0, %p192_p2 }
   0x6   : > { %p239_p4 = scmp.lt.s32.totalorder (!%p193_p3), %s669_s12, 8  ;;  %s577_s16 = sshll.u32 (!%p193_p3), %s669_s12, 4 }
   0x7   : > { %196 = sbr.rel (%p193_p3) target bundleno = 267 (0x10b), region = 32  ;;  %p247_p5 = scmp.lt.s32.totalorder (!%p193_p3), %s577_s16, 143 }
   0x8   : > { %p580_p6 = scmp.ne.s32.totalorder (!%p193_p3), %s669_s12, 0 }
   0xc   : > { %s240_s17 = scalar_select %p239_p4, %s669_s12, 8 }
   0xd   : > { %s777_s16 = smov (!%p247_p5, %s577_s16), 143  ;;  %276 = sbr.rel (%p580_p6) target bundleno = 20 (0x14), region = 36 }
   0xe   : > { %s576_s18 = sshll.u32 %s240_s17, 2  ;;  %s603_s22 = sshll.u32 %s777_s16, 3 }
   0xf   : > { %s727_s21 = scalar_lea.vmem %s768_s0, %s576_s18  ;;  %s732_s25 = scalar_lea.vmem %s769_s1, %s603_s22 }
  0x12   : > { %v679_v0 = vmov 0.0  }
  0x13   : > { %277 = vst [vmem:[#allocation2] sm:$0xff] %v679_v0  ;;  %278 = vst [vmem:[#allocation2 + $0x8] sm:$0xff] %v679_v0 }
  0x14 PF: > { %v631_v1 = vld [vmem:[%s732_s25 + $0x74] ss:$8 sps:$4 sm:$0xff]   ;;  %v633_v2 = vld [vmem:[%s732_s25 + $0x70] ss:$8 sps:$4 sm:$0xff]   ;;  %v680_v3 = vmov 0   ;;  %p597_p7 = scmp.ne.s32.totalorder %s669_s12, 8 }
  0x15   : > { %410 = vmatprep.mubr.bf16.mxu0 %v680_v3  ;;  %378 = vmatprep.subr.bf16.mxu0 %v631_v1  ;;  %v634_v4 = vld [vmem:[%s732_s25 + $0x64] ss:$8 sps:$4 sm:$0xff]   ;;  %v636_v5 = vld [vmem:[%s732_s25 + $0x60] ss:$8 sps:$4 sm:$0xff]   ;;  %v637_v6 = vld [vmem:[%s732_s25 + $0x54] ss:$8 sps:$4 sm:$0xff]  }
  0x16   : > { %379 = vmatpush1.bf16.msra.mxu0 %v633_v2  ;;  %v639_v7 = vld [vmem:[%s732_s25 + $0x50] ss:$8 sps:$4 sm:$0xff]   ;;  %v640_v8 = vld [vmem:[%s732_s25 + $0x44] ss:$8 sps:$4 sm:$0xff]   ;;  %v642_v9 = vld [vmem:[%s732_s25 + $0x40] ss:$8 sps:$4 sm:$0xff]  }
  0x17   : > { %380 = vmatprep.subr.bf16.mxu0 %v634_v4  ;;  %v643_v10 = vld [vmem:[%s732_s25 + $0x34] ss:$8 sps:$4 sm:$0xff]   ;;  %v645_v11 = vld [vmem:[%s732_s25 + $0x30] ss:$8 sps:$4 sm:$0xff]   ;;  %v646_v12 = vld [vmem:[%s732_s25 + $0x24] ss:$8 sps:$4 sm:$0xff]  }
  0x18   : > { %v648_v13 = vld [vmem:[%s732_s25 + $0x20] ss:$8 sps:$4 sm:$0xff]   ;;  %v649_v14 = vld [vmem:[%s732_s25 + $0x14] ss:$8 sps:$4 sm:$0xff]   ;;  %v651_v15 = vld [vmem:[%s732_s25 + $0x10] ss:$8 sps:$4 sm:$0xff]  }
  0x19   : > { %v652_v16 = vld [vmem:[%s732_s25 + $0x4] ss:$8 sps:$4 sm:$0xff]   ;;  %v654_v17 = vld [vmem:[%s732_s25] ss:$8 sps:$4 sm:$0xff]  }
  0x1a   : > { %381 = vmatpush1.bf16.msra.mxu0 %v636_v5  ;;  %v281_v18 = vld [vmem:[%s727_s21] sm:$0xf]  ;;  %v280_v21 = vld [vmem:[#allocation2 + $0x8] sm:$0xff] }
  0x1b   : > { %382 = vmatprep.subr.bf16.mxu0 %v637_v6  ;;  %v279_v19 = vld [vmem:[#allocation2] sm:$0xff] }
  0x1e   : > { %383 = vmatpush1.bf16.msra.mxu0 %v639_v7 }
  0x1f   : > { %384 = vmatprep.subr.bf16.mxu0 %v640_v8 }
  0x22   : > { %385 = vmatpush1.bf16.msra.mxu0 %v642_v9 }
  0x23   : > { %386 = vmatprep.subr.bf16.mxu0 %v643_v10 }
  0x26   : > { %387 = vmatpush1.bf16.msra.mxu0 %v645_v11 }
  0x27   : > { %388 = vmatprep.subr.bf16.mxu0 %v646_v12 }
  0x2a   : > { %389 = vmatpush1.bf16.msra.mxu0 %v648_v13 }
  0x2b   : > { %390 = vmatprep.subr.bf16.mxu0 %v649_v14 }
  0x2e   : > { %391 = vmatpush1.bf16.msra.mxu0 %v651_v15 }
  0x2f   : > { %392 = vmatprep.subr.bf16.mxu0 %v652_v16 }
  0x32   : > { %393 = vmatpush1.bf16.msra.mxu0 %v654_v17 }
  0x35   : > { %411 = vmatmul.mubr.bf16.vlgmr.msra.gmra.mxu0 %v281_v18 }
  0xf5   : > { %v412_v20 = vpop.f32.mrf.mxu0 }
  0xf6   : > { %v419_v22 = vadd.f32 %v412_v20, %v279_v19 }
  0xf7   : > { %v414_v23 = vpop.f32.mrf.mxu0  ;;  %426 = sbr.rel (%p597_p7) target bundleno = 267 (0x10b), region = 40 }
  0xf8   : > { %421 = vst [vmem:[#allocation2] sm:$0xff] %v419_v22  ;;  %v420_v24 = vadd.f32 %v414_v23, %v280_v21 }
  0xf9   : > { %v416_v25 = vpop.f32.mrf.mxu0 }
  0xfa   : > { %422 = vst [vmem:[#allocation2 + $0x8] sm:$0xff] %v420_v24 }
  0xfb   : > { %v417_v26 = vpop.f32.mrf.mxu0 }
  0xfc   : > { %v431_v27 = vlaneseq  ;;  %v429_v29 = vld [vmem:[%s770_s2] sm:$0x3] }
  0xfe   : > { %v432_v28 = vshrl.u32 %v431_v27, 7 }
  0xff   : > { %v427_v32 = vld [vmem:[#allocation2] sm:$0xff] }
 0x100   : > { %v433_v30 = vsub.s32 0, %v432_v28  ;;  %v437_v31 = vsub.s32 1, %v432_v28 }
 0x101   : > { %v428_v33 = vld [vmem:[#allocation2 + $0x8] sm:$0xff] }
 0x102   : > { %v434_v34 = vrot.slane %v429_v29, %v433_v30  ;;  %v438_v35 = vrot.slane %v429_v29, %v437_v31 }
 0x104   : > { %v441_v36 = vadd.f32 %v434_v34, %v427_v32  ;;  %v442_v37 = vadd.f32 %v438_v35, %v428_v33 }
 0x106   : > { %v443_v38 = vmax.f32 %v441_v36, 0.0  ;;  %v444_v39 = vmax.f32 %v442_v37, 0.0 }
 0x108   : > { %v604_v40 = vpack.c.bf16 %v444_v39, %v443_v38 }
 0x10a   : > { %453 = vst [vmem:[%s771_s3] sm:$0xff] %v604_v40 }
 0x10b PF: > { %s13_s14 = sadd.s32 1, %s677_s14   ;;  %s772_s12 = smov %s673_s13 }
 0x10c   : > { %p10_p8 = scmp.ge.s32.totalorder %s13_s14, 11   ;;  %s773_s13 = smov %s775_s15 }
 0x10e   :  { %12 = sbr.rel (!%p10_p8) target bundleno = 2 (0x2), region = 76 }

// kernel: _lambda_.33
= control target key start
LH: loop header
LB: loop body
LE: loop exit
PB: predicated region body
PF: predicated region fallthrough
CT: control target
= control target key end

     0   :  { %v240_v1 = vmov 0   ;;  %v172_v18 = vlaneseq  ;;  %s318_s1 = inlined_call_operand.vmem [shape: bf16[128,256], index: 1, kind: input, shape index: {}]   ;;  %s319_s0 = inlined_call_operand.vmem [shape: bf16[8,128], index: 0, kind: input, shape index: {}]   ;;  %s320_s2 = inlined_call_operand.vmem [shape: f32[1,256], index: 2, kind: input, shape index: {}]   ;;  %s321_s3 = inlined_call_operand.vmem [shape: bf16[8,256], index: 3, kind: output, shape index: {}]  }
   0x1   :  { %v216_v0 = vld [vmem:[%s318_s1 + $0x74] ss:$8 sps:$4 sm:$0xff]   ;;  %152 = vmatprep.mubr.bf16.mxu0 %v240_v1  ;;  %v218_v2 = vld [vmem:[%s318_s1 + $0x70] ss:$8 sps:$4 sm:$0xff]   ;;  %v219_v3 = vld [vmem:[%s318_s1 + $0x64] ss:$8 sps:$4 sm:$0xff]  }
   0x2   :  { %120 = vmatprep.subr.bf16.mxu0 %v216_v0  ;;  %v221_v4 = vld [vmem:[%s318_s1 + $0x60] ss:$8 sps:$4 sm:$0xff]   ;;  %v222_v5 = vld [vmem:[%s318_s1 + $0x54] ss:$8 sps:$4 sm:$0xff]   ;;  %v224_v6 = vld [vmem:[%s318_s1 + $0x50] ss:$8 sps:$4 sm:$0xff]  }
   0x3   :  { %121 = vmatpush1.bf16.msra.mxu0 %v218_v2  ;;  %v225_v7 = vld [vmem:[%s318_s1 + $0x44] ss:$8 sps:$4 sm:$0xff]   ;;  %v227_v8 = vld [vmem:[%s318_s1 + $0x40] ss:$8 sps:$4 sm:$0xff]   ;;  %v228_v9 = vld [vmem:[%s318_s1 + $0x34] ss:$8 sps:$4 sm:$0xff]  }
   0x4   :  { %122 = vmatprep.subr.bf16.mxu0 %v219_v3  ;;  %v230_v10 = vld [vmem:[%s318_s1 + $0x30] ss:$8 sps:$4 sm:$0xff]   ;;  %v231_v11 = vld [vmem:[%s318_s1 + $0x24] ss:$8 sps:$4 sm:$0xff]   ;;  %v233_v12 = vld [vmem:[%s318_s1 + $0x20] ss:$8 sps:$4 sm:$0xff]  }
   0x5   :  { %v234_v13 = vld [vmem:[%s318_s1 + $0x14] ss:$8 sps:$4 sm:$0xff]   ;;  %v236_v14 = vld [vmem:[%s318_s1 + $0x10] ss:$8 sps:$4 sm:$0xff]   ;;  %v237_v15 = vld [vmem:[%s318_s1 + $0x4] ss:$8 sps:$4 sm:$0xff]  }
   0x6   :  { %v239_v16 = vld [vmem:[%s318_s1] ss:$8 sps:$4 sm:$0xff]   ;;  %v173_v19 = vshrl.u32 %v172_v18, 7 }
   0x7   :  { %123 = vmatpush1.bf16.msra.mxu0 %v221_v4  ;;  %v23_v17 = vld [vmem:[%s319_s0] sm:$0xf] }
   0x8   :  { %124 = vmatprep.subr.bf16.mxu0 %v222_v5  ;;  %v174_v20 = vsub.s32 0, %v173_v19  ;;  %v178_v21 = vsub.s32 1, %v173_v19  ;;  %v170_v22 = vld [vmem:[%s320_s2] sm:$0x3] }
   0xa   :  { %v175_v23 = vrot.slane %v170_v22, %v174_v20  ;;  %v179_v24 = vrot.slane %v170_v22, %v178_v21 }
   0xb   :  { %125 = vmatpush1.bf16.msra.mxu0 %v224_v6 }
   0xc   :  { %126 = vmatprep.subr.bf16.mxu0 %v225_v7 }
   0xf   :  { %127 = vmatpush1.bf16.msra.mxu0 %v227_v8 }
  0x10   :  { %128 = vmatprep.subr.bf16.mxu0 %v228_v9 }
  0x13   :  { %129 = vmatpush1.bf16.msra.mxu0 %v230_v10 }
  0x14   :  { %130 = vmatprep.subr.bf16.mxu0 %v231_v11 }
  0x17   :  { %131 = vmatpush1.bf16.msra.mxu0 %v233_v12 }
  0x18   :  { %132 = vmatprep.subr.bf16.mxu0 %v234_v13 }
  0x1b   :  { %133 = vmatpush1.bf16.msra.mxu0 %v236_v14 }
  0x1c   :  { %134 = vmatprep.subr.bf16.mxu0 %v237_v15 }
  0x1f   :  { %135 = vmatpush1.bf16.msra.mxu0 %v239_v16 }
  0x22   :  { %153 = vmatmul.mubr.bf16.vlgmr.msra.gmra.mxu0 %v23_v17 }
  0xe2   :  { %v154_v25 = vpop.f32.mrf.mxu0 }
  0xe3   :  { %v182_v27 = vadd.f32 %v175_v23, %v154_v25 }
  0xe4   :  { %v156_v26 = vpop.f32.mrf.mxu0 }
  0xe5   :  { %v183_v28 = vadd.f32 %v179_v24, %v156_v26 }
  0xe6   :  { %v158_v29 = vpop.f32.mrf.mxu0 }
  0xe7   :  { %v214_v30 = vpack.c.bf16 %v183_v28, %v182_v27 }
  0xe8   :  { %v159_v31 = vpop.f32.mrf.mxu0 }
  0xe9   :  { %192 = vst [vmem:[%s321_s3] sm:$0xff] %v214_v30 }

// kernel: _lambda_.35
= control target key start
LH: loop header
LB: loop body
LE: loop exit
PB: predicated region body
PF: predicated region fallthrough
CT: control target
= control target key end

     0   :  { %s946_s15 = smov 0   ;;  %s948_s16 = smov 0   ;;  %s1031_s0 = inlined_call_operand.vmem [shape: bf16[8,2304], index: 0, kind: input, shape index: {}]   ;;  %s1032_s1 = inlined_call_operand.vmem [shape: bf16[2304,256], index: 1, kind: input, shape index: {}]   ;;  %s1033_s2 = inlined_call_operand.vmem [shape: f32[1,256], index: 2, kind: input, shape index: {}]   ;;  %s1034_s3 = inlined_call_operand.vmem [shape: bf16[8,256], index: 3, kind: input, shape index: {}]   ;;  %s1035_s4 = inlined_call_operand.vmem [shape: bf16[8,256], index: 4, kind: output, shape index: {}]  }
   0x1   :  { %s950_s17 = smov 0  }
   0x2 LB: > { %s26_s18 = sadd.s32 1, %s914_s16  ;;  %p772_p0 = scmp.ge.s32.totalorder %s918_s17, 1  ;;  %s918_s17 = sphi %s950_s17, %s14_s17   ;;  %s914_s16 = sphi %s948_s16, %s1037_s16   ;;  %s910_s15 = sphi %s946_s15, %s1036_s15  }
   0x3   : > { %p27_p1 = scmp.ge.s32.totalorder %s26_s18, 9  ;;  %p236_p2 = scmp.lt.s32.totalorder %s918_s17, 10 }
   0x5   : > { %s1039_s18 = smov (%p27_p1, %s26_s18), 0  ;;  %p237_p3 = pnand %p772_p0, %p236_p2 }
   0x6   : > { %s773_s19 = sshll.u32 (!%p237_p3), %s910_s15, 1  ;;  %s775_s20 = sshll.u32 (!%p237_p3), %s910_s15, 5 }
   0x7   : > { %240 = sbr.rel (%p237_p3) target bundleno = 303 (0x12f), region = 36  ;;  %p296_p4 = scmp.lt.s32.totalorder (!%p237_p3), %s773_s19, 17 }
   0x8   : > { %p305_p5 = scmp.lt.s32.totalorder (!%p237_p3), %s775_s20, 287  ;;  %p778_p6 = scmp.ne.s32.totalorder (!%p237_p3), %s910_s15, 0 }
   0xc   : > { %s1041_s19 = smov (!%p296_p4, %s773_s19), 17  ;;  %s1043_s20 = smov (!%p305_p5, %s775_s20), 287 }
   0xd   : > { %s774_s21 = sshll.u32 %s1041_s19, 2  ;;  %s819_s25 = sshll.u32 %s1043_s20, 3 }
   0xe   : > { %s971_s24 = scalar_lea.vmem %s1031_s0, %s774_s21  ;;  %s976_s28 = scalar_lea.vmem %s1032_s1, %s819_s25 }
   0xf   : > { %343 = sbr.rel (%p778_p6) target bundleno = 22 (0x16), region = 40 }
  0x14   : > { %v920_v0 = vmov 0.0  }
  0x15   : > { %344 = vst [vmem:[#allocation2] sm:$0xff] %v920_v0  ;;  %345 = vst [vmem:[#allocation2 + $0x8] sm:$0xff] %v920_v0 }
  0x16 PF: > { %v846_v1 = vld [vmem:[%s976_s28 + $0x74] ss:$8 sps:$4 sm:$0xff]   ;;  %v848_v2 = vld [vmem:[%s976_s28 + $0x70] ss:$8 sps:$4 sm:$0xff]   ;;  %v849_v3 = vld [vmem:[%s976_s28 + $0x64] ss:$8 sps:$4 sm:$0xff]  }
  0x17   : > { %548 = vmatprep.subr.bf16.mxu0 %v846_v1  ;;  %v851_v4 = vld [vmem:[%s976_s28 + $0x60] ss:$8 sps:$4 sm:$0xff]   ;;  %v852_v5 = vld [vmem:[%s976_s28 + $0x54] ss:$8 sps:$4 sm:$0xff]   ;;  %v854_v6 = vld [vmem:[%s976_s28 + $0x50] ss:$8 sps:$4 sm:$0xff]  }
  0x18   : > { %549 = vmatpush1.bf16.msra.mxu0 %v848_v2  ;;  %v855_v7 = vld [vmem:[%s976_s28 + $0x44] ss:$8 sps:$4 sm:$0xff]   ;;  %v857_v8 = vld [vmem:[%s976_s28 + $0x40] ss:$8 sps:$4 sm:$0xff]   ;;  %v858_v9 = vld [vmem:[%s976_s28 + $0x34] ss:$8 sps:$4 sm:$0xff]  }
  0x19   : > { %550 = vmatprep.subr.bf16.mxu0 %v849_v3  ;;  %v860_v10 = vld [vmem:[%s976_s28 + $0x30] ss:$8 sps:$4 sm:$0xff]   ;;  %v861_v11 = vld [vmem:[%s976_s28 + $0x24] ss:$8 sps:$4 sm:$0xff]   ;;  %v863_v12 = vld [vmem:[%s976_s28 + $0x20] ss:$8 sps:$4 sm:$0xff]  }
  0x1a   : > { %v864_v13 = vld [vmem:[%s976_s28 + $0x14] ss:$8 sps:$4 sm:$0xff]   ;;  %v348_v14 = vld [vmem:[%s971_s24] sm:$0xff]  ;;  %v866_v16 = vld [vmem:[%s976_s28 + $0x10] ss:$8 sps:$4 sm:$0xff]   ;;  %p813_p7 = scmp.ne.s32.totalorder %s910_s15, 8 }
  0x1b   : > { %v780_v15 = vcombine.high %v348_v14, %v348_v14  ;;  %v867_v17 = vld [vmem:[%s976_s28 + $0x4] ss:$8 sps:$4 sm:$0xff]   ;;  %v869_v18 = vld [vmem:[%s976_s28] ss:$8 sps:$4 sm:$0xff]   ;;  %v870_v19 = vld [vmem:[%s976_s28 + $0xf4] ss:$8 sps:$4 sm:$0xff]   ;;  %v779_v35 = vcombine.low %v348_v14, %v348_v14 }
  0x1c   : > { %551 = vmatpush1.bf16.msra.mxu0 %v851_v4  ;;  %v872_v20 = vld [vmem:[%s976_s28 + $0xf0] ss:$8 sps:$4 sm:$0xff]   ;;  %v873_v21 = vld [vmem:[%s976_s28 + $0xe4] ss:$8 sps:$4 sm:$0xff]   ;;  %v875_v22 = vld [vmem:[%s976_s28 + $0xe0] ss:$8 sps:$4 sm:$0xff]  }
  0x1d   : > { %552 = vmatprep.subr.bf16.mxu0 %v852_v5  ;;  %580 = vmatprep.mubr.bf16.mxu0 %v780_v15  ;;  %v876_v23 = vld [vmem:[%s976_s28 + $0xd4] ss:$8 sps:$4 sm:$0xff]   ;;  %v878_v24 = vld [vmem:[%s976_s28 + $0xd0] ss:$8 sps:$4 sm:$0xff]   ;;  %v879_v25 = vld [vmem:[%s976_s28 + $0xc4] ss:$8 sps:$4 sm:$0xff]  }
  0x1e   : > { %v881_v26 = vld [vmem:[%s976_s28 + $0xc0] ss:$8 sps:$4 sm:$0xff]   ;;  %v882_v27 = vld [vmem:[%s976_s28 + $0xb4] ss:$8 sps:$4 sm:$0xff]   ;;  %v884_v28 = vld [vmem:[%s976_s28 + $0xb0] ss:$8 sps:$4 sm:$0xff]  }
  0x1f   : > { %v885_v29 = vld [vmem:[%s976_s28 + $0xa4] ss:$8 sps:$4 sm:$0xff]   ;;  %v887_v30 = vld [vmem:[%s976_s28 + $0xa0] ss:$8 sps:$4 sm:$0xff]   ;;  %v888_v31 = vld [vmem:[%s976_s28 + $0x94] ss:$8 sps:$4 sm:$0xff]  }
  0x20   : > { %553 = vmatpush1.bf16.msra.mxu0 %v854_v6  ;;  %v890_v32 = vld [vmem:[%s976_s28 + $0x90] ss:$8 sps:$4 sm:$0xff]   ;;  %v891_v33 = vld [vmem:[%s976_s28 + $0x84] ss:$8 sps:$4 sm:$0xff]   ;;  %v893_v34 = vld [vmem:[%s976_s28 + $0x80] ss:$8 sps:$4 sm:$0xff]  }
  0x21   : > { %554 = vmatprep.subr.bf16.mxu0 %v855_v7  ;;  %v346_v36 = vld [vmem:[#allocation2] sm:$0xff]  ;;  %v347_v38 = vld [vmem:[#allocation2 + $0x8] sm:$0xff] }
  0x24   : > { %555 = vmatpush1.bf16.msra.mxu0 %v857_v8 }
  0x25   : > { %556 = vmatprep.subr.bf16.mxu0 %v858_v9 }
  0x28   : > { %557 = vmatpush1.bf16.msra.mxu0 %v860_v10 }
  0x29   : > { %558 = vmatprep.subr.bf16.mxu0 %v861_v11 }
  0x2c   : > { %559 = vmatpush1.bf16.msra.mxu0 %v863_v12 }
  0x2d   : > { %560 = vmatprep.subr.bf16.mxu0 %v864_v13 }
  0x30   : > { %561 = vmatpush1.bf16.msra.mxu0 %v866_v16 }
  0x31   : > { %562 = vmatprep.subr.bf16.mxu0 %v867_v17 }
  0x34   : > { %563 = vmatpush1.bf16.msra.mxu0 %v869_v18 }
  0x35   : > { %564 = vmatprep.subr.bf16.mxu0 %v870_v19 }
  0x38   : > { %565 = vmatpush2.bf16.msra.mxu0 %v872_v20 }
  0x39   : > { %566 = vmatprep.subr.bf16.mxu0 %v873_v21 }
  0x3c   : > { %567 = vmatpush2.bf16.msra.mxu0 %v875_v22 }
  0x3d   : > { %568 = vmatprep.subr.bf16.mxu0 %v876_v23 }
  0x40   : > { %569 = vmatpush2.bf16.msra.mxu0 %v878_v24 }
  0x41   : > { %570 = vmatprep.subr.bf16.mxu0 %v879_v25 }
  0x44   : > { %571 = vmatpush2.bf16.msra.mxu0 %v881_v26 }
  0x45   : > { %572 = vmatprep.subr.bf16.mxu0 %v882_v27 }
  0x48   : > { %573 = vmatpush2.bf16.msra.mxu0 %v884_v28 }
  0x49   : > { %574 = vmatprep.subr.bf16.mxu0 %v885_v29 }
  0x4c   : > { %575 = vmatpush2.bf16.msra.mxu0 %v887_v30 }
  0x4d   : > { %576 = vmatprep.subr.bf16.mxu0 %v888_v31 }
  0x50   : > { %577 = vmatpush2.bf16.msra.mxu0 %v890_v32 }
  0x51   : > { %578 = vmatprep.subr.bf16.mxu0 %v891_v33 }
  0x54   : > { %579 = vmatpush2.bf16.msra.mxu0 %v893_v34 }
  0x57   : > { %581 = vmatmul.mubr.bf16.vlgmr.msra.gmra.mxu0 %v779_v35 }
 0x117   : > { %v582_v37 = vpop.f32.mrf.mxu0 }
 0x118   : > { %v589_v39 = vadd.f32 %v582_v37, %v346_v36 }
 0x119   : > { %v584_v40 = vpop.f32.mrf.mxu0  ;;  %596 = sbr.rel (%p813_p7) target bundleno = 303 (0x12f), region = 44 }
 0x11a   : > { %591 = vst [vmem:[#allocation2] sm:$0xff] %v589_v39  ;;  %v590_v41 = vadd.f32 %v584_v40, %v347_v38 }
 0x11b   : > { %v586_v42 = vpop.f32.mrf.mxu0 }
 0x11c   : > { %592 = vst [vmem:[#allocation2 + $0x8] sm:$0xff] %v590_v41 }
 0x11d   : > { %v587_v43 = vpop.f32.mrf.mxu0 }
 0x11e   : > { %v601_v44 = vlaneseq  ;;  %v599_v46 = vld [vmem:[%s1033_s2] sm:$0x3] }
 0x11f   : > { %v613_v47 = vld [vmem:[%s1034_s3] sm:$0xff] }
 0x120   : > { %v602_v45 = vshrl.u32 %v601_v44, 7  ;;  %v614_v54 = vunpack.c.l.bf16 %v613_v47  ;;  %v615_v55 = vunpack.c.h.bf16 %v613_v47 }
 0x121   : > { %v597_v50 = vld [vmem:[#allocation2] sm:$0xff] }
 0x122   : > { %v603_v48 = vsub.s32 0, %v602_v45  ;;  %v607_v49 = vsub.s32 1, %v602_v45 }
 0x123   : > { %v598_v51 = vld [vmem:[#allocation2 + $0x8] sm:$0xff] }
 0x124   : > { %v604_v52 = vrot.slane %v599_v46, %v603_v48  ;;  %v608_v53 = vrot.slane %v599_v46, %v607_v49 }
 0x126   : > { %v611_v56 = vadd.f32 %v604_v52, %v597_v50  ;;  %v612_v57 = vadd.f32 %v608_v53, %v598_v51 }
 0x128   : > { %v616_v58 = vadd.f32 %v614_v54, %v611_v56  ;;  %v617_v59 = vadd.f32 %v615_v55, %v612_v57 }
 0x12a   : > { %v618_v60 = vmax.f32 %v616_v58, 0.0  ;;  %v619_v61 = vmax.f32 %v617_v59, 0.0 }
 0x12c   : > { %v820_v62 = vpack.c.bf16 %v619_v61, %v618_v60 }
 0x12e   : > { %628 = vst [vmem:[%s1035_s4] sm:$0xff] %v820_v62 }
 0x12f PF: > { %s14_s17 = sadd.s32 1, %s918_s17   ;;  %s1036_s15 = smov %s914_s16 }
 0x130   : > { %p11_p8 = scmp.ge.s32.totalorder %s14_s17, 11   ;;  %s1037_s16 = smov %s1039_s18 }
 0x132   :  { %13 = sbr.rel (!%p11_p8) target bundleno = 2 (0x2), region = 83 }

// kernel: _lambda_.36
= control target key start
LH: loop header
LB: loop body
LE: loop exit
PB: predicated region body
PF: predicated region fallthrough
CT: control target
= control target key end

     0   :  { %s851_s12 = smov 0   ;;  %s853_s13 = smov 0   ;;  %s933_s0 = inlined_call_operand.vmem [shape: bf16[8,2304], index: 0, kind: input, shape index: {}]   ;;  %s934_s1 = inlined_call_operand.vmem [shape: bf16[2304,256], index: 1, kind: input, shape index: {}]   ;;  %s935_s2 = inlined_call_operand.vmem [shape: f32[1,256], index: 2, kind: input, shape index: {}]   ;;  %s936_s3 = inlined_call_operand.vmem [shape: bf16[8,256], index: 3, kind: output, shape index: {}]  }
   0x1   :  { %s855_s14 = smov 0  }
   0x2 LB: > { %s25_s15 = sadd.s32 1, %s824_s13  ;;  %p682_p0 = scmp.ge.s32.totalorder %s828_s14, 1  ;;  %s828_s14 = sphi %s855_s14, %s13_s14   ;;  %s824_s13 = sphi %s853_s13, %s938_s13   ;;  %s820_s12 = sphi %s851_s12, %s937_s12  }
   0x3   : > { %p26_p1 = scmp.ge.s32.totalorder %s25_s15, 9  ;;  %p194_p2 = scmp.lt.s32.totalorder %s828_s14, 10 }
   0x5   : > { %s940_s15 = smov (%p26_p1, %s25_s15), 0  ;;  %p195_p3 = pnand %p682_p0, %p194_p2 }
   0x6   : > { %s683_s16 = sshll.u32 (!%p195_p3), %s820_s12, 1  ;;  %s685_s17 = sshll.u32 (!%p195_p3), %s820_s12, 5 }
   0x7   : > { %198 = sbr.rel (%p195_p3) target bundleno = 301 (0x12d), region = 32  ;;  %p243_p4 = scmp.lt.s32.totalorder (!%p195_p3), %s683_s16, 17 }
   0x8   : > { %p252_p5 = scmp.lt.s32.totalorder (!%p195_p3), %s685_s17, 287  ;;  %p688_p6 = scmp.ne.s32.totalorder (!%p195_p3), %s820_s12, 0 }
   0xc   : > { %s942_s16 = smov (!%p243_p4, %s683_s16), 17  ;;  %s944_s17 = smov (!%p252_p5, %s685_s17), 287 }
   0xd   : > { %s684_s18 = sshll.u32 %s942_s16, 2  ;;  %s729_s22 = sshll.u32 %s944_s17, 3 }
   0xe   : > { %s876_s21 = scalar_lea.vmem %s933_s0, %s684_s18  ;;  %s881_s25 = scalar_lea.vmem %s934_s1, %s729_s22 }
   0xf   : > { %280 = sbr.rel (%p688_p6) target bundleno = 22 (0x16), region = 36 }
  0x14   : > { %v830_v0 = vmov 0.0  }
  0x15   : > { %281 = vst [vmem:[#allocation2] sm:$0xff] %v830_v0  ;;  %282 = vst [vmem:[#allocation2 + $0x8] sm:$0xff] %v830_v0 }
  0x16 PF: > { %v756_v1 = vld [vmem:[%s881_s25 + $0x74] ss:$8 sps:$4 sm:$0xff]   ;;  %v758_v2 = vld [vmem:[%s881_s25 + $0x70] ss:$8 sps:$4 sm:$0xff]   ;;  %v759_v3 = vld [vmem:[%s881_s25 + $0x64] ss:$8 sps:$4 sm:$0xff]  }
  0x17   : > { %485 = vmatprep.subr.bf16.mxu0 %v756_v1  ;;  %v761_v4 = vld [vmem:[%s881_s25 + $0x60] ss:$8 sps:$4 sm:$0xff]   ;;  %v762_v5 = vld [vmem:[%s881_s25 + $0x54] ss:$8 sps:$4 sm:$0xff]   ;;  %v764_v6 = vld [vmem:[%s881_s25 + $0x50] ss:$8 sps:$4 sm:$0xff]  }
  0x18   : > { %486 = vmatpush1.bf16.msra.mxu0 %v758_v2  ;;  %v765_v7 = vld [vmem:[%s881_s25 + $0x44] ss:$8 sps:$4 sm:$0xff]   ;;  %v767_v8 = vld [vmem:[%s881_s25 + $0x40] ss:$8 sps:$4 sm:$0xff]   ;;  %v768_v9 = vld [vmem:[%s881_s25 + $0x34] ss:$8 sps:$4 sm:$0xff]  }
  0x19   : > { %487 = vmatprep.subr.bf16.mxu0 %v759_v3  ;;  %v770_v10 = vld [vmem:[%s881_s25 + $0x30] ss:$8 sps:$4 sm:$0xff]   ;;  %v771_v11 = vld [vmem:[%s881_s25 + $0x24] ss:$8 sps:$4 sm:$0xff]   ;;  %v773_v12 = vld [vmem:[%s881_s25 + $0x20] ss:$8 sps:$4 sm:$0xff]  }
  0x1a   : > { %v774_v13 = vld [vmem:[%s881_s25 + $0x14] ss:$8 sps:$4 sm:$0xff]   ;;  %v285_v14 = vld [vmem:[%s876_s21] sm:$0xff]  ;;  %v776_v16 = vld [vmem:[%s881_s25 + $0x10] ss:$8 sps:$4 sm:$0xff]   ;;  %p723_p7 = scmp.ne.s32.totalorder %s820_s12, 8 }
  0x1b   : > { %v690_v15 = vcombine.high %v285_v14, %v285_v14  ;;  %v777_v17 = vld [vmem:[%s881_s25 + $0x4] ss:$8 sps:$4 sm:$0xff]   ;;  %v779_v18 = vld [vmem:[%s881_s25] ss:$8 sps:$4 sm:$0xff]   ;;  %v780_v19 = vld [vmem:[%s881_s25 + $0xf4] ss:$8 sps:$4 sm:$0xff]   ;;  %v689_v35 = vcombine.low %v285_v14, %v285_v14 }
  0x1c   : > { %488 = vmatpush1.bf16.msra.mxu0 %v761_v4  ;;  %v782_v20 = vld [vmem:[%s881_s25 + $0xf0] ss:$8 sps:$4 sm:$0xff]   ;;  %v783_v21 = vld [vmem:[%s881_s25 + $0xe4] ss:$8 sps:$4 sm:$0xff]   ;;  %v785_v22 = vld [vmem:[%s881_s25 + $0xe0] ss:$8 sps:$4 sm:$0xff]  }
  0x1d   : > { %489 = vmatprep.subr.bf16.mxu0 %v762_v5  ;;  %517 = vmatprep.mubr.bf16.mxu0 %v690_v15  ;;  %v786_v23 = vld [vmem:[%s881_s25 + $0xd4] ss:$8 sps:$4 sm:$0xff]   ;;  %v788_v24 = vld [vmem:[%s881_s25 + $0xd0] ss:$8 sps:$4 sm:$0xff]   ;;  %v789_v25 = vld [vmem:[%s881_s25 + $0xc4] ss:$8 sps:$4 sm:$0xff]  }
  0x1e   : > { %v791_v26 = vld [vmem:[%s881_s25 + $0xc0] ss:$8 sps:$4 sm:$0xff]   ;;  %v792_v27 = vld [vmem:[%s881_s25 + $0xb4] ss:$8 sps:$4 sm:$0xff]   ;;  %v794_v28 = vld [vmem:[%s881_s25 + $0xb0] ss:$8 sps:$4 sm:$0xff]  }
  0x1f   : > { %v795_v29 = vld [vmem:[%s881_s25 + $0xa4] ss:$8 sps:$4 sm:$0xff]   ;;  %v797_v30 = vld [vmem:[%s881_s25 + $0xa0] ss:$8 sps:$4 sm:$0xff]   ;;  %v798_v31 = vld [vmem:[%s881_s25 + $0x94] ss:$8 sps:$4 sm:$0xff]  }
  0x20   : > { %490 = vmatpush1.bf16.msra.mxu0 %v764_v6  ;;  %v800_v32 = vld [vmem:[%s881_s25 + $0x90] ss:$8 sps:$4 sm:$0xff]   ;;  %v801_v33 = vld [vmem:[%s881_s25 + $0x84] ss:$8 sps:$4 sm:$0xff]   ;;  %v803_v34 = vld [vmem:[%s881_s25 + $0x80] ss:$8 sps:$4 sm:$0xff]  }
  0x21   : > { %491 = vmatprep.subr.bf16.mxu0 %v765_v7  ;;  %v283_v36 = vld [vmem:[#allocation2] sm:$0xff]  ;;  %v284_v38 = vld [vmem:[#allocation2 + $0x8] sm:$0xff] }
  0x24   : > { %492 = vmatpush1.bf16.msra.mxu0 %v767_v8 }
  0x25   : > { %493 = vmatprep.subr.bf16.mxu0 %v768_v9 }
  0x28   : > { %494 = vmatpush1.bf16.msra.mxu0 %v770_v10 }
  0x29   : > { %495 = vmatprep.subr.bf16.mxu0 %v771_v11 }
  0x2c   : > { %496 = vmatpush1.bf16.msra.mxu0 %v773_v12 }
  0x2d   : > { %497 = vmatprep.subr.bf16.mxu0 %v774_v13 }
  0x30   : > { %498 = vmatpush1.bf16.msra.mxu0 %v776_v16 }
  0x31   : > { %499 = vmatprep.subr.bf16.mxu0 %v777_v17 }
  0x34   : > { %500 = vmatpush1.bf16.msra.mxu0 %v779_v18 }
  0x35   : > { %501 = vmatprep.subr.bf16.mxu0 %v780_v19 }
  0x38   : > { %502 = vmatpush2.bf16.msra.mxu0 %v782_v20 }
  0x39   : > { %503 = vmatprep.subr.bf16.mxu0 %v783_v21 }
  0x3c   : > { %504 = vmatpush2.bf16.msra.mxu0 %v785_v22 }
  0x3d   : > { %505 = vmatprep.subr.bf16.mxu0 %v786_v23 }
  0x40   : > { %506 = vmatpush2.bf16.msra.mxu0 %v788_v24 }
  0x41   : > { %507 = vmatprep.subr.bf16.mxu0 %v789_v25 }
  0x44   : > { %508 = vmatpush2.bf16.msra.mxu0 %v791_v26 }
  0x45   : > { %509 = vmatprep.subr.bf16.mxu0 %v792_v27 }
  0x48   : > { %510 = vmatpush2.bf16.msra.mxu0 %v794_v28 }
  0x49   : > { %511 = vmatprep.subr.bf16.mxu0 %v795_v29 }
  0x4c   : > { %512 = vmatpush2.bf16.msra.mxu0 %v797_v30 }
  0x4d   : > { %513 = vmatprep.subr.bf16.mxu0 %v798_v31 }
  0x50   : > { %514 = vmatpush2.bf16.msra.mxu0 %v800_v32 }
  0x51   : > { %515 = vmatprep.subr.bf16.mxu0 %v801_v33 }
  0x54   : > { %516 = vmatpush2.bf16.msra.mxu0 %v803_v34 }
  0x57   : > { %518 = vmatmul.mubr.bf16.vlgmr.msra.gmra.mxu0 %v689_v35 }
 0x117   : > { %v519_v37 = vpop.f32.mrf.mxu0 }
 0x118   : > { %v526_v39 = vadd.f32 %v519_v37, %v283_v36 }
 0x119   : > { %v521_v40 = vpop.f32.mrf.mxu0  ;;  %533 = sbr.rel (%p723_p7) target bundleno = 301 (0x12d), region = 40 }
 0x11a   : > { %528 = vst [vmem:[#allocation2] sm:$0xff] %v526_v39  ;;  %v527_v41 = vadd.f32 %v521_v40, %v284_v38 }
 0x11b   : > { %v523_v42 = vpop.f32.mrf.mxu0 }
 0x11c   : > { %529 = vst [vmem:[#allocation2 + $0x8] sm:$0xff] %v527_v41 }
 0x11d   : > { %v524_v43 = vpop.f32.mrf.mxu0 }
 0x11e   : > { %v538_v44 = vlaneseq  ;;  %v536_v46 = vld [vmem:[%s935_s2] sm:$0x3] }
 0x120   : > { %v539_v45 = vshrl.u32 %v538_v44, 7 }
 0x121   : > { %v534_v49 = vld [vmem:[#allocation2] sm:$0xff] }
 0x122   : > { %v540_v47 = vsub.s32 0, %v539_v45  ;;  %v544_v48 = vsub.s32 1, %v539_v45 }
 0x123   : > { %v535_v50 = vld [vmem:[#allocation2 + $0x8] sm:$0xff] }
 0x124   : > { %v541_v51 = vrot.slane %v536_v46, %v540_v47  ;;  %v545_v52 = vrot.slane %v536_v46, %v544_v48 }
 0x126   : > { %v548_v53 = vadd.f32 %v541_v51, %v534_v49  ;;  %v549_v54 = vadd.f32 %v545_v52, %v535_v50 }
 0x128   : > { %v550_v55 = vmax.f32 %v548_v53, 0.0  ;;  %v551_v56 = vmax.f32 %v549_v54, 0.0 }
 0x12a   : > { %v730_v57 = vpack.c.bf16 %v551_v56, %v550_v55 }
 0x12c   : > { %560 = vst [vmem:[%s936_s3] sm:$0xff] %v730_v57 }
 0x12d PF: > { %s13_s14 = sadd.s32 1, %s828_s14   ;;  %s937_s12 = smov %s824_s13 }
 0x12e   : > { %p10_p8 = scmp.ge.s32.totalorder %s13_s14, 11   ;;  %s938_s13 = smov %s940_s15 }
 0x130   :  { %12 = sbr.rel (!%p10_p8) target bundleno = 2 (0x2), region = 76 }

// kernel: _lambda_.39
= control target key start
LH: loop header
LB: loop body
LE: loop exit
PB: predicated region body
PF: predicated region fallthrough
CT: control target
= control target key end

     0   :  { %s1071_s12 = smov 0   ;;  %s1073_s13 = smov 0   ;;  %s1285_s0 = inlined_call_operand.vmem [shape: bf16[8,2304], index: 0, kind: input, shape index: {}]   ;;  %s1286_s1 = inlined_call_operand.vmem [shape: bf16[2304,512], index: 1, kind: input, shape index: {}]   ;;  %s1287_s2 = inlined_call_operand.vmem [shape: f32[1,512], index: 2, kind: input, shape index: {}]   ;;  %s1288_s3 = inlined_call_operand.vmem [shape: bf16[8,512], index: 3, kind: output, shape index: {}]  }
   0x1   :  { %s1075_s14 = smov 0   ;;  %s1077_s15 = smov 0  }
   0x2   :  { %s1079_s16 = smov 0   ;;  %s1081_s17 = smov 0  }
   0x3   :  { %s1083_s18 = smov 0  }
   0x4 LB: > { %s25_s19 = sadd.s32 1, %s1040_s16  ;;  %s28_s20 = sadd.s32 1, %s1044_s17  ;;  %s1048_s18 = sphi %s1083_s18, %s13_s18   ;;  %s1044_s17 = sphi %s1081_s17, %s1294_s17   ;;  %s1040_s16 = sphi %s1079_s16, %s1293_s16   ;;  %s1036_s15 = sphi %s1077_s15, %s1292_s15   ;;  %s1032_s14 = sphi %s1075_s14, %s1291_s14   ;;  %s1028_s13 = sphi %s1073_s13, %s1290_s13   ;;  %s1024_s12 = sphi %s1071_s12, %s1289_s12  }
   0x5   : > { %p26_p0 = scmp.ge.s32.totalorder %s25_s19, 9  ;;  %p76_p1 = scmp.ne.s32.totalorder %s1028_s13, %s1024_s12 }
   0x6   : > { %p77_p2 = scmp.eq.s32.totalorder %s1048_s18, 0  ;;  %s69_s24 = sadd.s32 1, %s1028_s13 }
   0x7   : > { %s1296_s19 = smov (%p26_p0, %s25_s19), 0  ;;  %s1298_s20 = smov (!%p26_p0, %s28_s20), %s1044_s17 }
   0x8   : > { %p78_p3 = por %p77_p2, %p76_p1  ;;  %p30_p4 = scmp.ge.s32.totalorder %s1298_s20, 2 }
   0x9   : > { %s64_s21 = ssub.s32 %s1040_s16, %s1296_s19  ;;  %p833_p6 = scmp.ge.s32.totalorder %s1048_s18, 18 }
   0xa   : > { %s1300_s20 = smov (%p30_p4, %s1298_s20), 0 }
   0xb   : > { %s65_s22 = ssub.s32 %s1044_s17, %s1300_s20  ;;  %156 = sbr.rel (%p833_p6) target bundleno = 39 (0x27), region = 16 }
   0xc   : > { %s66_s23 = sor.u32 %s65_s22, %s64_s21 }
   0xd   : > { %p67_p5 = scmp.eq.s32.totalorder %s66_s23, 0 }
   0xf   : > { %s1122_s25 = scalar_select %p67_p5, %s1028_s13, %s69_s24  }
  0x10   : > { %172 = sbr.rel (!%p78_p3) target bundleno = 39 (0x27), region = 24  ;;  %s174_s26 = sand.u32 (%p78_p3), 1, %s1028_s13  }
  0x11   : > { %s836_s27 = sshll.u32 (%p78_p3), %s1044_s17, 1  ;;  %s834_s28 = sshll.u32 (%p78_p3), %s174_s26, 8 }
  0x12   : > { %s885_s29 = sshll.u32 (%p78_p3), %s1040_s16, 7  ;;  %s1136_s8 = scalar_lea.vmem (%p78_p3), [#allocation3], %s834_s28 }
  0x13   : > { %s180_s30 = sadd.s32 (%p78_p3), %s885_s29, %s836_s27 }
  0x14   : > { %s838_s4 = sshll.u32 (%p78_p3), %s180_s30, 2 }
  0x15   : > { %s1131_s7 = scalar_lea.vmem %s1286_s1, %s838_s4 }
  0x16   : > { %v273_v0 = vld [vmem:[%s1131_s7] sm:$0xff]  ;;  %v275_v1 = vld [vmem:[%s1131_s7 + $0x10] sm:$0xff] }
  0x17   : > { %v277_v2 = vld [vmem:[%s1131_s7 + $0x20] sm:$0xff]  ;;  %274 = vst [vmem:[%s1136_s8] sm:$0xff] %v273_v0  ;;  %276 = vst [vmem:[%s1136_s8 + $0x8] sm:$0xff] %v275_v1  ;;  %v279_v3 = vld [vmem:[%s1131_s7 + $0x30] sm:$0xff] }
  0x18   : > { %278 = vst [vmem:[%s1136_s8 + $0x10] sm:$0xff] %v277_v2  ;;  %v281_v4 = vld [vmem:[%s1131_s7 + $0x40] sm:$0xff]  ;;  %v283_v5 = vld [vmem:[%s1131_s7 + $0x50] sm:$0xff]  ;;  %280 = vst [vmem:[%s1136_s8 + $0x18] sm:$0xff] %v279_v3 }
  0x19   : > { %282 = vst [vmem:[%s1136_s8 + $0x20] sm:$0xff] %v281_v4  ;;  %284 = vst [vmem:[%s1136_s8 + $0x28] sm:$0xff] %v283_v5  ;;  %v285_v6 = vld [vmem:[%s1131_s7 + $0x60] sm:$0xff]  ;;  %v287_v7 = vld [vmem:[%s1131_s7 + $0x70] sm:$0xff] }
  0x1a   : > { %v289_v8 = vld [vmem:[%s1131_s7 + $0x80] sm:$0xff]  ;;  %286 = vst [vmem:[%s1136_s8 + $0x30] sm:$0xff] %v285_v6  ;;  %288 = vst [vmem:[%s1136_s8 + $0x38] sm:$0xff] %v287_v7  ;;  %v291_v9 = vld [vmem:[%s1131_s7 + $0x90] sm:$0xff] }
  0x1b   : > { %290 = vst [vmem:[%s1136_s8 + $0x40] sm:$0xff] %v289_v8  ;;  %v293_v10 = vld [vmem:[%s1131_s7 + $0xa0] sm:$0xff]  ;;  %v295_v11 = vld [vmem:[%s1131_s7 + $0xb0] sm:$0xff]  ;;  %292 = vst [vmem:[%s1136_s8 + $0x48] sm:$0xff] %v291_v9 }
  0x1c   : > { %294 = vst [vmem:[%s1136_s8 + $0x50] sm:$0xff] %v293_v10  ;;  %296 = vst [vmem:[%s1136_s8 + $0x58] sm:$0xff] %v295_v11  ;;  %v297_v12 = vld [vmem:[%s1131_s7 + $0xc0] sm:$0xff]  ;;  %v299_v13 = vld [vmem:[%s1131_s7 + $0xd0] sm:$0xff] }
  0x1d   : > { %v301_v14 = vld [vmem:[%s1131_s7 + $0xe0] sm:$0xff]  ;;  %298 = vst [vmem:[%s1136_s8 + $0x60] sm:$0xff] %v297_v12  ;;  %300 = vst [vmem:[%s1136_s8 + $0x68] sm:$0xff] %v299_v13  ;;  %v303_v15 = vld [vmem:[%s1131_s7 + $0xf0] sm:$0xff] }
  0x1e   : > { %302 = vst [vmem:[%s1136_s8 + $0x70] sm:$0xff] %v301_v14  ;;  %v305_v16 = vld [vmem:[%s1131_s7 + $0x100] sm:$0xff]  ;;  %v307_v17 = vld [vmem:[%s1131_s7 + $0x110] sm:$0xff]  ;;  %304 = vst [vmem:[%s1136_s8 + $0x78] sm:$0xff] %v303_v15 }
  0x1f   : > { %306 = vst [vmem:[%s1136_s8 + $0x80] sm:$0xff] %v305_v16  ;;  %308 = vst [vmem:[%s1136_s8 + $0x88] sm:$0xff] %v307_v17  ;;  %v309_v18 = vld [vmem:[%s1131_s7 + $0x120] sm:$0xff]  ;;  %v311_v19 = vld [vmem:[%s1131_s7 + $0x130] sm:$0xff] }
  0x20   : > { %v313_v20 = vld [vmem:[%s1131_s7 + $0x140] sm:$0xff]  ;;  %310 = vst [vmem:[%s1136_s8 + $0x90] sm:$0xff] %v309_v18  ;;  %312 = vst [vmem:[%s1136_s8 + $0x98] sm:$0xff] %v311_v19  ;;  %v315_v21 = vld [vmem:[%s1131_s7 + $0x150] sm:$0xff] }
  0x21   : > { %314 = vst [vmem:[%s1136_s8 + $0xa0] sm:$0xff] %v313_v20  ;;  %v317_v22 = vld [vmem:[%s1131_s7 + $0x160] sm:$0xff]  ;;  %v319_v23 = vld [vmem:[%s1131_s7 + $0x170] sm:$0xff]  ;;  %316 = vst [vmem:[%s1136_s8 + $0xa8] sm:$0xff] %v315_v21 }
  0x22   : > { %318 = vst [vmem:[%s1136_s8 + $0xb0] sm:$0xff] %v317_v22  ;;  %320 = vst [vmem:[%s1136_s8 + $0xb8] sm:$0xff] %v319_v23  ;;  %v321_v24 = vld [vmem:[%s1131_s7 + $0x180] sm:$0xff]  ;;  %v323_v25 = vld [vmem:[%s1131_s7 + $0x190] sm:$0xff] }
  0x23   : > { %v325_v26 = vld [vmem:[%s1131_s7 + $0x1a0] sm:$0xff]  ;;  %322 = vst [vmem:[%s1136_s8 + $0xc0] sm:$0xff] %v321_v24  ;;  %324 = vst [vmem:[%s1136_s8 + $0xc8] sm:$0xff] %v323_v25  ;;  %v327_v27 = vld [vmem:[%s1131_s7 + $0x1b0] sm:$0xff] }
  0x24   : > { %326 = vst [vmem:[%s1136_s8 + $0xd0] sm:$0xff] %v325_v26  ;;  %v329_v28 = vld [vmem:[%s1131_s7 + $0x1c0] sm:$0xff]  ;;  %v331_v29 = vld [vmem:[%s1131_s7 + $0x1d0] sm:$0xff]  ;;  %328 = vst [vmem:[%s1136_s8 + $0xd8] sm:$0xff] %v327_v27 }
  0x25   : > { %330 = vst [vmem:[%s1136_s8 + $0xe0] sm:$0xff] %v329_v28  ;;  %332 = vst [vmem:[%s1136_s8 + $0xe8] sm:$0xff] %v331_v29  ;;  %v333_v30 = vld [vmem:[%s1131_s7 + $0x1e0] sm:$0xff]  ;;  %v335_v31 = vld [vmem:[%s1131_s7 + $0x1f0] sm:$0xff] }
  0x26   : > { %334 = vst [vmem:[%s1136_s8 + $0xf0] sm:$0xff] %v333_v30  ;;  %336 = vst [vmem:[%s1136_s8 + $0xf8] sm:$0xff] %v335_v31 }
  0x27 PF: > { %p839_p7 = scmp.ge.s32.totalorder %s1048_s18, 1  ;;  %p349_p8 = scmp.lt.s32.totalorder %s1048_s18, 19 }
  0x29   : > { %p350_p9 = pnand %p839_p7, %p349_p8 }
  0x2a   : > { %s356_s9 = sand.u32 (!%p350_p9), 1, %s1024_s12   ;;  %s841_s10 = sshll.u32 (!%p350_p9), %s1032_s14, 1 }
  0x2b   : > { %353 = sbr.rel (%p350_p9) target bundleno = 337 (0x151), region = 66  ;;  %s840_s11 = sshll.u32 (!%p350_p9), %s356_s9, 8 }
  0x2c   : > { %p399_p10 = scmp.lt.s32.totalorder (!%p350_p9), %s841_s10, 17  ;;  %s843_s21 = sshll.u32 (!%p350_p9), %s1036_s15, 1 }
  0x2d   : > { %p409_p11 = scmp.lt.s32.totalorder (!%p350_p9), %s843_s21, 3  ;;  %s1221_s5 = scalar_lea.vmem (!%p350_p9), [#allocation3], %s840_s11 }
  0x2e   : > { %p846_p12 = scmp.ne.s32.totalorder (!%p350_p9), %s1032_s14, 0 }
  0x30   : > { %s1302_s10 = smov (!%p399_p10, %s841_s10), 17  ;;  %s1304_s21 = smov (!%p409_p11, %s843_s21), 3 }
  0x31   : > { %s842_s22 = sshll.u32 %s1302_s10, 2  ;;  %s411_s12 = scalar_lea.vmem %s1287_s2, %s1304_s21 }
  0x32   : > { %s1207_s26 = scalar_lea.vmem %s1285_s0, %s842_s22  ;;  %s845_s29 = sshll.u32 %s1304_s21, 2 }
  0x33   : > { %s1219_s15 = scalar_lea.vmem %s1288_s3, %s845_s29  ;;  %426 = sbr.rel (%p846_p12) target bundleno = 58 (0x3a), region = 74 }
  0x38   : > { %v1050_v32 = vmov 0.0  }
  0x39   : > { %427 = vst [vmem:[#allocation2] sm:$0xff] %v1050_v32  ;;  %428 = vst [vmem:[#allocation2 + $0x8] sm:$0xff] %v1050_v32 }
  0x3a PF: > { %v944_v33 = vld [vmem:[%s1221_s5 + $0x74] ss:$8 sps:$4 sm:$0xff]   ;;  %v946_v34 = vld [vmem:[%s1221_s5 + $0x70] ss:$8 sps:$4 sm:$0xff]   ;;  %v947_v35 = vld [vmem:[%s1221_s5 + $0x64] ss:$8 sps:$4 sm:$0xff]  }
  0x3b   : > { %631 = vmatprep.subr.bf16.mxu0 %v944_v33  ;;  %v949_v36 = vld [vmem:[%s1221_s5 + $0x60] ss:$8 sps:$4 sm:$0xff]   ;;  %v950_v37 = vld [vmem:[%s1221_s5 + $0x54] ss:$8 sps:$4 sm:$0xff]   ;;  %v952_v38 = vld [vmem:[%s1221_s5 + $0x50] ss:$8 sps:$4 sm:$0xff]  }
  0x3c   : > { %632 = vmatpush1.bf16.msra.mxu0 %v946_v34  ;;  %v953_v39 = vld [vmem:[%s1221_s5 + $0x44] ss:$8 sps:$4 sm:$0xff]   ;;  %v955_v40 = vld [vmem:[%s1221_s5 + $0x40] ss:$8 sps:$4 sm:$0xff]   ;;  %v956_v41 = vld [vmem:[%s1221_s5 + $0x34] ss:$8 sps:$4 sm:$0xff]  }
  0x3d   : > { %633 = vmatprep.subr.bf16.mxu0 %v947_v35  ;;  %v958_v42 = vld [vmem:[%s1221_s5 + $0x30] ss:$8 sps:$4 sm:$0xff]   ;;  %v959_v43 = vld [vmem:[%s1221_s5 + $0x24] ss:$8 sps:$4 sm:$0xff]   ;;  %v961_v44 = vld [vmem:[%s1221_s5 + $0x20] ss:$8 sps:$4 sm:$0xff]  }
  0x3e   : > { %v962_v45 = vld [vmem:[%s1221_s5 + $0x14] ss:$8 sps:$4 sm:$0xff]   ;;  %v964_v48 = vld [vmem:[%s1221_s5 + $0x10] ss:$8 sps:$4 sm:$0xff]   ;;  %v965_v49 = vld [vmem:[%s1221_s5 + $0x4] ss:$8 sps:$4 sm:$0xff]  }
  0x3f   : > { %v431_v46 = vld [vmem:[%s1207_s26] sm:$0xff]  ;;  %v967_v50 = vld [vmem:[%s1221_s5] ss:$8 sps:$4 sm:$0xff]   ;;  %v971_v53 = vld [vmem:[%s1221_s5 + $0xe4] ss:$8 sps:$4 sm:$0xff]   ;;  %p881_p13 = scmp.ne.s32.totalorder %s1032_s14, 8 }
  0x40   : > { %634 = vmatpush1.bf16.msra.mxu0 %v949_v36  ;;  %v848_v47 = vcombine.high %v431_v46, %v431_v46  ;;  %v968_v51 = vld [vmem:[%s1221_s5 + $0xf4] ss:$8 sps:$4 sm:$0xff]   ;;  %v970_v52 = vld [vmem:[%s1221_s5 + $0xf0] ss:$8 sps:$4 sm:$0xff]   ;;  %v973_v54 = vld [vmem:[%s1221_s5 + $0xe0] ss:$8 sps:$4 sm:$0xff]   ;;  %v847_v3 = vcombine.low %v431_v46, %v431_v46 }
  0x41   : > { %635 = vmatprep.subr.bf16.mxu0 %v950_v37  ;;  %v974_v55 = vld [vmem:[%s1221_s5 + $0xd4] ss:$8 sps:$4 sm:$0xff]   ;;  %v976_v56 = vld [vmem:[%s1221_s5 + $0xd0] ss:$8 sps:$4 sm:$0xff]   ;;  %v977_v57 = vld [vmem:[%s1221_s5 + $0xc4] ss:$8 sps:$4 sm:$0xff]  }
  0x42   : > { %663 = vmatprep.mubr.bf16.mxu0 %v848_v47  ;;  %v979_v58 = vld [vmem:[%s1221_s5 + $0xc0] ss:$8 sps:$4 sm:$0xff]   ;;  %v980_v59 = vld [vmem:[%s1221_s5 + $0xb4] ss:$8 sps:$4 sm:$0xff]   ;;  %v982_v60 = vld [vmem:[%s1221_s5 + $0xb0] ss:$8 sps:$4 sm:$0xff]  }
  0x43   : > { %v983_v61 = vld [vmem:[%s1221_s5 + $0xa4] ss:$8 sps:$4 sm:$0xff]   ;;  %v985_v62 = vld [vmem:[%s1221_s5 + $0xa0] ss:$8 sps:$4 sm:$0xff]   ;;  %v986_v63 = vld [vmem:[%s1221_s5 + $0x94] ss:$8 sps:$4 sm:$0xff]  }
  0x44   : > { %636 = vmatpush1.bf16.msra.mxu0 %v952_v38  ;;  %v988_v0 = vld [vmem:[%s1221_s5 + $0x90] ss:$8 sps:$4 sm:$0xff]   ;;  %v989_v1 = vld [vmem:[%s1221_s5 + $0x84] ss:$8 sps:$4 sm:$0xff]   ;;  %v991_v2 = vld [vmem:[%s1221_s5 + $0x80] ss:$8 sps:$4 sm:$0xff]  }
  0x45   : > { %637 = vmatprep.subr.bf16.mxu0 %v953_v39  ;;  %v429_v4 = vld [vmem:[#allocation2] sm:$0xff]  ;;  %v430_v6 = vld [vmem:[#allocation2 + $0x8] sm:$0xff] }
  0x48   : > { %638 = vmatpush1.bf16.msra.mxu0 %v955_v40 }
  0x49   : > { %639 = vmatprep.subr.bf16.mxu0 %v956_v41 }
  0x4c   : > { %640 = vmatpush1.bf16.msra.mxu0 %v958_v42 }
  0x4d   : > { %641 = vmatprep.subr.bf16.mxu0 %v959_v43 }
  0x50   : > { %642 = vmatpush1.bf16.msra.mxu0 %v961_v44 }
  0x51   : > { %643 = vmatprep.subr.bf16.mxu0 %v962_v45 }
  0x54   : > { %644 = vmatpush1.bf16.msra.mxu0 %v964_v48 }
  0x55   : > { %645 = vmatprep.subr.bf16.mxu0 %v965_v49 }
  0x58   : > { %646 = vmatpush1.bf16.msra.mxu0 %v967_v50 }
  0x59   : > { %647 = vmatprep.subr.bf16.mxu0 %v968_v51 }
  0x5c   : > { %648 = vmatpush2.bf16.msra.mxu0 %v970_v52 }
  0x5d   : > { %649 = vmatprep.subr.bf16.mxu0 %v971_v53 }
  0x60   : > { %650 = vmatpush2.bf16.msra.mxu0 %v973_v54 }
  0x61   : > { %651 = vmatprep.subr.bf16.mxu0 %v974_v55 }
  0x64   : > { %652 = vmatpush2.bf16.msra.mxu0 %v976_v56 }
  0x65   : > { %653 = vmatprep.subr.bf16.mxu0 %v977_v57 }
  0x68   : > { %654 = vmatpush2.bf16.msra.mxu0 %v979_v58 }
  0x69   : > { %655 = vmatprep.subr.bf16.mxu0 %v980_v59 }
  0x6c   : > { %656 = vmatpush2.bf16.msra.mxu0 %v982_v60 }
  0x6d   : > { %657 = vmatprep.subr.bf16.mxu0 %v983_v61 }
  0x70   : > { %658 = vmatpush2.bf16.msra.mxu0 %v985_v62 }
  0x71   : > { %659 = vmatprep.subr.bf16.mxu0 %v986_v63 }
  0x74   : > { %660 = vmatpush2.bf16.msra.mxu0 %v988_v0 }
  0x75   : > { %661 = vmatprep.subr.bf16.mxu0 %v989_v1 }
  0x78   : > { %662 = vmatpush2.bf16.msra.mxu0 %v991_v2 }
  0x7b   : > { %664 = vmatmul.mubr.bf16.vlgmr.msra.gmra.mxu0 %v847_v3 }
 0x13b   : > { %v665_v5 = vpop.f32.mrf.mxu0 }
 0x13c   : > { %v672_v7 = vadd.f32 %v665_v5, %v429_v4 }
 0x13d   : > { %v667_v8 = vpop.f32.mrf.mxu0  ;;  %679 = sbr.rel (%p881_p13) target bundleno = 337 (0x151), region = 78 }
 0x13e   : > { %674 = vst [vmem:[#allocation2] sm:$0xff] %v672_v7  ;;  %v673_v9 = vadd.f32 %v667_v8, %v430_v6 }
 0x13f   : > { %v669_v10 = vpop.f32.mrf.mxu0 }
 0x140   : > { %675 = vst [vmem:[#allocation2 + $0x8] sm:$0xff] %v673_v9 }
 0x141   : > { %v670_v11 = vpop.f32.mrf.mxu0 }
 0x142   : > { %v684_v12 = vlaneseq  ;;  %v682_v14 = vld [vmem:[%s411_s12] sm:$0x3] }
 0x144   : > { %v685_v13 = vshrl.u32 %v684_v12, 7 }
 0x145   : > { %v680_v17 = vld [vmem:[#allocation2] sm:$0xff] }
 0x146   : > { %v686_v15 = vsub.s32 0, %v685_v13  ;;  %v690_v16 = vsub.s32 1, %v685_v13 }
 0x147   : > { %v681_v18 = vld [vmem:[#allocation2 + $0x8] sm:$0xff] }
 0x148   : > { %v687_v19 = vrot.slane %v682_v14, %v686_v15  ;;  %v691_v20 = vrot.slane %v682_v14, %v690_v16 }
 0x14a   : > { %v694_v21 = vadd.f32 %v687_v19, %v680_v17  ;;  %v695_v22 = vadd.f32 %v691_v20, %v681_v18 }
 0x14c   : > { %v696_v23 = vmax.f32 %v694_v21, 0.0  ;;  %v697_v24 = vmax.f32 %v695_v22, 0.0 }
 0x14e   : > { %v886_v25 = vpack.c.bf16 %v697_v24, %v696_v23 }
 0x150   : > { %706 = vst [vmem:[%s1219_s15] sm:$0xff] %v886_v25 }
 0x151 PF: > { %s13_s18 = sadd.s32 1, %s1048_s18   ;;  %s1289_s12 = smov %s1028_s13 }
 0x152   : > { %p10_p0 = scmp.ge.s32.totalorder %s13_s18, 20   ;;  %s1290_s13 = smov %s1122_s25 }
 0x153   : > { %s1291_s14 = smov %s1040_s16  ;;  %s1292_s15 = smov %s1044_s17 }
 0x154   : > { %s1293_s16 = smov %s1296_s19  ;;  %s1294_s17 = smov %s1300_s20 }
 0x155   :  { %12 = sbr.rel (!%p10_p0) target bundleno = 4 (0x4), region = 119 }

// kernel: _lambda_.38
= control target key start
LH: loop header
LB: loop body
LE: loop exit
PB: predicated region body
PF: predicated region fallthrough
CT: control target
= control target key end

     0   :  { %s1029_s12 = smov 0   ;;  %s1031_s13 = smov 0   ;;  %s1208_s0 = inlined_call_operand.vmem [shape: bf16[8,256], index: 0, kind: input, shape index: {}]   ;;  %s1209_s1 = inlined_call_operand.vmem [shape: bf16[256,512], index: 1, kind: input, shape index: {}]   ;;  %s1210_s2 = inlined_call_operand.vmem [shape: f32[1,512], index: 2, kind: input, shape index: {}]   ;;  %s1211_s3 = inlined_call_operand.vmem [shape: bf16[8,512], index: 3, kind: output, shape index: {}]  }
   0x1   :  { %s1033_s14 = smov 0   ;;  %s1035_s15 = smov 0  }
   0x2   :  { %s1037_s16 = smov 0  }
   0x3 LB: > { %s28_s17 = sadd.s32 1, %s1003_s15  ;;  %p76_p1 = scmp.ne.s32.totalorder %s995_s13, %s991_s12  ;;  %s1007_s16 = sphi %s1037_s16, %s13_s16   ;;  %s1003_s15 = sphi %s1035_s15, %s1215_s15   ;;  %s999_s14 = sphi %s1033_s14, %s1214_s14   ;;  %s995_s13 = sphi %s1031_s13, %s1213_s13   ;;  %s991_s12 = sphi %s1029_s12, %s1212_s12  }
   0x4   : > { %p30_p0 = scmp.ge.s32.totalorder %s28_s17, 2  ;;  %p77_p2 = scmp.eq.s32.totalorder %s1007_s16, 0 }
   0x5   : > { %s69_s19 = sadd.s32 1, %s995_s13  ;;  %p831_p5 = scmp.ge.s32.totalorder %s1007_s16, 2 }
   0x6   : > { %s1217_s17 = smov (%p30_p0, %s28_s17), 0  ;;  %p78_p3 = por %p77_p2, %p76_p1 }
   0x7   : > { %s65_s18 = ssub.s32 %s1003_s15, %s1217_s17  ;;  %169 = sbr.rel (%p831_p5) target bundleno = 32 (0x20), region = 20 }
   0x8   : > { %p67_p4 = scmp.eq.s32.totalorder %s65_s18, 0 }
   0xa   : > { %s1064_s20 = scalar_select %p67_p4, %s995_s13, %s69_s19  }
   0xc   : > { %172 = sbr.rel (!%p78_p3) target bundleno = 32 (0x20), region = 24  ;;  %s174_s21 = sand.u32 (%p78_p3), 1, %s995_s13  }
   0xd   : > { %s877_s22 = sshll.u32 (%p78_p3), %s1003_s15, 3  ;;  %s832_s23 = sshll.u32 (%p78_p3), %s174_s21, 8 }
   0xe   : > { %s1072_s26 = scalar_lea.vmem (%p78_p3), %s1209_s1, %s877_s22  ;;  %s1077_s27 = scalar_lea.vmem (%p78_p3), [#allocation3], %s832_s23 }
   0xf   : > { %v273_v0 = vld [vmem:[%s1072_s26] sm:$0xff] (%p78_p3)  ;;  %v275_v1 = vld [vmem:[%s1072_s26 + $0x10] sm:$0xff] (%p78_p3) }
  0x10   : > { %v277_v2 = vld [vmem:[%s1072_s26 + $0x20] sm:$0xff] (%p78_p3)  ;;  %274 = vst [vmem:[%s1077_s27] sm:$0xff] (%p78_p3), %v273_v0  ;;  %276 = vst [vmem:[%s1077_s27 + $0x8] sm:$0xff] (%p78_p3), %v275_v1  ;;  %v279_v3 = vld [vmem:[%s1072_s26 + $0x30] sm:$0xff] (%p78_p3) }
  0x11   : > { %278 = vst [vmem:[%s1077_s27 + $0x10] sm:$0xff] %v277_v2  ;;  %v281_v4 = vld [vmem:[%s1072_s26 + $0x40] sm:$0xff]  ;;  %v283_v5 = vld [vmem:[%s1072_s26 + $0x50] sm:$0xff]  ;;  %280 = vst [vmem:[%s1077_s27 + $0x18] sm:$0xff] %v279_v3 }
  0x12   : > { %282 = vst [vmem:[%s1077_s27 + $0x20] sm:$0xff] %v281_v4  ;;  %284 = vst [vmem:[%s1077_s27 + $0x28] sm:$0xff] %v283_v5  ;;  %v285_v6 = vld [vmem:[%s1072_s26 + $0x60] sm:$0xff]  ;;  %v287_v7 = vld [vmem:[%s1072_s26 + $0x70] sm:$0xff] }
  0x13   : > { %v289_v8 = vld [vmem:[%s1072_s26 + $0x80] sm:$0xff]  ;;  %286 = vst [vmem:[%s1077_s27 + $0x30] sm:$0xff] %v285_v6  ;;  %288 = vst [vmem:[%s1077_s27 + $0x38] sm:$0xff] %v287_v7  ;;  %v291_v9 = vld [vmem:[%s1072_s26 + $0x90] sm:$0xff] }
  0x14   : > { %290 = vst [vmem:[%s1077_s27 + $0x40] sm:$0xff] %v289_v8  ;;  %v293_v10 = vld [vmem:[%s1072_s26 + $0xa0] sm:$0xff]  ;;  %v295_v11 = vld [vmem:[%s1072_s26 + $0xb0] sm:$0xff]  ;;  %292 = vst [vmem:[%s1077_s27 + $0x48] sm:$0xff] %v291_v9 }
  0x15   : > { %294 = vst [vmem:[%s1077_s27 + $0x50] sm:$0xff] %v293_v10  ;;  %296 = vst [vmem:[%s1077_s27 + $0x58] sm:$0xff] %v295_v11  ;;  %v297_v12 = vld [vmem:[%s1072_s26 + $0xc0] sm:$0xff]  ;;  %v299_v13 = vld [vmem:[%s1072_s26 + $0xd0] sm:$0xff] }
  0x16   : > { %v301_v14 = vld [vmem:[%s1072_s26 + $0xe0] sm:$0xff]  ;;  %298 = vst [vmem:[%s1077_s27 + $0x60] sm:$0xff] %v297_v12  ;;  %300 = vst [vmem:[%s1077_s27 + $0x68] sm:$0xff] %v299_v13  ;;  %v303_v15 = vld [vmem:[%s1072_s26 + $0xf0] sm:$0xff] }
  0x17   : > { %302 = vst [vmem:[%s1077_s27 + $0x70] sm:$0xff] %v301_v14  ;;  %v305_v16 = vld [vmem:[%s1072_s26 + $0x100] sm:$0xff]  ;;  %v307_v17 = vld [vmem:[%s1072_s26 + $0x110] sm:$0xff]  ;;  %304 = vst [vmem:[%s1077_s27 + $0x78] sm:$0xff] %v303_v15 }
  0x18   : > { %306 = vst [vmem:[%s1077_s27 + $0x80] sm:$0xff] %v305_v16  ;;  %308 = vst [vmem:[%s1077_s27 + $0x88] sm:$0xff] %v307_v17  ;;  %v309_v18 = vld [vmem:[%s1072_s26 + $0x120] sm:$0xff]  ;;  %v311_v19 = vld [vmem:[%s1072_s26 + $0x130] sm:$0xff] }
  0x19   : > { %v313_v20 = vld [vmem:[%s1072_s26 + $0x140] sm:$0xff]  ;;  %310 = vst [vmem:[%s1077_s27 + $0x90] sm:$0xff] %v309_v18  ;;  %312 = vst [vmem:[%s1077_s27 + $0x98] sm:$0xff] %v311_v19  ;;  %v315_v21 = vld [vmem:[%s1072_s26 + $0x150] sm:$0xff] }
  0x1a   : > { %314 = vst [vmem:[%s1077_s27 + $0xa0] sm:$0xff] %v313_v20  ;;  %v317_v22 = vld [vmem:[%s1072_s26 + $0x160] sm:$0xff]  ;;  %v319_v23 = vld [vmem:[%s1072_s26 + $0x170] sm:$0xff]  ;;  %316 = vst [vmem:[%s1077_s27 + $0xa8] sm:$0xff] %v315_v21 }
  0x1b   : > { %318 = vst [vmem:[%s1077_s27 + $0xb0] sm:$0xff] %v317_v22  ;;  %320 = vst [vmem:[%s1077_s27 + $0xb8] sm:$0xff] %v319_v23  ;;  %v321_v24 = vld [vmem:[%s1072_s26 + $0x180] sm:$0xff]  ;;  %v323_v25 = vld [vmem:[%s1072_s26 + $0x190] sm:$0xff] }
  0x1c   : > { %v325_v26 = vld [vmem:[%s1072_s26 + $0x1a0] sm:$0xff]  ;;  %322 = vst [vmem:[%s1077_s27 + $0xc0] sm:$0xff] %v321_v24  ;;  %324 = vst [vmem:[%s1077_s27 + $0xc8] sm:$0xff] %v323_v25  ;;  %v327_v27 = vld [vmem:[%s1072_s26 + $0x1b0] sm:$0xff] }
  0x1d   : > { %326 = vst [vmem:[%s1077_s27 + $0xd0] sm:$0xff] %v325_v26  ;;  %v329_v28 = vld [vmem:[%s1072_s26 + $0x1c0] sm:$0xff]  ;;  %v331_v29 = vld [vmem:[%s1072_s26 + $0x1d0] sm:$0xff]  ;;  %328 = vst [vmem:[%s1077_s27 + $0xd8] sm:$0xff] %v327_v27 }
  0x1e   : > { %330 = vst [vmem:[%s1077_s27 + $0xe0] sm:$0xff] %v329_v28  ;;  %332 = vst [vmem:[%s1077_s27 + $0xe8] sm:$0xff] %v331_v29  ;;  %v333_v30 = vld [vmem:[%s1072_s26 + $0x1e0] sm:$0xff]  ;;  %v335_v31 = vld [vmem:[%s1072_s26 + $0x1f0] sm:$0xff] }
  0x1f   : > { %334 = vst [vmem:[%s1077_s27 + $0xf0] sm:$0xff] %v333_v30  ;;  %336 = vst [vmem:[%s1077_s27 + $0xf8] sm:$0xff] %v335_v31 }
  0x20 PF: > { %p835_p6 = scmp.ge.s32.totalorder %s1007_s16, 1  ;;  %p349_p7 = scmp.lt.s32.totalorder %s1007_s16, 3 }
  0x22   : > { %p350_p8 = pnand %p835_p6, %p349_p7 }
  0x23   : > { %s356_s28 = sand.u32 (!%p350_p8), 1, %s991_s12   ;;  %s837_s6 = sshll.u32 (!%p350_p8), %s999_s14, 1 }
  0x24   : > { %353 = sbr.rel (%p350_p8) target bundleno = 306 (0x132), region = 66  ;;  %s836_s4 = sshll.u32 (!%p350_p8), %s356_s28, 8 }
  0x25   : > { %s1150_s5 = scalar_lea.vmem (!%p350_p8), [#allocation3], %s836_s4  ;;  %p409_p9 = scmp.lt.s32.totalorder (!%p350_p8), %s837_s6, 3 }
  0x29   : > { %v1146_v32 = vld [vmem:[%s1208_s0] sm:$0xff]  ;;  %v919_v34 = vld [vmem:[%s1150_s5 + $0x74] ss:$8 sps:$4 sm:$0xff]   ;;  %v921_v35 = vld [vmem:[%s1150_s5 + $0x70] ss:$8 sps:$4 sm:$0xff]   ;;  %v683_v3 = vlaneseq  ;;  %s1219_s6 = smov (!%p409_p9, %s837_s6), 3 }
  0x2a   : > { %v841_v33 = vcombine.high %v1146_v32, %v1146_v32  ;;  %631 = vmatprep.subr.bf16.mxu0 %v919_v34  ;;  %v922_v36 = vld [vmem:[%s1150_s5 + $0x64] ss:$8 sps:$4 sm:$0xff]   ;;  %v924_v37 = vld [vmem:[%s1150_s5 + $0x60] ss:$8 sps:$4 sm:$0xff]   ;;  %v925_v38 = vld [vmem:[%s1150_s5 + $0x54] ss:$8 sps:$4 sm:$0xff]   ;;  %v840_v2 = vcombine.low %v1146_v32, %v1146_v32  ;;  %s411_s9 = scalar_lea.vmem %s1210_s2, %s1219_s6 }
  0x2b   : > { %632 = vmatpush1.bf16.msra.mxu0 %v921_v35  ;;  %v927_v39 = vld [vmem:[%s1150_s5 + $0x50] ss:$8 sps:$4 sm:$0xff]   ;;  %v928_v40 = vld [vmem:[%s1150_s5 + $0x44] ss:$8 sps:$4 sm:$0xff]   ;;  %v930_v41 = vld [vmem:[%s1150_s5 + $0x40] ss:$8 sps:$4 sm:$0xff]  }
  0x2c   : > { %663 = vmatprep.mubr.bf16.mxu0 %v841_v33  ;;  %633 = vmatprep.subr.bf16.mxu0 %v922_v36  ;;  %v931_v42 = vld [vmem:[%s1150_s5 + $0x34] ss:$8 sps:$4 sm:$0xff]   ;;  %v933_v43 = vld [vmem:[%s1150_s5 + $0x30] ss:$8 sps:$4 sm:$0xff]   ;;  %v934_v44 = vld [vmem:[%s1150_s5 + $0x24] ss:$8 sps:$4 sm:$0xff]  }
  0x2d   : > { %v936_v45 = vld [vmem:[%s1150_s5 + $0x20] ss:$8 sps:$4 sm:$0xff]   ;;  %v937_v46 = vld [vmem:[%s1150_s5 + $0x14] ss:$8 sps:$4 sm:$0xff]   ;;  %v939_v47 = vld [vmem:[%s1150_s5 + $0x10] ss:$8 sps:$4 sm:$0xff]  }
  0x2e   : > { %v940_v48 = vld [vmem:[%s1150_s5 + $0x4] ss:$8 sps:$4 sm:$0xff]   ;;  %v942_v49 = vld [vmem:[%s1150_s5] ss:$8 sps:$4 sm:$0xff]   ;;  %v943_v50 = vld [vmem:[%s1150_s5 + $0xf4] ss:$8 sps:$4 sm:$0xff]  }
  0x2f   : > { %634 = vmatpush1.bf16.msra.mxu0 %v924_v37  ;;  %v945_v51 = vld [vmem:[%s1150_s5 + $0xf0] ss:$8 sps:$4 sm:$0xff]   ;;  %v946_v52 = vld [vmem:[%s1150_s5 + $0xe4] ss:$8 sps:$4 sm:$0xff]   ;;  %v948_v53 = vld [vmem:[%s1150_s5 + $0xe0] ss:$8 sps:$4 sm:$0xff]  }
  0x30   : > { %635 = vmatprep.subr.bf16.mxu0 %v925_v38  ;;  %v949_v54 = vld [vmem:[%s1150_s5 + $0xd4] ss:$8 sps:$4 sm:$0xff]   ;;  %v951_v55 = vld [vmem:[%s1150_s5 + $0xd0] ss:$8 sps:$4 sm:$0xff]   ;;  %v952_v56 = vld [vmem:[%s1150_s5 + $0xc4] ss:$8 sps:$4 sm:$0xff]  }
  0x31   : > { %v954_v57 = vld [vmem:[%s1150_s5 + $0xc0] ss:$8 sps:$4 sm:$0xff]   ;;  %v955_v58 = vld [vmem:[%s1150_s5 + $0xb4] ss:$8 sps:$4 sm:$0xff]   ;;  %v957_v59 = vld [vmem:[%s1150_s5 + $0xb0] ss:$8 sps:$4 sm:$0xff]  }
  0x32   : > { %v958_v60 = vld [vmem:[%s1150_s5 + $0xa4] ss:$8 sps:$4 sm:$0xff]   ;;  %v960_v61 = vld [vmem:[%s1150_s5 + $0xa0] ss:$8 sps:$4 sm:$0xff]   ;;  %v961_v62 = vld [vmem:[%s1150_s5 + $0x94] ss:$8 sps:$4 sm:$0xff]  }
  0x33   : > { %636 = vmatpush1.bf16.msra.mxu0 %v927_v39  ;;  %v963_v63 = vld [vmem:[%s1150_s5 + $0x90] ss:$8 sps:$4 sm:$0xff]   ;;  %v964_v0 = vld [vmem:[%s1150_s5 + $0x84] ss:$8 sps:$4 sm:$0xff]   ;;  %v966_v1 = vld [vmem:[%s1150_s5 + $0x80] ss:$8 sps:$4 sm:$0xff]  }
  0x34   : > { %637 = vmatprep.subr.bf16.mxu0 %v928_v40  ;;  %v684_v4 = vshrl.u32 %v683_v3, 7  ;;  %v681_v7 = vld [vmem:[%s411_s9] sm:$0x3]  ;;  %s839_s10 = sshll.u32 %s1219_s6, 2 }
  0x35   : > { %s421_s14 = scalar_lea.vmem %s1211_s3, %s839_s10 }
  0x36   : > { %v685_v5 = vsub.s32 0, %v684_v4  ;;  %v689_v6 = vsub.s32 1, %v684_v4 }
  0x37   : > { %638 = vmatpush1.bf16.msra.mxu0 %v930_v41 }
  0x38   : > { %639 = vmatprep.subr.bf16.mxu0 %v931_v42  ;;  %v686_v8 = vrot.slane %v681_v7, %v685_v5  ;;  %v690_v9 = vrot.slane %v681_v7, %v689_v6 }
  0x3b   : > { %640 = vmatpush1.bf16.msra.mxu0 %v933_v43 }
  0x3c   : > { %641 = vmatprep.subr.bf16.mxu0 %v934_v44 }
  0x3f   : > { %642 = vmatpush1.bf16.msra.mxu0 %v936_v45 }
  0x40   : > { %643 = vmatprep.subr.bf16.mxu0 %v937_v46 }
  0x43   : > { %644 = vmatpush1.bf16.msra.mxu0 %v939_v47 }
  0x44   : > { %645 = vmatprep.subr.bf16.mxu0 %v940_v48 }
  0x47   : > { %646 = vmatpush1.bf16.msra.mxu0 %v942_v49 }
  0x48   : > { %647 = vmatprep.subr.bf16.mxu0 %v943_v50 }
  0x4b   : > { %648 = vmatpush2.bf16.msra.mxu0 %v945_v51 }
  0x4c   : > { %649 = vmatprep.subr.bf16.mxu0 %v946_v52 }
  0x4f   : > { %650 = vmatpush2.bf16.msra.mxu0 %v948_v53 }
  0x50   : > { %651 = vmatprep.subr.bf16.mxu0 %v949_v54 }
  0x53   : > { %652 = vmatpush2.bf16.msra.mxu0 %v951_v55 }
  0x54   : > { %653 = vmatprep.subr.bf16.mxu0 %v952_v56 }
  0x57   : > { %654 = vmatpush2.bf16.msra.mxu0 %v954_v57 }
  0x58   : > { %655 = vmatprep.subr.bf16.mxu0 %v955_v58 }
  0x5b   : > { %656 = vmatpush2.bf16.msra.mxu0 %v957_v59 }
  0x5c   : > { %657 = vmatprep.subr.bf16.mxu0 %v958_v60 }
  0x5f   : > { %658 = vmatpush2.bf16.msra.mxu0 %v960_v61 }
  0x60   : > { %659 = vmatprep.subr.bf16.mxu0 %v961_v62 }
  0x63   : > { %660 = vmatpush2.bf16.msra.mxu0 %v963_v63 }
  0x64   : > { %661 = vmatprep.subr.bf16.mxu0 %v964_v0 }
  0x67   : > { %662 = vmatpush2.bf16.msra.mxu0 %v966_v1 }
  0x6a   : > { %664 = vmatmul.mubr.bf16.vlgmr.msra.gmra.mxu0 %v840_v2 }
 0x12a   : > { %v665_v10 = vpop.f32.mrf.mxu0 }
 0x12b   : > { %v693_v12 = vadd.f32 %v686_v8, %v665_v10 }
 0x12c   : > { %v667_v11 = vpop.f32.mrf.mxu0 }
 0x12d   : > { %v694_v13 = vadd.f32 %v690_v9, %v667_v11 }
 0x12e   : > { %v669_v14 = vpop.f32.mrf.mxu0 }
 0x12f   : > { %v878_v15 = vpack.c.bf16 %v694_v13, %v693_v12 }
 0x130   : > { %v670_v16 = vpop.f32.mrf.mxu0 }
 0x131   : > { %703 = vst [vmem:[%s421_s14] sm:$0xff] %v878_v15 }
 0x132 PF: > { %s13_s16 = sadd.s32 1, %s1007_s16   ;;  %s1212_s12 = smov %s995_s13 }
 0x133   : > { %p10_p10 = scmp.ge.s32.totalorder %s13_s16, 4   ;;  %s1213_s13 = smov %s1064_s20 }
 0x134   : > { %s1214_s14 = smov %s1003_s15  ;;  %s1215_s15 = smov %s1217_s17 }
 0x135   :  { %12 = sbr.rel (!%p10_p10) target bundleno = 3 (0x3), region = 119 }

// kernel: _lambda_.40
= control target key start
LH: loop header
LB: loop body
LE: loop exit
PB: predicated region body
PF: predicated region fallthrough
CT: control target
= control target key end

     0   :  { %s1617_s15 = smov 0   ;;  %s1619_s16 = smov 0   ;;  %s1934_s0 = inlined_call_operand.vmem [shape: bf16[8,4608], index: 0, kind: input, shape index: {}]   ;;  %s1935_s1 = inlined_call_operand.vmem [shape: bf16[4608,512], index: 1, kind: input, shape index: {}]   ;;  %s1936_s2 = inlined_call_operand.vmem [shape: f32[1,512], index: 2, kind: input, shape index: {}]   ;;  %s1937_s3 = inlined_call_operand.vmem [shape: bf16[8,512], index: 3, kind: input, shape index: {}]   ;;  %s1938_s4 = inlined_call_operand.vmem [shape: bf16[8,512], index: 4, kind: output, shape index: {}]  }
   0x1   :  { %s1621_s17 = smov 0   ;;  %s1623_s18 = smov 0  }
   0x2   :  { %s1625_s19 = smov 0   ;;  %s1627_s20 = smov 0  }
   0x3   :  { %s1629_s21 = smov 0  }
   0x4 LB: > { %s26_s22 = sadd.s32 1, %s1581_s19  ;;  %s29_s23 = sadd.s32 1, %s1585_s20  ;;  %s1589_s21 = sphi %s1629_s21, %s14_s21   ;;  %s1585_s20 = sphi %s1627_s20, %s1944_s20   ;;  %s1581_s19 = sphi %s1625_s19, %s1943_s19   ;;  %s1577_s18 = sphi %s1623_s18, %s1942_s18   ;;  %s1573_s17 = sphi %s1621_s17, %s1941_s17   ;;  %s1569_s16 = sphi %s1619_s16, %s1940_s16   ;;  %s1565_s15 = sphi %s1617_s15, %s1939_s15  }
   0x5   : > { %p27_p0 = scmp.ge.s32.totalorder %s26_s22, 9  ;;  %p77_p1 = scmp.ne.s32.totalorder %s1569_s16, %s1565_s15 }
   0x6   : > { %p78_p2 = scmp.eq.s32.totalorder %s1589_s21, 0  ;;  %s70_s27 = sadd.s32 1, %s1569_s16 }
   0x7   : > { %s1946_s22 = smov (%p27_p0, %s26_s22), 0  ;;  %s1948_s23 = smov (!%p27_p0, %s29_s23), %s1585_s20 }
   0x8   : > { %p79_p3 = por %p78_p2, %p77_p1  ;;  %p31_p4 = scmp.ge.s32.totalorder %s1948_s23, 2 }
   0x9   : > { %s65_s24 = ssub.s32 %s1581_s19, %s1946_s22  ;;  %p1288_p6 = scmp.ge.s32.totalorder %s1589_s21, 18 }
   0xa   : > { %s1950_s23 = smov (%p31_p4, %s1948_s23), 0 }
   0xb   : > { %s66_s25 = ssub.s32 %s1585_s20, %s1950_s23  ;;  %185 = sbr.rel (%p1288_p6) target bundleno = 55 (0x37), region = 16 }
   0xc   : > { %s67_s26 = sor.u32 %s66_s25, %s65_s24 }
   0xd   : > { %p68_p5 = scmp.eq.s32.totalorder %s67_s26, 0 }
   0xf   : > { %s1668_s28 = scalar_select %p68_p5, %s1569_s16, %s70_s27  }
  0x10   : > { %201 = sbr.rel (!%p79_p3) target bundleno = 55 (0x37), region = 24  ;;  %s203_s29 = sand.u32 (%p79_p3), 1, %s1569_s16  }
  0x11   : > { %s1291_s30 = sshll.u32 (%p79_p3), %s1585_s20, 1  ;;  %s1289_s5 = sshll.u32 (%p79_p3), %s203_s29, 9 }
  0x12   : > { %s1376_s6 = sshll.u32 (%p79_p3), %s1581_s19, 8  ;;  %s1682_s12 = scalar_lea.vmem (%p79_p3), [#allocation3], %s1289_s5 }
  0x13   : > { %s209_s7 = sadd.s32 (%p79_p3), %s1376_s6, %s1291_s30 }
  0x14   : > { %s1293_s8 = sshll.u32 (%p79_p3), %s209_s7, 2 }
  0x15   : > { %s1677_s11 = scalar_lea.vmem %s1935_s1, %s1293_s8 }
  0x16   : > { %v366_v0 = vld [vmem:[%s1677_s11] sm:$0xff]  ;;  %v368_v1 = vld [vmem:[%s1677_s11 + $0x10] sm:$0xff] }
  0x17   : > { %v370_v2 = vld [vmem:[%s1677_s11 + $0x20] sm:$0xff]  ;;  %367 = vst [vmem:[%s1682_s12] sm:$0xff] %v366_v0  ;;  %369 = vst [vmem:[%s1682_s12 + $0x8] sm:$0xff] %v368_v1  ;;  %v372_v3 = vld [vmem:[%s1677_s11 + $0x30] sm:$0xff] }
  0x18   : > { %371 = vst [vmem:[%s1682_s12 + $0x10] sm:$0xff] %v370_v2  ;;  %v374_v4 = vld [vmem:[%s1677_s11 + $0x40] sm:$0xff]  ;;  %v376_v5 = vld [vmem:[%s1677_s11 + $0x50] sm:$0xff]  ;;  %373 = vst [vmem:[%s1682_s12 + $0x18] sm:$0xff] %v372_v3 }
  0x19   : > { %375 = vst [vmem:[%s1682_s12 + $0x20] sm:$0xff] %v374_v4  ;;  %377 = vst [vmem:[%s1682_s12 + $0x28] sm:$0xff] %v376_v5  ;;  %v378_v6 = vld [vmem:[%s1677_s11 + $0x60] sm:$0xff]  ;;  %v380_v7 = vld [vmem:[%s1677_s11 + $0x70] sm:$0xff] }
  0x1a   : > { %v382_v8 = vld [vmem:[%s1677_s11 + $0x80] sm:$0xff]  ;;  %379 = vst [vmem:[%s1682_s12 + $0x30] sm:$0xff] %v378_v6  ;;  %381 = vst [vmem:[%s1682_s12 + $0x38] sm:$0xff] %v380_v7  ;;  %v384_v9 = vld [vmem:[%s1677_s11 + $0x90] sm:$0xff] }
  0x1b   : > { %383 = vst [vmem:[%s1682_s12 + $0x40] sm:$0xff] %v382_v8  ;;  %v386_v10 = vld [vmem:[%s1677_s11 + $0xa0] sm:$0xff]  ;;  %v388_v11 = vld [vmem:[%s1677_s11 + $0xb0] sm:$0xff]  ;;  %385 = vst [vmem:[%s1682_s12 + $0x48] sm:$0xff] %v384_v9 }
  0x1c   : > { %387 = vst [vmem:[%s1682_s12 + $0x50] sm:$0xff] %v386_v10  ;;  %389 = vst [vmem:[%s1682_s12 + $0x58] sm:$0xff] %v388_v11  ;;  %v390_v12 = vld [vmem:[%s1677_s11 + $0xc0] sm:$0xff]  ;;  %v392_v13 = vld [vmem:[%s1677_s11 + $0xd0] sm:$0xff] }
  0x1d   : > { %v394_v14 = vld [vmem:[%s1677_s11 + $0xe0] sm:$0xff]  ;;  %391 = vst [vmem:[%s1682_s12 + $0x60] sm:$0xff] %v390_v12  ;;  %393 = vst [vmem:[%s1682_s12 + $0x68] sm:$0xff] %v392_v13  ;;  %v396_v15 = vld [vmem:[%s1677_s11 + $0xf0] sm:$0xff] }
  0x1e   : > { %395 = vst [vmem:[%s1682_s12 + $0x70] sm:$0xff] %v394_v14  ;;  %v398_v16 = vld [vmem:[%s1677_s11 + $0x100] sm:$0xff]  ;;  %v400_v17 = vld [vmem:[%s1677_s11 + $0x110] sm:$0xff]  ;;  %397 = vst [vmem:[%s1682_s12 + $0x78] sm:$0xff] %v396_v15 }
  0x1f   : > { %399 = vst [vmem:[%s1682_s12 + $0x80] sm:$0xff] %v398_v16  ;;  %401 = vst [vmem:[%s1682_s12 + $0x88] sm:$0xff] %v400_v17  ;;  %v402_v18 = vld [vmem:[%s1677_s11 + $0x120] sm:$0xff]  ;;  %v404_v19 = vld [vmem:[%s1677_s11 + $0x130] sm:$0xff] }
  0x20   : > { %v406_v20 = vld [vmem:[%s1677_s11 + $0x140] sm:$0xff]  ;;  %403 = vst [vmem:[%s1682_s12 + $0x90] sm:$0xff] %v402_v18  ;;  %405 = vst [vmem:[%s1682_s12 + $0x98] sm:$0xff] %v404_v19  ;;  %v408_v21 = vld [vmem:[%s1677_s11 + $0x150] sm:$0xff] }
  0x21   : > { %407 = vst [vmem:[%s1682_s12 + $0xa0] sm:$0xff] %v406_v20  ;;  %v410_v22 = vld [vmem:[%s1677_s11 + $0x160] sm:$0xff]  ;;  %v412_v23 = vld [vmem:[%s1677_s11 + $0x170] sm:$0xff]  ;;  %409 = vst [vmem:[%s1682_s12 + $0xa8] sm:$0xff] %v408_v21 }
  0x22   : > { %411 = vst [vmem:[%s1682_s12 + $0xb0] sm:$0xff] %v410_v22  ;;  %413 = vst [vmem:[%s1682_s12 + $0xb8] sm:$0xff] %v412_v23  ;;  %v414_v24 = vld [vmem:[%s1677_s11 + $0x180] sm:$0xff]  ;;  %v416_v25 = vld [vmem:[%s1677_s11 + $0x190] sm:$0xff] }
  0x23   : > { %v418_v26 = vld [vmem:[%s1677_s11 + $0x1a0] sm:$0xff]  ;;  %415 = vst [vmem:[%s1682_s12 + $0xc0] sm:$0xff] %v414_v24  ;;  %417 = vst [vmem:[%s1682_s12 + $0xc8] sm:$0xff] %v416_v25  ;;  %v420_v27 = vld [vmem:[%s1677_s11 + $0x1b0] sm:$0xff] }
  0x24   : > { %419 = vst [vmem:[%s1682_s12 + $0xd0] sm:$0xff] %v418_v26  ;;  %v422_v28 = vld [vmem:[%s1677_s11 + $0x1c0] sm:$0xff]  ;;  %v424_v29 = vld [vmem:[%s1677_s11 + $0x1d0] sm:$0xff]  ;;  %421 = vst [vmem:[%s1682_s12 + $0xd8] sm:$0xff] %v420_v27 }
  0x25   : > { %423 = vst [vmem:[%s1682_s12 + $0xe0] sm:$0xff] %v422_v28  ;;  %425 = vst [vmem:[%s1682_s12 + $0xe8] sm:$0xff] %v424_v29  ;;  %v426_v30 = vld [vmem:[%s1677_s11 + $0x1e0] sm:$0xff]  ;;  %v428_v31 = vld [vmem:[%s1677_s11 + $0x1f0] sm:$0xff] }
  0x26   : > { %v430_v32 = vld [vmem:[%s1677_s11 + $0x200] sm:$0xff]  ;;  %427 = vst [vmem:[%s1682_s12 + $0xf0] sm:$0xff] %v426_v30  ;;  %429 = vst [vmem:[%s1682_s12 + $0xf8] sm:$0xff] %v428_v31  ;;  %v432_v33 = vld [vmem:[%s1677_s11 + $0x210] sm:$0xff] }
  0x27   : > { %431 = vst [vmem:[%s1682_s12 + $0x100] sm:$0xff] %v430_v32  ;;  %v434_v34 = vld [vmem:[%s1677_s11 + $0x220] sm:$0xff]  ;;  %v436_v35 = vld [vmem:[%s1677_s11 + $0x230] sm:$0xff]  ;;  %433 = vst [vmem:[%s1682_s12 + $0x108] sm:$0xff] %v432_v33 }
  0x28   : > { %435 = vst [vmem:[%s1682_s12 + $0x110] sm:$0xff] %v434_v34  ;;  %437 = vst [vmem:[%s1682_s12 + $0x118] sm:$0xff] %v436_v35  ;;  %v438_v36 = vld [vmem:[%s1677_s11 + $0x240] sm:$0xff]  ;;  %v440_v37 = vld [vmem:[%s1677_s11 + $0x250] sm:$0xff] }
  0x29   : > { %v442_v38 = vld [vmem:[%s1677_s11 + $0x260] sm:$0xff]  ;;  %439 = vst [vmem:[%s1682_s12 + $0x120] sm:$0xff] %v438_v36  ;;  %441 = vst [vmem:[%s1682_s12 + $0x128] sm:$0xff] %v440_v37  ;;  %v444_v39 = vld [vmem:[%s1677_s11 + $0x270] sm:$0xff] }
  0x2a   : > { %443 = vst [vmem:[%s1682_s12 + $0x130] sm:$0xff] %v442_v38  ;;  %v446_v40 = vld [vmem:[%s1677_s11 + $0x280] sm:$0xff]  ;;  %v448_v41 = vld [vmem:[%s1677_s11 + $0x290] sm:$0xff]  ;;  %445 = vst [vmem:[%s1682_s12 + $0x138] sm:$0xff] %v444_v39 }
  0x2b   : > { %447 = vst [vmem:[%s1682_s12 + $0x140] sm:$0xff] %v446_v40  ;;  %449 = vst [vmem:[%s1682_s12 + $0x148] sm:$0xff] %v448_v41  ;;  %v450_v42 = vld [vmem:[%s1677_s11 + $0x2a0] sm:$0xff]  ;;  %v452_v43 = vld [vmem:[%s1677_s11 + $0x2b0] sm:$0xff] }
  0x2c   : > { %v454_v44 = vld [vmem:[%s1677_s11 + $0x2c0] sm:$0xff]  ;;  %451 = vst [vmem:[%s1682_s12 + $0x150] sm:$0xff] %v450_v42  ;;  %453 = vst [vmem:[%s1682_s12 + $0x158] sm:$0xff] %v452_v43  ;;  %v456_v45 = vld [vmem:[%s1677_s11 + $0x2d0] sm:$0xff] }
  0x2d   : > { %455 = vst [vmem:[%s1682_s12 + $0x160] sm:$0xff] %v454_v44  ;;  %v458_v46 = vld [vmem:[%s1677_s11 + $0x2e0] sm:$0xff]  ;;  %v460_v47 = vld [vmem:[%s1677_s11 + $0x2f0] sm:$0xff]  ;;  %457 = vst [vmem:[%s1682_s12 + $0x168] sm:$0xff] %v456_v45 }
  0x2e   : > { %459 = vst [vmem:[%s1682_s12 + $0x170] sm:$0xff] %v458_v46  ;;  %461 = vst [vmem:[%s1682_s12 + $0x178] sm:$0xff] %v460_v47  ;;  %v462_v48 = vld [vmem:[%s1677_s11 + $0x300] sm:$0xff]  ;;  %v464_v49 = vld [vmem:[%s1677_s11 + $0x310] sm:$0xff] }
  0x2f   : > { %v466_v50 = vld [vmem:[%s1677_s11 + $0x320] sm:$0xff]  ;;  %463 = vst [vmem:[%s1682_s12 + $0x180] sm:$0xff] %v462_v48  ;;  %465 = vst [vmem:[%s1682_s12 + $0x188] sm:$0xff] %v464_v49  ;;  %v468_v51 = vld [vmem:[%s1677_s11 + $0x330] sm:$0xff] }
  0x30   : > { %467 = vst [vmem:[%s1682_s12 + $0x190] sm:$0xff] %v466_v50  ;;  %v470_v52 = vld [vmem:[%s1677_s11 + $0x340] sm:$0xff]  ;;  %v472_v53 = vld [vmem:[%s1677_s11 + $0x350] sm:$0xff]  ;;  %469 = vst [vmem:[%s1682_s12 + $0x198] sm:$0xff] %v468_v51 }
  0x31   : > { %471 = vst [vmem:[%s1682_s12 + $0x1a0] sm:$0xff] %v470_v52  ;;  %473 = vst [vmem:[%s1682_s12 + $0x1a8] sm:$0xff] %v472_v53  ;;  %v474_v54 = vld [vmem:[%s1677_s11 + $0x360] sm:$0xff]  ;;  %v476_v55 = vld [vmem:[%s1677_s11 + $0x370] sm:$0xff] }
  0x32   : > { %v478_v56 = vld [vmem:[%s1677_s11 + $0x380] sm:$0xff]  ;;  %475 = vst [vmem:[%s1682_s12 + $0x1b0] sm:$0xff] %v474_v54  ;;  %477 = vst [vmem:[%s1682_s12 + $0x1b8] sm:$0xff] %v476_v55  ;;  %v480_v57 = vld [vmem:[%s1677_s11 + $0x390] sm:$0xff] }
  0x33   : > { %479 = vst [vmem:[%s1682_s12 + $0x1c0] sm:$0xff] %v478_v56  ;;  %v482_v58 = vld [vmem:[%s1677_s11 + $0x3a0] sm:$0xff]  ;;  %v484_v59 = vld [vmem:[%s1677_s11 + $0x3b0] sm:$0xff]  ;;  %481 = vst [vmem:[%s1682_s12 + $0x1c8] sm:$0xff] %v480_v57 }
  0x34   : > { %483 = vst [vmem:[%s1682_s12 + $0x1d0] sm:$0xff] %v482_v58  ;;  %485 = vst [vmem:[%s1682_s12 + $0x1d8] sm:$0xff] %v484_v59  ;;  %v486_v60 = vld [vmem:[%s1677_s11 + $0x3c0] sm:$0xff]  ;;  %v488_v61 = vld [vmem:[%s1677_s11 + $0x3d0] sm:$0xff] }
  0x35   : > { %v490_v62 = vld [vmem:[%s1677_s11 + $0x3e0] sm:$0xff]  ;;  %487 = vst [vmem:[%s1682_s12 + $0x1e0] sm:$0xff] %v486_v60  ;;  %489 = vst [vmem:[%s1682_s12 + $0x1e8] sm:$0xff] %v488_v61  ;;  %v492_v63 = vld [vmem:[%s1677_s11 + $0x3f0] sm:$0xff] }
  0x36   : > { %491 = vst [vmem:[%s1682_s12 + $0x1f0] sm:$0xff] %v490_v62  ;;  %493 = vst [vmem:[%s1682_s12 + $0x1f8] sm:$0xff] %v492_v63 }
  0x37 PF: > { %p1294_p7 = scmp.ge.s32.totalorder %s1589_s21, 1  ;;  %p519_p8 = scmp.lt.s32.totalorder %s1589_s21, 19 }
  0x39   : > { %p520_p9 = pnand %p1294_p7, %p519_p8 }
  0x3a   : > { %s526_s13 = sand.u32 (!%p520_p9), 1, %s1565_s15   ;;  %s1296_s14 = sshll.u32 (!%p520_p9), %s1573_s17, 2 }
  0x3b   : > { %523 = sbr.rel (%p520_p9) target bundleno = 358 (0x166), region = 70  ;;  %s1295_s24 = sshll.u32 (!%p520_p9), %s526_s13, 9 }
  0x3c   : > { %p580_p10 = scmp.lt.s32.totalorder (!%p520_p9), %s1296_s14, 35  ;;  %s1298_s25 = sshll.u32 (!%p520_p9), %s1577_s18, 1 }
  0x3d   : > { %p590_p11 = scmp.lt.s32.totalorder (!%p520_p9), %s1298_s25, 3  ;;  %s1836_s13 = scalar_lea.vmem (!%p520_p9), [#allocation3], %s1295_s24 }
  0x3e   : > { %p1303_p12 = scmp.ne.s32.totalorder (!%p520_p9), %s1573_s17, 0 }
  0x40   : > { %s1952_s14 = smov (!%p580_p10, %s1296_s14), 35  ;;  %s1954_s25 = smov (!%p590_p11, %s1298_s25), 3 }
  0x41   : > { %s1297_s26 = sshll.u32 %s1952_s14, 2  ;;  %s592_s15 = scalar_lea.vmem %s1936_s2, %s1954_s25 }
  0x42   : > { %s1817_s30 = scalar_lea.vmem %s1934_s0, %s1297_s26  ;;  %s1300_s7 = sshll.u32 %s1954_s25, 2 }
  0x43   : > { %s1829_s18 = scalar_lea.vmem %s1937_s3, %s1300_s7  ;;  %s1834_s12 = scalar_lea.vmem %s1938_s4, %s1300_s7 }
  0x44   : > { %617 = sbr.rel (%p1303_p12) target bundleno = 75 (0x4b), region = 78 }
  0x49   : > { %v1591_v0 = vmov 0.0  }
  0x4a   : > { %618 = vst [vmem:[#allocation2] sm:$0xff] %v1591_v0  ;;  %619 = vst [vmem:[#allocation2 + $0x8] sm:$0xff] %v1591_v0 }
  0x4b PF: > { %v1435_v1 = vld [vmem:[%s1836_s13 + $0x74] ss:$8 sps:$4 sm:$0xff]   ;;  %v1439_v3 = vld [vmem:[%s1836_s13 + $0x70] ss:$8 sps:$4 sm:$0xff]   ;;  %v1441_v5 = vld [vmem:[%s1836_s13 + $0x64] ss:$8 sps:$4 sm:$0xff]  }
  0x4c   : > { %v1437_v2 = vld [vmem:[%s1836_s13 + $0x174] ss:$8 sps:$4 sm:$0xff]   ;;  %1022 = vmatprep.subr.bf16.mxu0 %v1435_v1  ;;  %v1440_v4 = vld [vmem:[%s1836_s13 + $0x170] ss:$8 sps:$4 sm:$0xff]   ;;  %v1443_v6 = vld [vmem:[%s1836_s13 + $0x164] ss:$8 sps:$4 sm:$0xff]  }
  0x4d   : > { %1063 = vmatprep.subr.bf16.mxu1 %v1437_v2  ;;  %1023 = vmatpush1.bf16.msra.mxu0 %v1439_v3  ;;  %v1445_v7 = vld [vmem:[%s1836_s13 + $0x60] ss:$8 sps:$4 sm:$0xff]   ;;  %v1447_v9 = vld [vmem:[%s1836_s13 + $0x54] ss:$8 sps:$4 sm:$0xff]   ;;  %v1451_v11 = vld [vmem:[%s1836_s13 + $0x50] ss:$8 sps:$4 sm:$0xff]  }
  0x4e   : > { %1064 = vmatpush1.bf16.msra.mxu1 %v1440_v4  ;;  %1024 = vmatprep.subr.bf16.mxu0 %v1441_v5  ;;  %v1446_v8 = vld [vmem:[%s1836_s13 + $0x160] ss:$8 sps:$4 sm:$0xff]   ;;  %v1449_v10 = vld [vmem:[%s1836_s13 + $0x154] ss:$8 sps:$4 sm:$0xff]   ;;  %v1452_v12 = vld [vmem:[%s1836_s13 + $0x150] ss:$8 sps:$4 sm:$0xff]  }
  0x4f   : > { %1065 = vmatprep.subr.bf16.mxu1 %v1443_v6  ;;  %v1453_v13 = vld [vmem:[%s1836_s13 + $0x44] ss:$8 sps:$4 sm:$0xff]   ;;  %v1457_v15 = vld [vmem:[%s1836_s13 + $0x40] ss:$8 sps:$4 sm:$0xff]   ;;  %v1459_v17 = vld [vmem:[%s1836_s13 + $0x34] ss:$8 sps:$4 sm:$0xff]  }
  0x50   : > { %v1455_v14 = vld [vmem:[%s1836_s13 + $0x144] ss:$8 sps:$4 sm:$0xff]   ;;  %v1458_v16 = vld [vmem:[%s1836_s13 + $0x140] ss:$8 sps:$4 sm:$0xff]   ;;  %v1461_v18 = vld [vmem:[%s1836_s13 + $0x134] ss:$8 sps:$4 sm:$0xff]  }
  0x51   : > { %1025 = vmatpush1.bf16.msra.mxu0 %v1445_v7  ;;  %v1463_v19 = vld [vmem:[%s1836_s13 + $0x30] ss:$8 sps:$4 sm:$0xff]   ;;  %v1465_v21 = vld [vmem:[%s1836_s13 + $0x24] ss:$8 sps:$4 sm:$0xff]   ;;  %v1469_v23 = vld [vmem:[%s1836_s13 + $0x20] ss:$8 sps:$4 sm:$0xff]  }
  0x52   : > { %1066 = vmatpush1.bf16.msra.mxu1 %v1446_v8  ;;  %1026 = vmatprep.subr.bf16.mxu0 %v1447_v9  ;;  %v1464_v20 = vld [vmem:[%s1836_s13 + $0x130] ss:$8 sps:$4 sm:$0xff]   ;;  %v1467_v22 = vld [vmem:[%s1836_s13 + $0x124] ss:$8 sps:$4 sm:$0xff]   ;;  %v1470_v24 = vld [vmem:[%s1836_s13 + $0x120] ss:$8 sps:$4 sm:$0xff]  }
  0x53   : > { %1067 = vmatprep.subr.bf16.mxu1 %v1449_v10  ;;  %v1471_v25 = vld [vmem:[%s1836_s13 + $0x14] ss:$8 sps:$4 sm:$0xff]   ;;  %v1475_v27 = vld [vmem:[%s1836_s13 + $0x10] ss:$8 sps:$4 sm:$0xff]   ;;  %v1477_v29 = vld [vmem:[%s1836_s13 + $0x4] ss:$8 sps:$4 sm:$0xff]  }
  0x54   : > { %v1473_v26 = vld [vmem:[%s1836_s13 + $0x114] ss:$8 sps:$4 sm:$0xff]   ;;  %v1476_v28 = vld [vmem:[%s1836_s13 + $0x110] ss:$8 sps:$4 sm:$0xff]   ;;  %v1479_v30 = vld [vmem:[%s1836_s13 + $0x104] ss:$8 sps:$4 sm:$0xff]  }
  0x55   : > { %1027 = vmatpush1.bf16.msra.mxu0 %v1451_v11  ;;  %v1481_v31 = vld [vmem:[%s1836_s13] ss:$8 sps:$4 sm:$0xff]   ;;  %v1483_v33 = vld [vmem:[%s1836_s13 + $0xf4] ss:$8 sps:$4 sm:$0xff]   ;;  %v1487_v35 = vld [vmem:[%s1836_s13 + $0xf0] ss:$8 sps:$4 sm:$0xff]  }
  0x56   : > { %1068 = vmatpush1.bf16.msra.mxu1 %v1452_v12  ;;  %1028 = vmatprep.subr.bf16.mxu0 %v1453_v13  ;;  %v1482_v32 = vld [vmem:[%s1836_s13 + $0x100] ss:$8 sps:$4 sm:$0xff]   ;;  %v1485_v34 = vld [vmem:[%s1836_s13 + $0x1f4] ss:$8 sps:$4 sm:$0xff]   ;;  %v1488_v36 = vld [vmem:[%s1836_s13 + $0x1f0] ss:$8 sps:$4 sm:$0xff]  }
  0x57   : > { %1069 = vmatprep.subr.bf16.mxu1 %v1455_v14  ;;  %v1489_v37 = vld [vmem:[%s1836_s13 + $0xe4] ss:$8 sps:$4 sm:$0xff]   ;;  %v1493_v39 = vld [vmem:[%s1836_s13 + $0xe0] ss:$8 sps:$4 sm:$0xff]   ;;  %v1495_v41 = vld [vmem:[%s1836_s13 + $0xd4] ss:$8 sps:$4 sm:$0xff]  }
  0x58   : > { %v1491_v38 = vld [vmem:[%s1836_s13 + $0x1e4] ss:$8 sps:$4 sm:$0xff]   ;;  %v1494_v40 = vld [vmem:[%s1836_s13 + $0x1e0] ss:$8 sps:$4 sm:$0xff]   ;;  %v1497_v42 = vld [vmem:[%s1836_s13 + $0x1d4] ss:$8 sps:$4 sm:$0xff]  }
  0x59   : > { %1029 = vmatpush1.bf16.msra.mxu0 %v1457_v15  ;;  %v1499_v43 = vld [vmem:[%s1836_s13 + $0xd0] ss:$8 sps:$4 sm:$0xff]   ;;  %v1501_v45 = vld [vmem:[%s1836_s13 + $0xc4] ss:$8 sps:$4 sm:$0xff]   ;;  %v1505_v50 = vld [vmem:[%s1836_s13 + $0xc0] ss:$8 sps:$4 sm:$0xff]  }
  0x5a   : > { %1070 = vmatpush1.bf16.msra.mxu1 %v1458_v16  ;;  %1030 = vmatprep.subr.bf16.mxu0 %v1459_v17  ;;  %v1500_v44 = vld [vmem:[%s1836_s13 + $0x1d0] ss:$8 sps:$4 sm:$0xff]   ;;  %v1503_v46 = vld [vmem:[%s1836_s13 + $0x1c4] ss:$8 sps:$4 sm:$0xff]   ;;  %v1506_v51 = vld [vmem:[%s1836_s13 + $0x1c0] ss:$8 sps:$4 sm:$0xff]  }
  0x5b   : > { %1071 = vmatprep.subr.bf16.mxu1 %v1461_v18  ;;  %v622_v47 = vld [vmem:[%s1817_s30] sm:$0xff]  ;;  %v623_v49 = vld [vmem:[%s1817_s30 + $0x8] sm:$0xff]  ;;  %v1513_v57 = vld [vmem:[%s1836_s13 + $0xa4] ss:$8 sps:$4 sm:$0xff]   ;;  %p1372_p13 = scmp.ne.s32.totalorder %s1573_s17, 8 }
  0x5c   : > { %v1305_v48 = vcombine.high %v622_v47, %v622_v47  ;;  %v1307_v52 = vcombine.high %v623_v49, %v623_v49  ;;  %v1507_v53 = vld [vmem:[%s1836_s13 + $0xb4] ss:$8 sps:$4 sm:$0xff]   ;;  %v1511_v55 = vld [vmem:[%s1836_s13 + $0xb0] ss:$8 sps:$4 sm:$0xff]   ;;  %v1515_v58 = vld [vmem:[%s1836_s13 + $0x1a4] ss:$8 sps:$4 sm:$0xff]   ;;  %v1304_v5 = vcombine.low %v622_v47, %v622_v47  ;;  %v1306_v6 = vcombine.low %v623_v49, %v623_v49 }
  0x5d   : > { %1031 = vmatpush1.bf16.msra.mxu0 %v1463_v19  ;;  %v1509_v54 = vld [vmem:[%s1836_s13 + $0x1b4] ss:$8 sps:$4 sm:$0xff]   ;;  %v1512_v56 = vld [vmem:[%s1836_s13 + $0x1b0] ss:$8 sps:$4 sm:$0xff]   ;;  %v1517_v59 = vld [vmem:[%s1836_s13 + $0xa0] ss:$8 sps:$4 sm:$0xff]  }
  0x5e   : > { %1072 = vmatpush1.bf16.msra.mxu1 %v1464_v20  ;;  %1032 = vmatprep.subr.bf16.mxu0 %v1465_v21  ;;  %v1518_v60 = vld [vmem:[%s1836_s13 + $0x1a0] ss:$8 sps:$4 sm:$0xff]   ;;  %v1519_v61 = vld [vmem:[%s1836_s13 + $0x94] ss:$8 sps:$4 sm:$0xff]   ;;  %v1523_v63 = vld [vmem:[%s1836_s13 + $0x90] ss:$8 sps:$4 sm:$0xff]  }
  0x5f   : > { %1073 = vmatprep.subr.bf16.mxu1 %v1467_v22  ;;  %1054 = vmatprep.mubr.bf16.mxu0 %v1305_v48  ;;  %v1521_v62 = vld [vmem:[%s1836_s13 + $0x194] ss:$8 sps:$4 sm:$0xff]   ;;  %v1524_v0 = vld [vmem:[%s1836_s13 + $0x190] ss:$8 sps:$4 sm:$0xff]   ;;  %v1525_v1 = vld [vmem:[%s1836_s13 + $0x84] ss:$8 sps:$4 sm:$0xff]  }
  0x60   : > { %1095 = vmatprep.mubr.bf16.mxu1 %v1307_v52  ;;  %v1527_v2 = vld [vmem:[%s1836_s13 + $0x184] ss:$8 sps:$4 sm:$0xff]   ;;  %v1529_v3 = vld [vmem:[%s1836_s13 + $0x80] ss:$8 sps:$4 sm:$0xff]   ;;  %v620_v8 = vld [vmem:[#allocation2] sm:$0xff] }
  0x61   : > { %1033 = vmatpush1.bf16.msra.mxu0 %v1469_v23  ;;  %v1530_v4 = vld [vmem:[%s1836_s13 + $0x180] ss:$8 sps:$4 sm:$0xff]   ;;  %v621_v12 = vld [vmem:[#allocation2 + $0x8] sm:$0xff] }
  0x62   : > { %1074 = vmatpush1.bf16.msra.mxu1 %v1470_v24  ;;  %1034 = vmatprep.subr.bf16.mxu0 %v1471_v25 }
  0x63   : > { %1075 = vmatprep.subr.bf16.mxu1 %v1473_v26 }
  0x65   : > { %1035 = vmatpush1.bf16.msra.mxu0 %v1475_v27 }
  0x66   : > { %1076 = vmatpush1.bf16.msra.mxu1 %v1476_v28  ;;  %1036 = vmatprep.subr.bf16.mxu0 %v1477_v29 }
  0x67   : > { %1077 = vmatprep.subr.bf16.mxu1 %v1479_v30 }
  0x69   : > { %1037 = vmatpush1.bf16.msra.mxu0 %v1481_v31 }
  0x6a   : > { %1078 = vmatpush1.bf16.msra.mxu1 %v1482_v32  ;;  %1038 = vmatprep.subr.bf16.mxu0 %v1483_v33 }
  0x6b   : > { %1079 = vmatprep.subr.bf16.mxu1 %v1485_v34 }
  0x6d   : > { %1039 = vmatpush2.bf16.msra.mxu0 %v1487_v35 }
  0x6e   : > { %1080 = vmatpush2.bf16.msra.mxu1 %v1488_v36  ;;  %1040 = vmatprep.subr.bf16.mxu0 %v1489_v37 }
  0x6f   : > { %1081 = vmatprep.subr.bf16.mxu1 %v1491_v38 }
  0x71   : > { %1041 = vmatpush2.bf16.msra.mxu0 %v1493_v39 }
  0x72   : > { %1082 = vmatpush2.bf16.msra.mxu1 %v1494_v40  ;;  %1042 = vmatprep.subr.bf16.mxu0 %v1495_v41 }
  0x73   : > { %1083 = vmatprep.subr.bf16.mxu1 %v1497_v42 }
  0x75   : > { %1043 = vmatpush2.bf16.msra.mxu0 %v1499_v43 }
  0x76   : > { %1084 = vmatpush2.bf16.msra.mxu1 %v1500_v44  ;;  %1044 = vmatprep.subr.bf16.mxu0 %v1501_v45 }
  0x77   : > { %1085 = vmatprep.subr.bf16.mxu1 %v1503_v46 }
  0x79   : > { %1045 = vmatpush2.bf16.msra.mxu0 %v1505_v50 }
  0x7a   : > { %1086 = vmatpush2.bf16.msra.mxu1 %v1506_v51  ;;  %1046 = vmatprep.subr.bf16.mxu0 %v1507_v53 }
  0x7b   : > { %1087 = vmatprep.subr.bf16.mxu1 %v1509_v54 }
  0x7d   : > { %1047 = vmatpush2.bf16.msra.mxu0 %v1511_v55 }
  0x7e   : > { %1088 = vmatpush2.bf16.msra.mxu1 %v1512_v56  ;;  %1048 = vmatprep.subr.bf16.mxu0 %v1513_v57 }
  0x7f   : > { %1089 = vmatprep.subr.bf16.mxu1 %v1515_v58 }
  0x81   : > { %1049 = vmatpush2.bf16.msra.mxu0 %v1517_v59 }
  0x82   : > { %1090 = vmatpush2.bf16.msra.mxu1 %v1518_v60  ;;  %1050 = vmatprep.subr.bf16.mxu0 %v1519_v61 }
  0x83   : > { %1091 = vmatprep.subr.bf16.mxu1 %v1521_v62 }
  0x85   : > { %1051 = vmatpush2.bf16.msra.mxu0 %v1523_v63 }
  0x86   : > { %1092 = vmatpush2.bf16.msra.mxu1 %v1524_v0  ;;  %1052 = vmatprep.subr.bf16.mxu0 %v1525_v1 }
  0x87   : > { %1093 = vmatprep.subr.bf16.mxu1 %v1527_v2 }
  0x89   : > { %1053 = vmatpush2.bf16.msra.mxu0 %v1529_v3 }
  0x8a   : > { %1094 = vmatpush2.bf16.msra.mxu1 %v1530_v4 }
  0x8c   : > { %1055 = vmatmul.mubr.bf16.vlgmr.msra.gmra.mxu0 %v1304_v5 }
  0x8d   : > { %1096 = vmatmul.mubr.bf16.vlgmr.msra.gmra.mxu1 %v1306_v6 }
 0x14c   : > { %v1056_v7 = vpop.f32.mrf.mxu0 }
 0x14d   : > { %v1097_v9 = vpop.f32.mrf.mxu1 }
 0x14e   : > { %v1098_v10 = vadd.f32 %v1097_v9, %v1056_v7  ;;  %v1058_v11 = vpop.f32.mrf.mxu0 }
 0x14f   : > { %v1099_v13 = vpop.f32.mrf.mxu1 }
 0x150   : > { %v1104_v14 = vadd.f32 %v1098_v10, %v620_v8  ;;  %v1100_v15 = vadd.f32 %v1099_v13, %v1058_v11  ;;  %v1060_v16 = vpop.f32.mrf.mxu0  ;;  %1111 = sbr.rel (%p1372_p13) target bundleno = 358 (0x166), region = 82 }
 0x151   : > { %v1101_v17 = vpop.f32.mrf.mxu1 }
 0x152   : > { %1106 = vst [vmem:[#allocation2] sm:$0xff] %v1104_v14  ;;  %v1105_v18 = vadd.f32 %v1100_v15, %v621_v12  ;;  %v1061_v19 = vpop.f32.mrf.mxu0 }
 0x153   : > { %v1102_v20 = vpop.f32.mrf.mxu1 }
 0x154   : > { %1107 = vst [vmem:[#allocation2 + $0x8] sm:$0xff] %v1105_v18 }
 0x155   : > { %v1116_v21 = vlaneseq  ;;  %v1114_v23 = vld [vmem:[%s592_s15] sm:$0x3] }
 0x156   : > { %v1128_v24 = vld [vmem:[%s1829_s18] sm:$0xff] }
 0x157   : > { %v1117_v22 = vshrl.u32 %v1116_v21, 7  ;;  %v1129_v31 = vunpack.c.l.bf16 %v1128_v24  ;;  %v1130_v32 = vunpack.c.h.bf16 %v1128_v24 }
 0x159   : > { %v1118_v25 = vsub.s32 0, %v1117_v22  ;;  %v1122_v26 = vsub.s32 1, %v1117_v22  ;;  %v1112_v27 = vld [vmem:[#allocation2] sm:$0xff] }
 0x15b   : > { %v1113_v28 = vld [vmem:[#allocation2 + $0x8] sm:$0xff]  ;;  %v1119_v29 = vrot.slane %v1114_v23, %v1118_v25  ;;  %v1123_v30 = vrot.slane %v1114_v23, %v1122_v26 }
 0x15d   : > { %v1126_v33 = vadd.f32 %v1119_v29, %v1112_v27  ;;  %v1127_v34 = vadd.f32 %v1123_v30, %v1113_v28 }
 0x15f   : > { %v1131_v35 = vadd.f32 %v1129_v31, %v1126_v33  ;;  %v1132_v36 = vadd.f32 %v1130_v32, %v1127_v34 }
 0x161   : > { %v1133_v37 = vmax.f32 %v1131_v35, 0.0  ;;  %v1134_v38 = vmax.f32 %v1132_v36, 0.0 }
 0x163   : > { %v1377_v39 = vpack.c.bf16 %v1134_v38, %v1133_v37 }
 0x165   : > { %1143 = vst [vmem:[%s1834_s12] sm:$0xff] %v1377_v39 }
 0x166 PF: > { %s14_s21 = sadd.s32 1, %s1589_s21   ;;  %s1939_s15 = smov %s1569_s16 }
 0x167   : > { %p11_p0 = scmp.ge.s32.totalorder %s14_s21, 20   ;;  %s1940_s16 = smov %s1668_s28 }
 0x168   : > { %s1941_s17 = smov %s1581_s19  ;;  %s1942_s18 = smov %s1585_s20 }
 0x169   : > { %s1943_s19 = smov %s1946_s22  ;;  %s1944_s20 = smov %s1950_s23 }
 0x16a   :  { %13 = sbr.rel (!%p11_p0) target bundleno = 4 (0x4), region = 126 }

// kernel: _lambda_.41
= control target key start
LH: loop header
LB: loop body
LE: loop exit
PB: predicated region body
PF: predicated region fallthrough
CT: control target
= control target key end

     0   :  { %s1524_s12 = smov 0   ;;  %s1526_s13 = smov 0   ;;  %s1835_s0 = inlined_call_operand.vmem [shape: bf16[8,4608], index: 0, kind: input, shape index: {}]   ;;  %s1836_s1 = inlined_call_operand.vmem [shape: bf16[4608,512], index: 1, kind: input, shape index: {}]   ;;  %s1837_s2 = inlined_call_operand.vmem [shape: f32[1,512], index: 2, kind: input, shape index: {}]   ;;  %s1838_s3 = inlined_call_operand.vmem [shape: bf16[8,512], index: 3, kind: output, shape index: {}]  }
   0x1   :  { %s1528_s14 = smov 0   ;;  %s1530_s15 = smov 0  }
   0x2   :  { %s1532_s16 = smov 0   ;;  %s1534_s17 = smov 0  }
   0x3   :  { %s1536_s18 = smov 0  }
   0x4 LB: > { %s25_s19 = sadd.s32 1, %s1493_s16  ;;  %s28_s20 = sadd.s32 1, %s1497_s17  ;;  %s1501_s18 = sphi %s1536_s18, %s13_s18   ;;  %s1497_s17 = sphi %s1534_s17, %s1844_s17   ;;  %s1493_s16 = sphi %s1532_s16, %s1843_s16   ;;  %s1489_s15 = sphi %s1530_s15, %s1842_s15   ;;  %s1485_s14 = sphi %s1528_s14, %s1841_s14   ;;  %s1481_s13 = sphi %s1526_s13, %s1840_s13   ;;  %s1477_s12 = sphi %s1524_s12, %s1839_s12  }
   0x5   : > { %p26_p0 = scmp.ge.s32.totalorder %s25_s19, 9  ;;  %p76_p1 = scmp.ne.s32.totalorder %s1481_s13, %s1477_s12 }
   0x6   : > { %p77_p2 = scmp.eq.s32.totalorder %s1501_s18, 0  ;;  %s69_s24 = sadd.s32 1, %s1481_s13 }
   0x7   : > { %s1846_s19 = smov (%p26_p0, %s25_s19), 0  ;;  %s1848_s20 = smov (!%p26_p0, %s28_s20), %s1497_s17 }
   0x8   : > { %p78_p3 = por %p77_p2, %p76_p1  ;;  %p30_p4 = scmp.ge.s32.totalorder %s1848_s20, 2 }
   0x9   : > { %s64_s21 = ssub.s32 %s1493_s16, %s1846_s19  ;;  %p1202_p6 = scmp.ge.s32.totalorder %s1501_s18, 18 }
   0xa   : > { %s1850_s20 = smov (%p30_p4, %s1848_s20), 0 }
   0xb   : > { %s65_s22 = ssub.s32 %s1497_s17, %s1850_s20  ;;  %156 = sbr.rel (%p1202_p6) target bundleno = 55 (0x37), region = 16 }
   0xc   : > { %s66_s23 = sor.u32 %s65_s22, %s64_s21 }
   0xd   : > { %p67_p5 = scmp.eq.s32.totalorder %s66_s23, 0 }
   0xf   : > { %s1575_s25 = scalar_select %p67_p5, %s1481_s13, %s69_s24  }
  0x10   : > { %172 = sbr.rel (!%p78_p3) target bundleno = 55 (0x37), region = 24  ;;  %s174_s26 = sand.u32 (%p78_p3), 1, %s1481_s13  }
  0x11   : > { %s1205_s27 = sshll.u32 (%p78_p3), %s1497_s17, 1  ;;  %s1203_s28 = sshll.u32 (%p78_p3), %s174_s26, 9 }
  0x12   : > { %s1288_s29 = sshll.u32 (%p78_p3), %s1493_s16, 8  ;;  %s1589_s8 = scalar_lea.vmem (%p78_p3), [#allocation3], %s1203_s28 }
  0x13   : > { %s180_s30 = sadd.s32 (%p78_p3), %s1288_s29, %s1205_s27 }
  0x14   : > { %s1207_s4 = sshll.u32 (%p78_p3), %s180_s30, 2 }
  0x15   : > { %s1584_s7 = scalar_lea.vmem %s1836_s1, %s1207_s4 }
  0x16   : > { %v337_v0 = vld [vmem:[%s1584_s7] sm:$0xff]  ;;  %v339_v1 = vld [vmem:[%s1584_s7 + $0x10] sm:$0xff] }
  0x17   : > { %v341_v2 = vld [vmem:[%s1584_s7 + $0x20] sm:$0xff]  ;;  %338 = vst [vmem:[%s1589_s8] sm:$0xff] %v337_v0  ;;  %340 = vst [vmem:[%s1589_s8 + $0x8] sm:$0xff] %v339_v1  ;;  %v343_v3 = vld [vmem:[%s1584_s7 + $0x30] sm:$0xff] }
  0x18   : > { %342 = vst [vmem:[%s1589_s8 + $0x10] sm:$0xff] %v341_v2  ;;  %v345_v4 = vld [vmem:[%s1584_s7 + $0x40] sm:$0xff]  ;;  %v347_v5 = vld [vmem:[%s1584_s7 + $0x50] sm:$0xff]  ;;  %344 = vst [vmem:[%s1589_s8 + $0x18] sm:$0xff] %v343_v3 }
  0x19   : > { %346 = vst [vmem:[%s1589_s8 + $0x20] sm:$0xff] %v345_v4  ;;  %348 = vst [vmem:[%s1589_s8 + $0x28] sm:$0xff] %v347_v5  ;;  %v349_v6 = vld [vmem:[%s1584_s7 + $0x60] sm:$0xff]  ;;  %v351_v7 = vld [vmem:[%s1584_s7 + $0x70] sm:$0xff] }
  0x1a   : > { %v353_v8 = vld [vmem:[%s1584_s7 + $0x80] sm:$0xff]  ;;  %350 = vst [vmem:[%s1589_s8 + $0x30] sm:$0xff] %v349_v6  ;;  %352 = vst [vmem:[%s1589_s8 + $0x38] sm:$0xff] %v351_v7  ;;  %v355_v9 = vld [vmem:[%s1584_s7 + $0x90] sm:$0xff] }
  0x1b   : > { %354 = vst [vmem:[%s1589_s8 + $0x40] sm:$0xff] %v353_v8  ;;  %v357_v10 = vld [vmem:[%s1584_s7 + $0xa0] sm:$0xff]  ;;  %v359_v11 = vld [vmem:[%s1584_s7 + $0xb0] sm:$0xff]  ;;  %356 = vst [vmem:[%s1589_s8 + $0x48] sm:$0xff] %v355_v9 }
  0x1c   : > { %358 = vst [vmem:[%s1589_s8 + $0x50] sm:$0xff] %v357_v10  ;;  %360 = vst [vmem:[%s1589_s8 + $0x58] sm:$0xff] %v359_v11  ;;  %v361_v12 = vld [vmem:[%s1584_s7 + $0xc0] sm:$0xff]  ;;  %v363_v13 = vld [vmem:[%s1584_s7 + $0xd0] sm:$0xff] }
  0x1d   : > { %v365_v14 = vld [vmem:[%s1584_s7 + $0xe0] sm:$0xff]  ;;  %362 = vst [vmem:[%s1589_s8 + $0x60] sm:$0xff] %v361_v12  ;;  %364 = vst [vmem:[%s1589_s8 + $0x68] sm:$0xff] %v363_v13  ;;  %v367_v15 = vld [vmem:[%s1584_s7 + $0xf0] sm:$0xff] }
  0x1e   : > { %366 = vst [vmem:[%s1589_s8 + $0x70] sm:$0xff] %v365_v14  ;;  %v369_v16 = vld [vmem:[%s1584_s7 + $0x100] sm:$0xff]  ;;  %v371_v17 = vld [vmem:[%s1584_s7 + $0x110] sm:$0xff]  ;;  %368 = vst [vmem:[%s1589_s8 + $0x78] sm:$0xff] %v367_v15 }
  0x1f   : > { %370 = vst [vmem:[%s1589_s8 + $0x80] sm:$0xff] %v369_v16  ;;  %372 = vst [vmem:[%s1589_s8 + $0x88] sm:$0xff] %v371_v17  ;;  %v373_v18 = vld [vmem:[%s1584_s7 + $0x120] sm:$0xff]  ;;  %v375_v19 = vld [vmem:[%s1584_s7 + $0x130] sm:$0xff] }
  0x20   : > { %v377_v20 = vld [vmem:[%s1584_s7 + $0x140] sm:$0xff]  ;;  %374 = vst [vmem:[%s1589_s8 + $0x90] sm:$0xff] %v373_v18  ;;  %376 = vst [vmem:[%s1589_s8 + $0x98] sm:$0xff] %v375_v19  ;;  %v379_v21 = vld [vmem:[%s1584_s7 + $0x150] sm:$0xff] }
  0x21   : > { %378 = vst [vmem:[%s1589_s8 + $0xa0] sm:$0xff] %v377_v20  ;;  %v381_v22 = vld [vmem:[%s1584_s7 + $0x160] sm:$0xff]  ;;  %v383_v23 = vld [vmem:[%s1584_s7 + $0x170] sm:$0xff]  ;;  %380 = vst [vmem:[%s1589_s8 + $0xa8] sm:$0xff] %v379_v21 }
  0x22   : > { %382 = vst [vmem:[%s1589_s8 + $0xb0] sm:$0xff] %v381_v22  ;;  %384 = vst [vmem:[%s1589_s8 + $0xb8] sm:$0xff] %v383_v23  ;;  %v385_v24 = vld [vmem:[%s1584_s7 + $0x180] sm:$0xff]  ;;  %v387_v25 = vld [vmem:[%s1584_s7 + $0x190] sm:$0xff] }
  0x23   : > { %v389_v26 = vld [vmem:[%s1584_s7 + $0x1a0] sm:$0xff]  ;;  %386 = vst [vmem:[%s1589_s8 + $0xc0] sm:$0xff] %v385_v24  ;;  %388 = vst [vmem:[%s1589_s8 + $0xc8] sm:$0xff] %v387_v25  ;;  %v391_v27 = vld [vmem:[%s1584_s7 + $0x1b0] sm:$0xff] }
  0x24   : > { %390 = vst [vmem:[%s1589_s8 + $0xd0] sm:$0xff] %v389_v26  ;;  %v393_v28 = vld [vmem:[%s1584_s7 + $0x1c0] sm:$0xff]  ;;  %v395_v29 = vld [vmem:[%s1584_s7 + $0x1d0] sm:$0xff]  ;;  %392 = vst [vmem:[%s1589_s8 + $0xd8] sm:$0xff] %v391_v27 }
  0x25   : > { %394 = vst [vmem:[%s1589_s8 + $0xe0] sm:$0xff] %v393_v28  ;;  %396 = vst [vmem:[%s1589_s8 + $0xe8] sm:$0xff] %v395_v29  ;;  %v397_v30 = vld [vmem:[%s1584_s7 + $0x1e0] sm:$0xff]  ;;  %v399_v31 = vld [vmem:[%s1584_s7 + $0x1f0] sm:$0xff] }
  0x26   : > { %v401_v32 = vld [vmem:[%s1584_s7 + $0x200] sm:$0xff]  ;;  %398 = vst [vmem:[%s1589_s8 + $0xf0] sm:$0xff] %v397_v30  ;;  %400 = vst [vmem:[%s1589_s8 + $0xf8] sm:$0xff] %v399_v31  ;;  %v403_v33 = vld [vmem:[%s1584_s7 + $0x210] sm:$0xff] }
  0x27   : > { %402 = vst [vmem:[%s1589_s8 + $0x100] sm:$0xff] %v401_v32  ;;  %v405_v34 = vld [vmem:[%s1584_s7 + $0x220] sm:$0xff]  ;;  %v407_v35 = vld [vmem:[%s1584_s7 + $0x230] sm:$0xff]  ;;  %404 = vst [vmem:[%s1589_s8 + $0x108] sm:$0xff] %v403_v33 }
  0x28   : > { %406 = vst [vmem:[%s1589_s8 + $0x110] sm:$0xff] %v405_v34  ;;  %408 = vst [vmem:[%s1589_s8 + $0x118] sm:$0xff] %v407_v35  ;;  %v409_v36 = vld [vmem:[%s1584_s7 + $0x240] sm:$0xff]  ;;  %v411_v37 = vld [vmem:[%s1584_s7 + $0x250] sm:$0xff] }
  0x29   : > { %v413_v38 = vld [vmem:[%s1584_s7 + $0x260] sm:$0xff]  ;;  %410 = vst [vmem:[%s1589_s8 + $0x120] sm:$0xff] %v409_v36  ;;  %412 = vst [vmem:[%s1589_s8 + $0x128] sm:$0xff] %v411_v37  ;;  %v415_v39 = vld [vmem:[%s1584_s7 + $0x270] sm:$0xff] }
  0x2a   : > { %414 = vst [vmem:[%s1589_s8 + $0x130] sm:$0xff] %v413_v38  ;;  %v417_v40 = vld [vmem:[%s1584_s7 + $0x280] sm:$0xff]  ;;  %v419_v41 = vld [vmem:[%s1584_s7 + $0x290] sm:$0xff]  ;;  %416 = vst [vmem:[%s1589_s8 + $0x138] sm:$0xff] %v415_v39 }
  0x2b   : > { %418 = vst [vmem:[%s1589_s8 + $0x140] sm:$0xff] %v417_v40  ;;  %420 = vst [vmem:[%s1589_s8 + $0x148] sm:$0xff] %v419_v41  ;;  %v421_v42 = vld [vmem:[%s1584_s7 + $0x2a0] sm:$0xff]  ;;  %v423_v43 = vld [vmem:[%s1584_s7 + $0x2b0] sm:$0xff] }
  0x2c   : > { %v425_v44 = vld [vmem:[%s1584_s7 + $0x2c0] sm:$0xff]  ;;  %422 = vst [vmem:[%s1589_s8 + $0x150] sm:$0xff] %v421_v42  ;;  %424 = vst [vmem:[%s1589_s8 + $0x158] sm:$0xff] %v423_v43  ;;  %v427_v45 = vld [vmem:[%s1584_s7 + $0x2d0] sm:$0xff] }
  0x2d   : > { %426 = vst [vmem:[%s1589_s8 + $0x160] sm:$0xff] %v425_v44  ;;  %v429_v46 = vld [vmem:[%s1584_s7 + $0x2e0] sm:$0xff]  ;;  %v431_v47 = vld [vmem:[%s1584_s7 + $0x2f0] sm:$0xff]  ;;  %428 = vst [vmem:[%s1589_s8 + $0x168] sm:$0xff] %v427_v45 }
  0x2e   : > { %430 = vst [vmem:[%s1589_s8 + $0x170] sm:$0xff] %v429_v46  ;;  %432 = vst [vmem:[%s1589_s8 + $0x178] sm:$0xff] %v431_v47  ;;  %v433_v48 = vld [vmem:[%s1584_s7 + $0x300] sm:$0xff]  ;;  %v435_v49 = vld [vmem:[%s1584_s7 + $0x310] sm:$0xff] }
  0x2f   : > { %v437_v50 = vld [vmem:[%s1584_s7 + $0x320] sm:$0xff]  ;;  %434 = vst [vmem:[%s1589_s8 + $0x180] sm:$0xff] %v433_v48  ;;  %436 = vst [vmem:[%s1589_s8 + $0x188] sm:$0xff] %v435_v49  ;;  %v439_v51 = vld [vmem:[%s1584_s7 + $0x330] sm:$0xff] }
  0x30   : > { %438 = vst [vmem:[%s1589_s8 + $0x190] sm:$0xff] %v437_v50  ;;  %v441_v52 = vld [vmem:[%s1584_s7 + $0x340] sm:$0xff]  ;;  %v443_v53 = vld [vmem:[%s1584_s7 + $0x350] sm:$0xff]  ;;  %440 = vst [vmem:[%s1589_s8 + $0x198] sm:$0xff] %v439_v51 }
  0x31   : > { %442 = vst [vmem:[%s1589_s8 + $0x1a0] sm:$0xff] %v441_v52  ;;  %444 = vst [vmem:[%s1589_s8 + $0x1a8] sm:$0xff] %v443_v53  ;;  %v445_v54 = vld [vmem:[%s1584_s7 + $0x360] sm:$0xff]  ;;  %v447_v55 = vld [vmem:[%s1584_s7 + $0x370] sm:$0xff] }
  0x32   : > { %v449_v56 = vld [vmem:[%s1584_s7 + $0x380] sm:$0xff]  ;;  %446 = vst [vmem:[%s1589_s8 + $0x1b0] sm:$0xff] %v445_v54  ;;  %448 = vst [vmem:[%s1589_s8 + $0x1b8] sm:$0xff] %v447_v55  ;;  %v451_v57 = vld [vmem:[%s1584_s7 + $0x390] sm:$0xff] }
  0x33   : > { %450 = vst [vmem:[%s1589_s8 + $0x1c0] sm:$0xff] %v449_v56  ;;  %v453_v58 = vld [vmem:[%s1584_s7 + $0x3a0] sm:$0xff]  ;;  %v455_v59 = vld [vmem:[%s1584_s7 + $0x3b0] sm:$0xff]  ;;  %452 = vst [vmem:[%s1589_s8 + $0x1c8] sm:$0xff] %v451_v57 }
  0x34   : > { %454 = vst [vmem:[%s1589_s8 + $0x1d0] sm:$0xff] %v453_v58  ;;  %456 = vst [vmem:[%s1589_s8 + $0x1d8] sm:$0xff] %v455_v59  ;;  %v457_v60 = vld [vmem:[%s1584_s7 + $0x3c0] sm:$0xff]  ;;  %v459_v61 = vld [vmem:[%s1584_s7 + $0x3d0] sm:$0xff] }
  0x35   : > { %v461_v62 = vld [vmem:[%s1584_s7 + $0x3e0] sm:$0xff]  ;;  %458 = vst [vmem:[%s1589_s8 + $0x1e0] sm:$0xff] %v457_v60  ;;  %460 = vst [vmem:[%s1589_s8 + $0x1e8] sm:$0xff] %v459_v61  ;;  %v463_v63 = vld [vmem:[%s1584_s7 + $0x3f0] sm:$0xff] }
  0x36   : > { %462 = vst [vmem:[%s1589_s8 + $0x1f0] sm:$0xff] %v461_v62  ;;  %464 = vst [vmem:[%s1589_s8 + $0x1f8] sm:$0xff] %v463_v63 }
  0x37 PF: > { %p1208_p7 = scmp.ge.s32.totalorder %s1501_s18, 1  ;;  %p477_p8 = scmp.lt.s32.totalorder %s1501_s18, 19 }
  0x39   : > { %p478_p9 = pnand %p1208_p7, %p477_p8 }
  0x3a   : > { %s484_s9 = sand.u32 (!%p478_p9), 1, %s1477_s12   ;;  %s1210_s10 = sshll.u32 (!%p478_p9), %s1485_s14, 2 }
  0x3b   : > { %481 = sbr.rel (%p478_p9) target bundleno = 355 (0x163), region = 66  ;;  %s1209_s11 = sshll.u32 (!%p478_p9), %s484_s9, 9 }
  0x3c   : > { %p527_p10 = scmp.lt.s32.totalorder (!%p478_p9), %s1210_s10, 35  ;;  %s1212_s21 = sshll.u32 (!%p478_p9), %s1489_s15, 1 }
  0x3d   : > { %p537_p11 = scmp.lt.s32.totalorder (!%p478_p9), %s1212_s21, 3  ;;  %s1738_s5 = scalar_lea.vmem (!%p478_p9), [#allocation3], %s1209_s11 }
  0x3e   : > { %p1215_p12 = scmp.ne.s32.totalorder (!%p478_p9), %s1485_s14, 0 }
  0x40   : > { %s1852_s10 = smov (!%p527_p10, %s1210_s10), 35  ;;  %s1854_s21 = smov (!%p537_p11, %s1212_s21), 3 }
  0x41   : > { %s1211_s22 = sshll.u32 %s1852_s10, 2  ;;  %s539_s12 = scalar_lea.vmem %s1837_s2, %s1854_s21 }
  0x42   : > { %s1724_s26 = scalar_lea.vmem %s1835_s0, %s1211_s22  ;;  %s1214_s29 = sshll.u32 %s1854_s21, 2 }
  0x43   : > { %s1736_s15 = scalar_lea.vmem %s1838_s3, %s1214_s29  ;;  %554 = sbr.rel (%p1215_p12) target bundleno = 74 (0x4a), region = 74 }
  0x48   : > { %v1503_v0 = vmov 0.0  }
  0x49   : > { %555 = vst [vmem:[#allocation2] sm:$0xff] %v1503_v0  ;;  %556 = vst [vmem:[#allocation2 + $0x8] sm:$0xff] %v1503_v0 }
  0x4a PF: > { %v1347_v1 = vld [vmem:[%s1738_s5 + $0x74] ss:$8 sps:$4 sm:$0xff]   ;;  %v1351_v3 = vld [vmem:[%s1738_s5 + $0x70] ss:$8 sps:$4 sm:$0xff]   ;;  %v1353_v5 = vld [vmem:[%s1738_s5 + $0x64] ss:$8 sps:$4 sm:$0xff]  }
  0x4b   : > { %v1349_v2 = vld [vmem:[%s1738_s5 + $0x174] ss:$8 sps:$4 sm:$0xff]   ;;  %959 = vmatprep.subr.bf16.mxu0 %v1347_v1  ;;  %v1352_v4 = vld [vmem:[%s1738_s5 + $0x170] ss:$8 sps:$4 sm:$0xff]   ;;  %v1355_v6 = vld [vmem:[%s1738_s5 + $0x164] ss:$8 sps:$4 sm:$0xff]  }
  0x4c   : > { %1000 = vmatprep.subr.bf16.mxu1 %v1349_v2  ;;  %960 = vmatpush1.bf16.msra.mxu0 %v1351_v3  ;;  %v1357_v7 = vld [vmem:[%s1738_s5 + $0x60] ss:$8 sps:$4 sm:$0xff]   ;;  %v1359_v9 = vld [vmem:[%s1738_s5 + $0x54] ss:$8 sps:$4 sm:$0xff]   ;;  %v1363_v11 = vld [vmem:[%s1738_s5 + $0x50] ss:$8 sps:$4 sm:$0xff]  }
  0x4d   : > { %1001 = vmatpush1.bf16.msra.mxu1 %v1352_v4  ;;  %961 = vmatprep.subr.bf16.mxu0 %v1353_v5  ;;  %v1358_v8 = vld [vmem:[%s1738_s5 + $0x160] ss:$8 sps:$4 sm:$0xff]   ;;  %v1361_v10 = vld [vmem:[%s1738_s5 + $0x154] ss:$8 sps:$4 sm:$0xff]   ;;  %v1364_v12 = vld [vmem:[%s1738_s5 + $0x150] ss:$8 sps:$4 sm:$0xff]  }
  0x4e   : > { %1002 = vmatprep.subr.bf16.mxu1 %v1355_v6  ;;  %v1365_v13 = vld [vmem:[%s1738_s5 + $0x44] ss:$8 sps:$4 sm:$0xff]   ;;  %v1369_v15 = vld [vmem:[%s1738_s5 + $0x40] ss:$8 sps:$4 sm:$0xff]   ;;  %v1371_v17 = vld [vmem:[%s1738_s5 + $0x34] ss:$8 sps:$4 sm:$0xff]  }
  0x4f   : > { %v1367_v14 = vld [vmem:[%s1738_s5 + $0x144] ss:$8 sps:$4 sm:$0xff]   ;;  %v1370_v16 = vld [vmem:[%s1738_s5 + $0x140] ss:$8 sps:$4 sm:$0xff]   ;;  %v1373_v18 = vld [vmem:[%s1738_s5 + $0x134] ss:$8 sps:$4 sm:$0xff]  }
  0x50   : > { %962 = vmatpush1.bf16.msra.mxu0 %v1357_v7  ;;  %v1375_v19 = vld [vmem:[%s1738_s5 + $0x30] ss:$8 sps:$4 sm:$0xff]   ;;  %v1377_v21 = vld [vmem:[%s1738_s5 + $0x24] ss:$8 sps:$4 sm:$0xff]   ;;  %v1381_v23 = vld [vmem:[%s1738_s5 + $0x20] ss:$8 sps:$4 sm:$0xff]  }
  0x51   : > { %1003 = vmatpush1.bf16.msra.mxu1 %v1358_v8  ;;  %963 = vmatprep.subr.bf16.mxu0 %v1359_v9  ;;  %v1376_v20 = vld [vmem:[%s1738_s5 + $0x130] ss:$8 sps:$4 sm:$0xff]   ;;  %v1379_v22 = vld [vmem:[%s1738_s5 + $0x124] ss:$8 sps:$4 sm:$0xff]   ;;  %v1382_v24 = vld [vmem:[%s1738_s5 + $0x120] ss:$8 sps:$4 sm:$0xff]  }
  0x52   : > { %1004 = vmatprep.subr.bf16.mxu1 %v1361_v10  ;;  %v1383_v25 = vld [vmem:[%s1738_s5 + $0x14] ss:$8 sps:$4 sm:$0xff]   ;;  %v1387_v27 = vld [vmem:[%s1738_s5 + $0x10] ss:$8 sps:$4 sm:$0xff]   ;;  %v1389_v29 = vld [vmem:[%s1738_s5 + $0x4] ss:$8 sps:$4 sm:$0xff]  }
  0x53   : > { %v1385_v26 = vld [vmem:[%s1738_s5 + $0x114] ss:$8 sps:$4 sm:$0xff]   ;;  %v1388_v28 = vld [vmem:[%s1738_s5 + $0x110] ss:$8 sps:$4 sm:$0xff]   ;;  %v1391_v30 = vld [vmem:[%s1738_s5 + $0x104] ss:$8 sps:$4 sm:$0xff]  }
  0x54   : > { %964 = vmatpush1.bf16.msra.mxu0 %v1363_v11  ;;  %v1393_v31 = vld [vmem:[%s1738_s5] ss:$8 sps:$4 sm:$0xff]   ;;  %v1395_v33 = vld [vmem:[%s1738_s5 + $0xf4] ss:$8 sps:$4 sm:$0xff]   ;;  %v1399_v35 = vld [vmem:[%s1738_s5 + $0xf0] ss:$8 sps:$4 sm:$0xff]  }
  0x55   : > { %1005 = vmatpush1.bf16.msra.mxu1 %v1364_v12  ;;  %965 = vmatprep.subr.bf16.mxu0 %v1365_v13  ;;  %v1394_v32 = vld [vmem:[%s1738_s5 + $0x100] ss:$8 sps:$4 sm:$0xff]   ;;  %v1397_v34 = vld [vmem:[%s1738_s5 + $0x1f4] ss:$8 sps:$4 sm:$0xff]   ;;  %v1400_v36 = vld [vmem:[%s1738_s5 + $0x1f0] ss:$8 sps:$4 sm:$0xff]  }
  0x56   : > { %1006 = vmatprep.subr.bf16.mxu1 %v1367_v14  ;;  %v1401_v37 = vld [vmem:[%s1738_s5 + $0xe4] ss:$8 sps:$4 sm:$0xff]   ;;  %v1405_v39 = vld [vmem:[%s1738_s5 + $0xe0] ss:$8 sps:$4 sm:$0xff]   ;;  %v1407_v41 = vld [vmem:[%s1738_s5 + $0xd4] ss:$8 sps:$4 sm:$0xff]  }
  0x57   : > { %v1403_v38 = vld [vmem:[%s1738_s5 + $0x1e4] ss:$8 sps:$4 sm:$0xff]   ;;  %v1406_v40 = vld [vmem:[%s1738_s5 + $0x1e0] ss:$8 sps:$4 sm:$0xff]   ;;  %v1409_v42 = vld [vmem:[%s1738_s5 + $0x1d4] ss:$8 sps:$4 sm:$0xff]  }
  0x58   : > { %966 = vmatpush1.bf16.msra.mxu0 %v1369_v15  ;;  %v1411_v43 = vld [vmem:[%s1738_s5 + $0xd0] ss:$8 sps:$4 sm:$0xff]   ;;  %v1413_v45 = vld [vmem:[%s1738_s5 + $0xc4] ss:$8 sps:$4 sm:$0xff]   ;;  %v1417_v50 = vld [vmem:[%s1738_s5 + $0xc0] ss:$8 sps:$4 sm:$0xff]  }
  0x59   : > { %1007 = vmatpush1.bf16.msra.mxu1 %v1370_v16  ;;  %967 = vmatprep.subr.bf16.mxu0 %v1371_v17  ;;  %v1412_v44 = vld [vmem:[%s1738_s5 + $0x1d0] ss:$8 sps:$4 sm:$0xff]   ;;  %v1415_v46 = vld [vmem:[%s1738_s5 + $0x1c4] ss:$8 sps:$4 sm:$0xff]   ;;  %v1418_v51 = vld [vmem:[%s1738_s5 + $0x1c0] ss:$8 sps:$4 sm:$0xff]  }
  0x5a   : > { %1008 = vmatprep.subr.bf16.mxu1 %v1373_v18  ;;  %v559_v47 = vld [vmem:[%s1724_s26] sm:$0xff]  ;;  %v560_v49 = vld [vmem:[%s1724_s26 + $0x8] sm:$0xff]  ;;  %v1425_v57 = vld [vmem:[%s1738_s5 + $0xa4] ss:$8 sps:$4 sm:$0xff]   ;;  %p1284_p13 = scmp.ne.s32.totalorder %s1485_s14, 8 }
  0x5b   : > { %v1217_v48 = vcombine.high %v559_v47, %v559_v47  ;;  %v1219_v52 = vcombine.high %v560_v49, %v560_v49  ;;  %v1419_v53 = vld [vmem:[%s1738_s5 + $0xb4] ss:$8 sps:$4 sm:$0xff]   ;;  %v1423_v55 = vld [vmem:[%s1738_s5 + $0xb0] ss:$8 sps:$4 sm:$0xff]   ;;  %v1427_v58 = vld [vmem:[%s1738_s5 + $0x1a4] ss:$8 sps:$4 sm:$0xff]   ;;  %v1216_v5 = vcombine.low %v559_v47, %v559_v47  ;;  %v1218_v6 = vcombine.low %v560_v49, %v560_v49 }
  0x5c   : > { %968 = vmatpush1.bf16.msra.mxu0 %v1375_v19  ;;  %v1421_v54 = vld [vmem:[%s1738_s5 + $0x1b4] ss:$8 sps:$4 sm:$0xff]   ;;  %v1424_v56 = vld [vmem:[%s1738_s5 + $0x1b0] ss:$8 sps:$4 sm:$0xff]   ;;  %v1429_v59 = vld [vmem:[%s1738_s5 + $0xa0] ss:$8 sps:$4 sm:$0xff]  }
  0x5d   : > { %1009 = vmatpush1.bf16.msra.mxu1 %v1376_v20  ;;  %969 = vmatprep.subr.bf16.mxu0 %v1377_v21  ;;  %v1430_v60 = vld [vmem:[%s1738_s5 + $0x1a0] ss:$8 sps:$4 sm:$0xff]   ;;  %v1431_v61 = vld [vmem:[%s1738_s5 + $0x94] ss:$8 sps:$4 sm:$0xff]   ;;  %v1435_v63 = vld [vmem:[%s1738_s5 + $0x90] ss:$8 sps:$4 sm:$0xff]  }
  0x5e   : > { %1010 = vmatprep.subr.bf16.mxu1 %v1379_v22  ;;  %991 = vmatprep.mubr.bf16.mxu0 %v1217_v48  ;;  %v1433_v62 = vld [vmem:[%s1738_s5 + $0x194] ss:$8 sps:$4 sm:$0xff]   ;;  %v1436_v0 = vld [vmem:[%s1738_s5 + $0x190] ss:$8 sps:$4 sm:$0xff]   ;;  %v1437_v1 = vld [vmem:[%s1738_s5 + $0x84] ss:$8 sps:$4 sm:$0xff]  }
  0x5f   : > { %1032 = vmatprep.mubr.bf16.mxu1 %v1219_v52  ;;  %v1439_v2 = vld [vmem:[%s1738_s5 + $0x184] ss:$8 sps:$4 sm:$0xff]   ;;  %v1441_v3 = vld [vmem:[%s1738_s5 + $0x80] ss:$8 sps:$4 sm:$0xff]   ;;  %v557_v8 = vld [vmem:[#allocation2] sm:$0xff] }
  0x60   : > { %970 = vmatpush1.bf16.msra.mxu0 %v1381_v23  ;;  %v1442_v4 = vld [vmem:[%s1738_s5 + $0x180] ss:$8 sps:$4 sm:$0xff]   ;;  %v558_v12 = vld [vmem:[#allocation2 + $0x8] sm:$0xff] }
  0x61   : > { %1011 = vmatpush1.bf16.msra.mxu1 %v1382_v24  ;;  %971 = vmatprep.subr.bf16.mxu0 %v1383_v25 }
  0x62   : > { %1012 = vmatprep.subr.bf16.mxu1 %v1385_v26 }
  0x64   : > { %972 = vmatpush1.bf16.msra.mxu0 %v1387_v27 }
  0x65   : > { %1013 = vmatpush1.bf16.msra.mxu1 %v1388_v28  ;;  %973 = vmatprep.subr.bf16.mxu0 %v1389_v29 }
  0x66   : > { %1014 = vmatprep.subr.bf16.mxu1 %v1391_v30 }
  0x68   : > { %974 = vmatpush1.bf16.msra.mxu0 %v1393_v31 }
  0x69   : > { %1015 = vmatpush1.bf16.msra.mxu1 %v1394_v32  ;;  %975 = vmatprep.subr.bf16.mxu0 %v1395_v33 }
  0x6a   : > { %1016 = vmatprep.subr.bf16.mxu1 %v1397_v34 }
  0x6c   : > { %976 = vmatpush2.bf16.msra.mxu0 %v1399_v35 }
  0x6d   : > { %1017 = vmatpush2.bf16.msra.mxu1 %v1400_v36  ;;  %977 = vmatprep.subr.bf16.mxu0 %v1401_v37 }
  0x6e   : > { %1018 = vmatprep.subr.bf16.mxu1 %v1403_v38 }
  0x70   : > { %978 = vmatpush2.bf16.msra.mxu0 %v1405_v39 }
  0x71   : > { %1019 = vmatpush2.bf16.msra.mxu1 %v1406_v40  ;;  %979 = vmatprep.subr.bf16.mxu0 %v1407_v41 }
  0x72   : > { %1020 = vmatprep.subr.bf16.mxu1 %v1409_v42 }
  0x74   : > { %980 = vmatpush2.bf16.msra.mxu0 %v1411_v43 }
  0x75   : > { %1021 = vmatpush2.bf16.msra.mxu1 %v1412_v44  ;;  %981 = vmatprep.subr.bf16.mxu0 %v1413_v45 }
  0x76   : > { %1022 = vmatprep.subr.bf16.mxu1 %v1415_v46 }
  0x78   : > { %982 = vmatpush2.bf16.msra.mxu0 %v1417_v50 }
  0x79   : > { %1023 = vmatpush2.bf16.msra.mxu1 %v1418_v51  ;;  %983 = vmatprep.subr.bf16.mxu0 %v1419_v53 }
  0x7a   : > { %1024 = vmatprep.subr.bf16.mxu1 %v1421_v54 }
  0x7c   : > { %984 = vmatpush2.bf16.msra.mxu0 %v1423_v55 }
  0x7d   : > { %1025 = vmatpush2.bf16.msra.mxu1 %v1424_v56  ;;  %985 = vmatprep.subr.bf16.mxu0 %v1425_v57 }
  0x7e   : > { %1026 = vmatprep.subr.bf16.mxu1 %v1427_v58 }
  0x80   : > { %986 = vmatpush2.bf16.msra.mxu0 %v1429_v59 }
  0x81   : > { %1027 = vmatpush2.bf16.msra.mxu1 %v1430_v60  ;;  %987 = vmatprep.subr.bf16.mxu0 %v1431_v61 }
  0x82   : > { %1028 = vmatprep.subr.bf16.mxu1 %v1433_v62 }
  0x84   : > { %988 = vmatpush2.bf16.msra.mxu0 %v1435_v63 }
  0x85   : > { %1029 = vmatpush2.bf16.msra.mxu1 %v1436_v0  ;;  %989 = vmatprep.subr.bf16.mxu0 %v1437_v1 }
  0x86   : > { %1030 = vmatprep.subr.bf16.mxu1 %v1439_v2 }
  0x88   : > { %990 = vmatpush2.bf16.msra.mxu0 %v1441_v3 }
  0x89   : > { %1031 = vmatpush2.bf16.msra.mxu1 %v1442_v4 }
  0x8b   : > { %992 = vmatmul.mubr.bf16.vlgmr.msra.gmra.mxu0 %v1216_v5 }
  0x8c   : > { %1033 = vmatmul.mubr.bf16.vlgmr.msra.gmra.mxu1 %v1218_v6 }
 0x14b   : > { %v993_v7 = vpop.f32.mrf.mxu0 }
 0x14c   : > { %v1034_v9 = vpop.f32.mrf.mxu1 }
 0x14d   : > { %v1035_v10 = vadd.f32 %v1034_v9, %v993_v7  ;;  %v995_v11 = vpop.f32.mrf.mxu0 }
 0x14e   : > { %v1036_v13 = vpop.f32.mrf.mxu1 }
 0x14f   : > { %v1041_v14 = vadd.f32 %v1035_v10, %v557_v8  ;;  %v1037_v15 = vadd.f32 %v1036_v13, %v995_v11  ;;  %v997_v16 = vpop.f32.mrf.mxu0  ;;  %1048 = sbr.rel (%p1284_p13) target bundleno = 355 (0x163), region = 78 }
 0x150   : > { %v1038_v17 = vpop.f32.mrf.mxu1 }
 0x151   : > { %1043 = vst [vmem:[#allocation2] sm:$0xff] %v1041_v14  ;;  %v1042_v18 = vadd.f32 %v1037_v15, %v558_v12  ;;  %v998_v19 = vpop.f32.mrf.mxu0 }
 0x152   : > { %v1039_v20 = vpop.f32.mrf.mxu1 }
 0x153   : > { %1044 = vst [vmem:[#allocation2 + $0x8] sm:$0xff] %v1042_v18 }
 0x154   : > { %v1053_v21 = vlaneseq  ;;  %v1051_v23 = vld [vmem:[%s539_s12] sm:$0x3] }
 0x156   : > { %v1054_v22 = vshrl.u32 %v1053_v21, 7 }
 0x158   : > { %v1055_v24 = vsub.s32 0, %v1054_v22  ;;  %v1059_v25 = vsub.s32 1, %v1054_v22  ;;  %v1049_v26 = vld [vmem:[#allocation2] sm:$0xff] }
 0x15a   : > { %v1050_v27 = vld [vmem:[#allocation2 + $0x8] sm:$0xff]  ;;  %v1056_v28 = vrot.slane %v1051_v23, %v1055_v24  ;;  %v1060_v29 = vrot.slane %v1051_v23, %v1059_v25 }
 0x15c   : > { %v1063_v30 = vadd.f32 %v1056_v28, %v1049_v26  ;;  %v1064_v31 = vadd.f32 %v1060_v29, %v1050_v27 }
 0x15e   : > { %v1065_v32 = vmax.f32 %v1063_v30, 0.0  ;;  %v1066_v33 = vmax.f32 %v1064_v31, 0.0 }
 0x160   : > { %v1289_v34 = vpack.c.bf16 %v1066_v33, %v1065_v32 }
 0x162   : > { %1075 = vst [vmem:[%s1736_s15] sm:$0xff] %v1289_v34 }
 0x163 PF: > { %s13_s18 = sadd.s32 1, %s1501_s18   ;;  %s1839_s12 = smov %s1481_s13 }
 0x164   : > { %p10_p0 = scmp.ge.s32.totalorder %s13_s18, 20   ;;  %s1840_s13 = smov %s1575_s25 }
 0x165   : > { %s1841_s14 = smov %s1493_s16  ;;  %s1842_s15 = smov %s1497_s17 }
 0x166   : > { %s1843_s16 = smov %s1846_s19  ;;  %s1844_s17 = smov %s1850_s20 }
 0x167   :  { %12 = sbr.rel (!%p10_p0) target bundleno = 4 (0x4), region = 119 }

// kernel: _lambda_.43
= control target key start
LH: loop header
LB: loop body
LE: loop exit
PB: predicated region body
PF: predicated region fallthrough
CT: control target
= control target key end

     0   :  { %s2321_s1 = inlined_call_operand.vmem [shape: bf16[512,512], index: 1, kind: input, shape index: {}]   ;;  %s2322_s0 = inlined_call_operand.vmem [shape: bf16[8,512], index: 0, kind: input, shape index: {}]   ;;  %s2323_s3 = inlined_call_operand.vmem [shape: bf16[512,128], index: 3, kind: input, shape index: {}]   ;;  %s2324_s2 = inlined_call_operand.vmem [shape: f32[1,512], index: 2, kind: input, shape index: {}]   ;;  %s2325_s4 = inlined_call_operand.vmem [shape: f32[1,128], index: 4, kind: input, shape index: {}]   ;;  %s2326_s5 = inlined_call_operand.vmem [shape: f32[8,128], index: 5, kind: output, shape index: {}]  }
   0x1   :  { %v1556_v0 = vld [vmem:[%s2321_s1 + $0xe4] ss:$16 sps:$4 sm:$0xff]   ;;  %v1560_v2 = vld [vmem:[%s2321_s1 + $0xe0] ss:$16 sps:$4 sm:$0xff]   ;;  %v22_v48 = vld [vmem:[%s2322_s0 + $0x8] sm:$0xff] }
   0x2   :  { %v1558_v1 = vld [vmem:[%s2321_s1 + $0x2e4] ss:$16 sps:$4 sm:$0xff]   ;;  %827 = vmatprep.subr.bf16.mxu0 %v1556_v0  ;;  %v1561_v3 = vld [vmem:[%s2321_s1 + $0x2e0] ss:$16 sps:$4 sm:$0xff]   ;;  %v1350_v51 = vcombine.high %v22_v48, %v22_v48 }
   0x3   :  { %868 = vmatprep.subr.bf16.mxu1 %v1558_v1  ;;  %v1562_v4 = vld [vmem:[%s2321_s1 + $0xc4] ss:$16 sps:$4 sm:$0xff]   ;;  %828 = vmatpush1.bf16.msra.mxu0 %v1560_v2  ;;  %v1566_v6 = vld [vmem:[%s2321_s1 + $0xc0] ss:$16 sps:$4 sm:$0xff]  }
   0x4   :  { %869 = vmatpush1.bf16.msra.mxu1 %v1561_v3  ;;  %v1564_v5 = vld [vmem:[%s2321_s1 + $0x2c4] ss:$16 sps:$4 sm:$0xff]   ;;  %829 = vmatprep.subr.bf16.mxu0 %v1562_v4  ;;  %v1567_v7 = vld [vmem:[%s2321_s1 + $0x2c0] ss:$16 sps:$4 sm:$0xff]   ;;  %v1658_v4 = vld [vmem:[%s2321_s1 + $0xec] ss:$16 sps:$4 sm:$0xff]  }
   0x5   :  { %870 = vmatprep.subr.bf16.mxu1 %v1564_v5  ;;  %v1568_v8 = vld [vmem:[%s2321_s1 + $0xa4] ss:$16 sps:$4 sm:$0xff]   ;;  %v1572_v10 = vld [vmem:[%s2321_s1 + $0xa0] ss:$16 sps:$4 sm:$0xff]   ;;  %900 = vmatprep.mubr.bf16.mxu1 %v1350_v51  ;;  %v1661_v5 = vld [vmem:[%s2321_s1 + $0x2ec] ss:$16 sps:$4 sm:$0xff]  }
   0x6   :  { %v1570_v9 = vld [vmem:[%s2321_s1 + $0x2a4] ss:$16 sps:$4 sm:$0xff]   ;;  %v1573_v11 = vld [vmem:[%s2321_s1 + $0x2a0] ss:$16 sps:$4 sm:$0xff]  }
   0x7   :  { %830 = vmatpush1.bf16.msra.mxu0 %v1566_v6  ;;  %v1574_v12 = vld [vmem:[%s2321_s1 + $0x84] ss:$16 sps:$4 sm:$0xff]   ;;  %v1578_v14 = vld [vmem:[%s2321_s1 + $0x80] ss:$16 sps:$4 sm:$0xff]  }
   0x8   :  { %871 = vmatpush1.bf16.msra.mxu1 %v1567_v7  ;;  %831 = vmatprep.subr.bf16.mxu0 %v1568_v8  ;;  %v1576_v13 = vld [vmem:[%s2321_s1 + $0x284] ss:$16 sps:$4 sm:$0xff]   ;;  %v1579_v15 = vld [vmem:[%s2321_s1 + $0x280] ss:$16 sps:$4 sm:$0xff]   ;;  %v2023_v7 = vcombine.low %v22_v48, %v22_v48  ;;  %v1656_v8 = vld [vmem:[%s2321_s1 + $0xe8] ss:$16 sps:$4 sm:$0xff]  }
   0x9   :  { %872 = vmatprep.subr.bf16.mxu1 %v1570_v9  ;;  %v1580_v16 = vld [vmem:[%s2321_s1 + $0x64] ss:$16 sps:$4 sm:$0xff]   ;;  %v1584_v18 = vld [vmem:[%s2321_s1 + $0x60] ss:$16 sps:$4 sm:$0xff]   ;;  %v1659_v9 = vld [vmem:[%s2321_s1 + $0x2e8] ss:$16 sps:$4 sm:$0xff]  }
   0xa   :  { %v1582_v17 = vld [vmem:[%s2321_s1 + $0x264] ss:$16 sps:$4 sm:$0xff]   ;;  %v1585_v19 = vld [vmem:[%s2321_s1 + $0x260] ss:$16 sps:$4 sm:$0xff]   ;;  %v1716_v48 = vld [vmem:[%s2321_s1 + $0x1a8] ss:$16 sps:$4 sm:$0xff]  }
   0xb   :  { %832 = vmatpush1.bf16.msra.mxu0 %v1572_v10  ;;  %v1586_v20 = vld [vmem:[%s2321_s1 + $0x44] ss:$16 sps:$4 sm:$0xff]   ;;  %v1590_v22 = vld [vmem:[%s2321_s1 + $0x40] ss:$16 sps:$4 sm:$0xff]   ;;  %v1664_v10 = vld [vmem:[%s2321_s1 + $0xcc] ss:$16 sps:$4 sm:$0xff]  }
   0xc   :  { %873 = vmatpush1.bf16.msra.mxu1 %v1573_v11  ;;  %833 = vmatprep.subr.bf16.mxu0 %v1574_v12  ;;  %v1588_v21 = vld [vmem:[%s2321_s1 + $0x244] ss:$16 sps:$4 sm:$0xff]   ;;  %v1591_v23 = vld [vmem:[%s2321_s1 + $0x240] ss:$16 sps:$4 sm:$0xff]   ;;  %v1667_v11 = vld [vmem:[%s2321_s1 + $0x2cc] ss:$16 sps:$4 sm:$0xff]  }
   0xd   :  { %874 = vmatprep.subr.bf16.mxu1 %v1576_v13  ;;  %v1592_v24 = vld [vmem:[%s2321_s1 + $0x24] ss:$16 sps:$4 sm:$0xff]   ;;  %v1596_v26 = vld [vmem:[%s2321_s1 + $0x20] ss:$16 sps:$4 sm:$0xff]   ;;  %v1662_v12 = vld [vmem:[%s2321_s1 + $0xc8] ss:$16 sps:$4 sm:$0xff]  }
   0xe   :  { %v1594_v25 = vld [vmem:[%s2321_s1 + $0x224] ss:$16 sps:$4 sm:$0xff]   ;;  %v1597_v27 = vld [vmem:[%s2321_s1 + $0x220] ss:$16 sps:$4 sm:$0xff]   ;;  %v1665_v13 = vld [vmem:[%s2321_s1 + $0x2c8] ss:$16 sps:$4 sm:$0xff]  }
   0xf   :  { %834 = vmatpush1.bf16.msra.mxu0 %v1578_v14  ;;  %v1598_v28 = vld [vmem:[%s2321_s1 + $0x4] ss:$16 sps:$4 sm:$0xff]   ;;  %v1602_v30 = vld [vmem:[%s2321_s1] ss:$16 sps:$4 sm:$0xff]   ;;  %v1670_v14 = vld [vmem:[%s2321_s1 + $0xac] ss:$16 sps:$4 sm:$0xff]  }
  0x10   :  { %875 = vmatpush1.bf16.msra.mxu1 %v1579_v15  ;;  %835 = vmatprep.subr.bf16.mxu0 %v1580_v16  ;;  %v1600_v29 = vld [vmem:[%s2321_s1 + $0x204] ss:$16 sps:$4 sm:$0xff]   ;;  %v1603_v31 = vld [vmem:[%s2321_s1 + $0x200] ss:$16 sps:$4 sm:$0xff]   ;;  %v1673_v15 = vld [vmem:[%s2321_s1 + $0x2ac] ss:$16 sps:$4 sm:$0xff]  }
  0x11   :  { %876 = vmatprep.subr.bf16.mxu1 %v1582_v17  ;;  %v1604_v32 = vld [vmem:[%s2321_s1 + $0x1e4] ss:$16 sps:$4 sm:$0xff]   ;;  %v1608_v34 = vld [vmem:[%s2321_s1 + $0x1e0] ss:$16 sps:$4 sm:$0xff]   ;;  %v1668_v16 = vld [vmem:[%s2321_s1 + $0xa8] ss:$16 sps:$4 sm:$0xff]  }
  0x12   :  { %v1606_v33 = vld [vmem:[%s2321_s1 + $0x3e4] ss:$16 sps:$4 sm:$0xff]   ;;  %v1609_v35 = vld [vmem:[%s2321_s1 + $0x3e0] ss:$16 sps:$4 sm:$0xff]   ;;  %v1671_v17 = vld [vmem:[%s2321_s1 + $0x2a8] ss:$16 sps:$4 sm:$0xff]  }
  0x13   :  { %836 = vmatpush1.bf16.msra.mxu0 %v1584_v18  ;;  %v1610_v36 = vld [vmem:[%s2321_s1 + $0x1c4] ss:$16 sps:$4 sm:$0xff]   ;;  %v1614_v38 = vld [vmem:[%s2321_s1 + $0x1c0] ss:$16 sps:$4 sm:$0xff]   ;;  %v1676_v18 = vld [vmem:[%s2321_s1 + $0x8c] ss:$16 sps:$4 sm:$0xff]  }
  0x14   :  { %877 = vmatpush1.bf16.msra.mxu1 %v1585_v19  ;;  %837 = vmatprep.subr.bf16.mxu0 %v1586_v20  ;;  %v1612_v37 = vld [vmem:[%s2321_s1 + $0x3c4] ss:$16 sps:$4 sm:$0xff]   ;;  %v1615_v39 = vld [vmem:[%s2321_s1 + $0x3c0] ss:$16 sps:$4 sm:$0xff]   ;;  %v1679_v19 = vld [vmem:[%s2321_s1 + $0x28c] ss:$16 sps:$4 sm:$0xff]  }
  0x15   :  { %878 = vmatprep.subr.bf16.mxu1 %v1588_v21  ;;  %v1616_v40 = vld [vmem:[%s2321_s1 + $0x1a4] ss:$16 sps:$4 sm:$0xff]   ;;  %v1620_v42 = vld [vmem:[%s2321_s1 + $0x1a0] ss:$16 sps:$4 sm:$0xff]   ;;  %v1674_v20 = vld [vmem:[%s2321_s1 + $0x88] ss:$16 sps:$4 sm:$0xff]  }
  0x16   :  { %v1618_v41 = vld [vmem:[%s2321_s1 + $0x3a4] ss:$16 sps:$4 sm:$0xff]   ;;  %v1621_v43 = vld [vmem:[%s2321_s1 + $0x3a0] ss:$16 sps:$4 sm:$0xff]   ;;  %v1677_v21 = vld [vmem:[%s2321_s1 + $0x288] ss:$16 sps:$4 sm:$0xff]  }
  0x17   :  { %838 = vmatpush1.bf16.msra.mxu0 %v1590_v22  ;;  %v1622_v44 = vld [vmem:[%s2321_s1 + $0x184] ss:$16 sps:$4 sm:$0xff]   ;;  %v1626_v49 = vld [vmem:[%s2321_s1 + $0x180] ss:$16 sps:$4 sm:$0xff]   ;;  %v1682_v22 = vld [vmem:[%s2321_s1 + $0x6c] ss:$16 sps:$4 sm:$0xff]  }
  0x18   :  { %879 = vmatpush1.bf16.msra.mxu1 %v1591_v23  ;;  %839 = vmatprep.subr.bf16.mxu0 %v1592_v24  ;;  %v1624_v45 = vld [vmem:[%s2321_s1 + $0x384] ss:$16 sps:$4 sm:$0xff]   ;;  %v1627_v50 = vld [vmem:[%s2321_s1 + $0x380] ss:$16 sps:$4 sm:$0xff]   ;;  %v1685_v23 = vld [vmem:[%s2321_s1 + $0x26c] ss:$16 sps:$4 sm:$0xff]  }
  0x19   :  { %880 = vmatprep.subr.bf16.mxu1 %v1594_v25  ;;  %v21_v46 = vld [vmem:[%s2322_s0] sm:$0xff]  ;;  %v1680_v24 = vld [vmem:[%s2321_s1 + $0x68] ss:$16 sps:$4 sm:$0xff]  }
  0x1a   :  { %v1955_v47 = vcombine.high %v21_v46, %v21_v46  ;;  %v1628_v52 = vld [vmem:[%s2321_s1 + $0x164] ss:$16 sps:$4 sm:$0xff]   ;;  %v1632_v54 = vld [vmem:[%s2321_s1 + $0x160] ss:$16 sps:$4 sm:$0xff]   ;;  %v2021_v6 = vcombine.low %v21_v46, %v21_v46  ;;  %v1683_v25 = vld [vmem:[%s2321_s1 + $0x268] ss:$16 sps:$4 sm:$0xff]  }
  0x1b   :  { %840 = vmatpush1.bf16.msra.mxu0 %v1596_v26  ;;  %v1630_v53 = vld [vmem:[%s2321_s1 + $0x364] ss:$16 sps:$4 sm:$0xff]   ;;  %v1633_v55 = vld [vmem:[%s2321_s1 + $0x360] ss:$16 sps:$4 sm:$0xff]   ;;  %v1688_v26 = vld [vmem:[%s2321_s1 + $0x4c] ss:$16 sps:$4 sm:$0xff]  }
  0x1c   :  { %881 = vmatpush1.bf16.msra.mxu1 %v1597_v27  ;;  %841 = vmatprep.subr.bf16.mxu0 %v1598_v28  ;;  %v1634_v56 = vld [vmem:[%s2321_s1 + $0x144] ss:$16 sps:$4 sm:$0xff]   ;;  %v1638_v58 = vld [vmem:[%s2321_s1 + $0x140] ss:$16 sps:$4 sm:$0xff]   ;;  %v1691_v27 = vld [vmem:[%s2321_s1 + $0x24c] ss:$16 sps:$4 sm:$0xff]  }
  0x1d   :  { %882 = vmatprep.subr.bf16.mxu1 %v1600_v29  ;;  %859 = vmatprep.mubr.bf16.mxu0 %v1955_v47  ;;  %v1636_v57 = vld [vmem:[%s2321_s1 + $0x344] ss:$16 sps:$4 sm:$0xff]   ;;  %v1639_v59 = vld [vmem:[%s2321_s1 + $0x340] ss:$16 sps:$4 sm:$0xff]   ;;  %v1686_v28 = vld [vmem:[%s2321_s1 + $0x48] ss:$16 sps:$4 sm:$0xff]  }
  0x1e   :  { %v1640_v60 = vld [vmem:[%s2321_s1 + $0x124] ss:$16 sps:$4 sm:$0xff]   ;;  %v1644_v62 = vld [vmem:[%s2321_s1 + $0x120] ss:$16 sps:$4 sm:$0xff]   ;;  %v1689_v29 = vld [vmem:[%s2321_s1 + $0x248] ss:$16 sps:$4 sm:$0xff]  }
  0x1f   :  { %842 = vmatpush1.bf16.msra.mxu0 %v1602_v30  ;;  %v1642_v61 = vld [vmem:[%s2321_s1 + $0x324] ss:$16 sps:$4 sm:$0xff]   ;;  %v1645_v63 = vld [vmem:[%s2321_s1 + $0x320] ss:$16 sps:$4 sm:$0xff]   ;;  %v1694_v30 = vld [vmem:[%s2321_s1 + $0x2c] ss:$16 sps:$4 sm:$0xff]  }
  0x20   :  { %883 = vmatpush1.bf16.msra.mxu1 %v1603_v31  ;;  %843 = vmatprep.subr.bf16.mxu0 %v1604_v32  ;;  %v1646_v0 = vld [vmem:[%s2321_s1 + $0x104] ss:$16 sps:$4 sm:$0xff]   ;;  %v1650_v2 = vld [vmem:[%s2321_s1 + $0x100] ss:$16 sps:$4 sm:$0xff]   ;;  %v1697_v31 = vld [vmem:[%s2321_s1 + $0x22c] ss:$16 sps:$4 sm:$0xff]  }
  0x21   :  { %884 = vmatprep.subr.bf16.mxu1 %v1606_v33  ;;  %v1648_v1 = vld [vmem:[%s2321_s1 + $0x304] ss:$16 sps:$4 sm:$0xff]   ;;  %v1651_v3 = vld [vmem:[%s2321_s1 + $0x300] ss:$16 sps:$4 sm:$0xff]   ;;  %v1692_v32 = vld [vmem:[%s2321_s1 + $0x28] ss:$16 sps:$4 sm:$0xff]  }
  0x22   :  { %v1695_v33 = vld [vmem:[%s2321_s1 + $0x228] ss:$16 sps:$4 sm:$0xff]   ;;  %v1718_v46 = vld [vmem:[%s2321_s1 + $0x1ac] ss:$16 sps:$4 sm:$0xff]  }
  0x23   :  { %844 = vmatpush2.bf16.msra.mxu0 %v1608_v34  ;;  %v1700_v34 = vld [vmem:[%s2321_s1 + $0xc] ss:$16 sps:$4 sm:$0xff]  }
  0x24   :  { %885 = vmatpush2.bf16.msra.mxu1 %v1609_v35  ;;  %845 = vmatprep.subr.bf16.mxu0 %v1610_v36  ;;  %v1703_v35 = vld [vmem:[%s2321_s1 + $0x20c] ss:$16 sps:$4 sm:$0xff]   ;;  %v1698_v36 = vld [vmem:[%s2321_s1 + $0x8] ss:$16 sps:$4 sm:$0xff]  }
  0x25   :  { %886 = vmatprep.subr.bf16.mxu1 %v1612_v37  ;;  %v1701_v37 = vld [vmem:[%s2321_s1 + $0x208] ss:$16 sps:$4 sm:$0xff]  }
  0x27   :  { %846 = vmatpush2.bf16.msra.mxu0 %v1614_v38  ;;  %v1706_v38 = vld [vmem:[%s2321_s1 + $0x1ec] ss:$16 sps:$4 sm:$0xff]  }
  0x28   :  { %887 = vmatpush2.bf16.msra.mxu1 %v1615_v39  ;;  %847 = vmatprep.subr.bf16.mxu0 %v1616_v40  ;;  %v1709_v39 = vld [vmem:[%s2321_s1 + $0x3ec] ss:$16 sps:$4 sm:$0xff]   ;;  %v1704_v40 = vld [vmem:[%s2321_s1 + $0x1e8] ss:$16 sps:$4 sm:$0xff]  }
  0x29   :  { %888 = vmatprep.subr.bf16.mxu1 %v1618_v41  ;;  %v1707_v41 = vld [vmem:[%s2321_s1 + $0x3e8] ss:$16 sps:$4 sm:$0xff]  }
  0x2b   :  { %848 = vmatpush2.bf16.msra.mxu0 %v1620_v42  ;;  %v1712_v42 = vld [vmem:[%s2321_s1 + $0x1cc] ss:$16 sps:$4 sm:$0xff]  }
  0x2c   :  { %889 = vmatpush2.bf16.msra.mxu1 %v1621_v43  ;;  %849 = vmatprep.subr.bf16.mxu0 %v1622_v44  ;;  %v1715_v43 = vld [vmem:[%s2321_s1 + $0x3cc] ss:$16 sps:$4 sm:$0xff]   ;;  %v1710_v44 = vld [vmem:[%s2321_s1 + $0x1c8] ss:$16 sps:$4 sm:$0xff]  }
  0x2d   :  { %890 = vmatprep.subr.bf16.mxu1 %v1624_v45  ;;  %v1713_v45 = vld [vmem:[%s2321_s1 + $0x3c8] ss:$16 sps:$4 sm:$0xff]  }
  0x2f   :  { %850 = vmatpush2.bf16.msra.mxu0 %v1626_v49  ;;  %v1719_v49 = vld [vmem:[%s2321_s1 + $0x3a8] ss:$16 sps:$4 sm:$0xff]  }
  0x30   :  { %891 = vmatpush2.bf16.msra.mxu1 %v1627_v50  ;;  %851 = vmatprep.subr.bf16.mxu0 %v1628_v52  ;;  %v1724_v50 = vld [vmem:[%s2321_s1 + $0x18c] ss:$16 sps:$4 sm:$0xff]   ;;  %v1722_v52 = vld [vmem:[%s2321_s1 + $0x188] ss:$16 sps:$4 sm:$0xff]  }
  0x31   :  { %892 = vmatprep.subr.bf16.mxu1 %v1630_v53  ;;  %v1725_v53 = vld [vmem:[%s2321_s1 + $0x388] ss:$16 sps:$4 sm:$0xff]  }
  0x33   :  { %852 = vmatpush2.bf16.msra.mxu0 %v1632_v54  ;;  %v1730_v54 = vld [vmem:[%s2321_s1 + $0x16c] ss:$16 sps:$4 sm:$0xff]  }
  0x34   :  { %893 = vmatpush2.bf16.msra.mxu1 %v1633_v55  ;;  %853 = vmatprep.subr.bf16.mxu0 %v1634_v56  ;;  %v1733_v55 = vld [vmem:[%s2321_s1 + $0x36c] ss:$16 sps:$4 sm:$0xff]   ;;  %v1728_v56 = vld [vmem:[%s2321_s1 + $0x168] ss:$16 sps:$4 sm:$0xff]  }
  0x35   :  { %894 = vmatprep.subr.bf16.mxu1 %v1636_v57  ;;  %v1731_v57 = vld [vmem:[%s2321_s1 + $0x368] ss:$16 sps:$4 sm:$0xff]  }
  0x37   :  { %854 = vmatpush2.bf16.msra.mxu0 %v1638_v58  ;;  %v1736_v58 = vld [vmem:[%s2321_s1 + $0x14c] ss:$16 sps:$4 sm:$0xff]  }
  0x38   :  { %895 = vmatpush2.bf16.msra.mxu1 %v1639_v59  ;;  %855 = vmatprep.subr.bf16.mxu0 %v1640_v60  ;;  %v1739_v59 = vld [vmem:[%s2321_s1 + $0x34c] ss:$16 sps:$4 sm:$0xff]   ;;  %v1734_v60 = vld [vmem:[%s2321_s1 + $0x148] ss:$16 sps:$4 sm:$0xff]  }
  0x39   :  { %896 = vmatprep.subr.bf16.mxu1 %v1642_v61  ;;  %v1737_v61 = vld [vmem:[%s2321_s1 + $0x348] ss:$16 sps:$4 sm:$0xff]  }
  0x3b   :  { %856 = vmatpush2.bf16.msra.mxu0 %v1644_v62  ;;  %v1742_v62 = vld [vmem:[%s2321_s1 + $0x12c] ss:$16 sps:$4 sm:$0xff]  }
  0x3c   :  { %897 = vmatpush2.bf16.msra.mxu1 %v1645_v63  ;;  %857 = vmatprep.subr.bf16.mxu0 %v1646_v0  ;;  %v1745_v63 = vld [vmem:[%s2321_s1 + $0x32c] ss:$16 sps:$4 sm:$0xff]   ;;  %v1740_v0 = vld [vmem:[%s2321_s1 + $0x128] ss:$16 sps:$4 sm:$0xff]  }
  0x3d   :  { %898 = vmatprep.subr.bf16.mxu1 %v1648_v1  ;;  %v1743_v1 = vld [vmem:[%s2321_s1 + $0x328] ss:$16 sps:$4 sm:$0xff]  }
  0x3f   :  { %858 = vmatpush2.bf16.msra.mxu0 %v1650_v2  ;;  %v1748_v2 = vld [vmem:[%s2321_s1 + $0x10c] ss:$16 sps:$4 sm:$0xff]  }
  0x40   :  { %899 = vmatpush2.bf16.msra.mxu1 %v1651_v3  ;;  %909 = vmatprep.subr.bf16.mxu0 %v1658_v4  ;;  %v1751_v3 = vld [vmem:[%s2321_s1 + $0x30c] ss:$16 sps:$4 sm:$0xff]   ;;  %v1746_v4 = vld [vmem:[%s2321_s1 + $0x108] ss:$16 sps:$4 sm:$0xff]  }
  0x41   :  { %950 = vmatprep.subr.bf16.mxu1 %v1661_v5  ;;  %v1749_v5 = vld [vmem:[%s2321_s1 + $0x308] ss:$16 sps:$4 sm:$0xff]  }
  0x42   :  { %860 = vmatmul.mubr.bf16.vlgmr.msra.gmra.mxu0 %v2021_v6 }
  0x43   :  { %901 = vmatmul.mubr.bf16.vlgmr.msra.gmra.mxu1 %v2023_v7  ;;  %910 = vmatpush1.bf16.msra.mxu0 %v1656_v8  ;;  %v1752_v8 = vld [vmem:[%s2323_s3 + $0x78] sm:$0xff]  }
  0x44   :  { %951 = vmatpush1.bf16.msra.mxu1 %v1659_v9  ;;  %911 = vmatprep.subr.bf16.mxu0 %v1664_v10  ;;  %v1753_v9 = vld [vmem:[%s2323_s3 + $0x38] sm:$0xff]   ;;  %v1754_v10 = vld [vmem:[%s2323_s3 + $0x70] sm:$0xff]  }
  0x45   :  { %952 = vmatprep.subr.bf16.mxu1 %v1667_v11  ;;  %941 = vmatprep.mubr.bf16.mxu0 %v1955_v47  ;;  %v1721_v47 = vld [vmem:[%s2321_s1 + $0x3ac] ss:$16 sps:$4 sm:$0xff]   ;;  %v1755_v11 = vld [vmem:[%s2323_s3 + $0x30] sm:$0xff]  }
  0x46   :  { %982 = vmatprep.mubr.bf16.mxu1 %v1350_v51  ;;  %v1727_v51 = vld [vmem:[%s2321_s1 + $0x38c] ss:$16 sps:$4 sm:$0xff]  }
  0x47   :  { %912 = vmatpush1.bf16.msra.mxu0 %v1662_v12  ;;  %v1756_v12 = vld [vmem:[%s2323_s3 + $0x68] sm:$0xff]  }
  0x48   :  { %953 = vmatpush1.bf16.msra.mxu1 %v1665_v13  ;;  %913 = vmatprep.subr.bf16.mxu0 %v1670_v14  ;;  %v1757_v13 = vld [vmem:[%s2323_s3 + $0x28] sm:$0xff]   ;;  %v1760_v14 = vld [vmem:[%s2323_s3 + $0x58] sm:$0xff]  }
  0x49   :  { %954 = vmatprep.subr.bf16.mxu1 %v1673_v15  ;;  %v1768_v15 = vld [vmem:[%s2323_s3 + $0xf8] sm:$0xff]  }
  0x4b   :  { %914 = vmatpush1.bf16.msra.mxu0 %v1668_v16  ;;  %v1769_v16 = vld [vmem:[%s2323_s3 + $0xb8] sm:$0xff]  }
  0x4c   :  { %955 = vmatpush1.bf16.msra.mxu1 %v1671_v17  ;;  %915 = vmatprep.subr.bf16.mxu0 %v1676_v18  ;;  %v1770_v17 = vld [vmem:[%s2323_s3 + $0xf0] sm:$0xff]   ;;  %v1761_v18 = vld [vmem:[%s2323_s3 + $0x18] sm:$0xff]  }
  0x4d   :  { %956 = vmatprep.subr.bf16.mxu1 %v1679_v19  ;;  %v1762_v19 = vld [vmem:[%s2323_s3 + $0x50] sm:$0xff]  }
  0x4f   :  { %916 = vmatpush1.bf16.msra.mxu0 %v1674_v20  ;;  %v1771_v20 = vld [vmem:[%s2323_s3 + $0xb0] sm:$0xff]  }
  0x50   :  { %957 = vmatpush1.bf16.msra.mxu1 %v1677_v21  ;;  %917 = vmatprep.subr.bf16.mxu0 %v1682_v22  ;;  %v1772_v21 = vld [vmem:[%s2323_s3 + $0xe8] sm:$0xff]   ;;  %v1763_v22 = vld [vmem:[%s2323_s3 + $0x10] sm:$0xff]  }
  0x51   :  { %958 = vmatprep.subr.bf16.mxu1 %v1685_v23  ;;  %v1764_v23 = vld [vmem:[%s2323_s3 + $0x48] sm:$0xff]  }
  0x53   :  { %918 = vmatpush1.bf16.msra.mxu0 %v1680_v24  ;;  %v1773_v24 = vld [vmem:[%s2323_s3 + $0xa8] sm:$0xff]  }
  0x54   :  { %959 = vmatpush1.bf16.msra.mxu1 %v1683_v25  ;;  %919 = vmatprep.subr.bf16.mxu0 %v1688_v26  ;;  %v1774_v25 = vld [vmem:[%s2323_s3 + $0xe0] sm:$0xff]   ;;  %v1765_v26 = vld [vmem:[%s2323_s3 + $0x8] sm:$0xff]  }
  0x55   :  { %960 = vmatprep.subr.bf16.mxu1 %v1691_v27  ;;  %v1766_v27 = vld [vmem:[%s2323_s3 + $0x40] sm:$0xff]  }
  0x57   :  { %920 = vmatpush1.bf16.msra.mxu0 %v1686_v28  ;;  %v1775_v28 = vld [vmem:[%s2323_s3 + $0xa0] sm:$0xff]  }
  0x58   :  { %961 = vmatpush1.bf16.msra.mxu1 %v1689_v29  ;;  %921 = vmatprep.subr.bf16.mxu0 %v1694_v30  ;;  %v1776_v29 = vld [vmem:[%s2323_s3 + $0xd8] sm:$0xff]   ;;  %v1767_v30 = vld [vmem:[%s2323_s3] sm:$0xff]  }
  0x59   :  { %962 = vmatprep.subr.bf16.mxu1 %v1697_v31  ;;  %v1777_v31 = vld [vmem:[%s2323_s3 + $0x98] sm:$0xff]  }
  0x5b   :  { %922 = vmatpush1.bf16.msra.mxu0 %v1692_v32  ;;  %v1778_v32 = vld [vmem:[%s2323_s3 + $0xd0] sm:$0xff]  }
  0x5c   :  { %963 = vmatpush1.bf16.msra.mxu1 %v1695_v33  ;;  %923 = vmatprep.subr.bf16.mxu0 %v1700_v34  ;;  %v1779_v33 = vld [vmem:[%s2323_s3 + $0x90] sm:$0xff]   ;;  %v1780_v34 = vld [vmem:[%s2323_s3 + $0xc8] sm:$0xff]  }
  0x5d   :  { %964 = vmatprep.subr.bf16.mxu1 %v1703_v35  ;;  %v1781_v35 = vld [vmem:[%s2323_s3 + $0x88] sm:$0xff]  }
  0x5f   :  { %924 = vmatpush1.bf16.msra.mxu0 %v1698_v36  ;;  %v1782_v36 = vld [vmem:[%s2323_s3 + $0xc0] sm:$0xff]  }
  0x60   :  { %965 = vmatpush1.bf16.msra.mxu1 %v1701_v37  ;;  %925 = vmatprep.subr.bf16.mxu0 %v1706_v38  ;;  %v1783_v37 = vld [vmem:[%s2323_s3 + $0x80] sm:$0xff]   ;;  %v153_v38 = vlaneseq }
  0x61   :  { %966 = vmatprep.subr.bf16.mxu1 %v1709_v39 }
  0x62   :  { %v154_v39 = vshrl.u32 %v153_v38, 7 }
  0x63   :  { %926 = vmatpush2.bf16.msra.mxu0 %v1704_v40 }
  0x64   :  { %967 = vmatpush2.bf16.msra.mxu1 %v1707_v41  ;;  %927 = vmatprep.subr.bf16.mxu0 %v1712_v42  ;;  %v155_v40 = vsub.s32 0, %v154_v39  ;;  %v151_v41 = vld [vmem:[%s2324_s2] sm:$0xf]  ;;  %v159_v42 = vsub.s32 1, %v154_v39 }
  0x65   :  { %968 = vmatprep.subr.bf16.mxu1 %v1715_v43 }
  0x66   :  { %v156_v43 = vrot.slane %v151_v41, %v155_v40 }
  0x67   :  { %928 = vmatpush2.bf16.msra.mxu0 %v1710_v44  ;;  %v160_v44 = vrot.slane %v151_v41, %v159_v42 }
  0x68   :  { %969 = vmatpush2.bf16.msra.mxu1 %v1713_v45  ;;  %929 = vmatprep.subr.bf16.mxu0 %v1718_v46 }
  0x69   :  { %970 = vmatprep.subr.bf16.mxu1 %v1721_v47 }
  0x6b   :  { %930 = vmatpush2.bf16.msra.mxu0 %v1716_v48 }
  0x6c   :  { %971 = vmatpush2.bf16.msra.mxu1 %v1719_v49  ;;  %931 = vmatprep.subr.bf16.mxu0 %v1724_v50 }
  0x6d   :  { %972 = vmatprep.subr.bf16.mxu1 %v1727_v51 }
  0x6f   :  { %932 = vmatpush2.bf16.msra.mxu0 %v1722_v52 }
  0x70   :  { %973 = vmatpush2.bf16.msra.mxu1 %v1725_v53  ;;  %933 = vmatprep.subr.bf16.mxu0 %v1730_v54 }
  0x71   :  { %974 = vmatprep.subr.bf16.mxu1 %v1733_v55 }
  0x73   :  { %934 = vmatpush2.bf16.msra.mxu0 %v1728_v56 }
  0x74   :  { %975 = vmatpush2.bf16.msra.mxu1 %v1731_v57  ;;  %935 = vmatprep.subr.bf16.mxu0 %v1736_v58 }
  0x75   :  { %976 = vmatprep.subr.bf16.mxu1 %v1739_v59 }
  0x77   :  { %936 = vmatpush2.bf16.msra.mxu0 %v1734_v60 }
  0x78   :  { %977 = vmatpush2.bf16.msra.mxu1 %v1737_v61  ;;  %937 = vmatprep.subr.bf16.mxu0 %v1742_v62  ;;  %v163_v61 = vsub.s32 2, %v154_v39  ;;  %v167_v62 = vsub.s32 3, %v154_v39 }
  0x79   :  { %978 = vmatprep.subr.bf16.mxu1 %v1745_v63 }
  0x7a   :  { %v164_v63 = vrot.slane %v151_v41, %v163_v61 }
  0x7b   :  { %938 = vmatpush2.bf16.msra.mxu0 %v1740_v0  ;;  %v168_v0 = vrot.slane %v151_v41, %v167_v62 }
  0x7c   :  { %979 = vmatpush2.bf16.msra.mxu1 %v1743_v1  ;;  %939 = vmatprep.subr.bf16.mxu0 %v1748_v2 }
  0x7d   :  { %980 = vmatprep.subr.bf16.mxu1 %v1751_v3 }
  0x7f   :  { %940 = vmatpush2.bf16.msra.mxu0 %v1746_v4 }
  0x80   :  { %981 = vmatpush2.bf16.msra.mxu1 %v1749_v5  ;;  %1512 = vmatprep.subr.bf16.mxu0 %v1752_v8 }
  0x81   :  { %1534 = vmatprep.subr.bf16.mxu1 %v1768_v15 }
  0x82   :  { %942 = vmatmul.mubr.bf16.vlgmr.msra.gmra.mxu0 %v2021_v6  ;;  %v1758_v6 = vld [vmem:[%s2323_s3 + $0x60] sm:$0xff]  }
  0x83   :  { %983 = vmatmul.mubr.bf16.vlgmr.msra.gmra.mxu1 %v2023_v7  ;;  %1513 = vmatpush3.bf16.msra.mxu0 %v1753_v9  ;;  %v1759_v7 = vld [vmem:[%s2323_s3 + $0x20] sm:$0xff]  }
  0x84   :  { %1514 = vmatprep.subr.bf16.mxu0 %v1754_v10  ;;  %1535 = vmatpush3.bf16.msra.mxu1 %v1769_v16 }
  0x85   :  { %1536 = vmatprep.subr.bf16.mxu1 %v1770_v17 }
  0x87   :  { %1515 = vmatpush3.bf16.msra.mxu0 %v1755_v11 }
  0x88   :  { %1516 = vmatprep.subr.bf16.mxu0 %v1756_v12  ;;  %1537 = vmatpush3.bf16.msra.mxu1 %v1771_v20 }
  0x89   :  { %1538 = vmatprep.subr.bf16.mxu1 %v1772_v21 }
  0x8b   :  { %1517 = vmatpush3.bf16.msra.mxu0 %v1757_v13 }
  0x8c   :  { %1518 = vmatprep.subr.bf16.mxu0 %v1758_v6  ;;  %1539 = vmatpush3.bf16.msra.mxu1 %v1773_v24 }
  0x8d   :  { %1540 = vmatprep.subr.bf16.mxu1 %v1774_v25 }
  0x8f   :  { %1519 = vmatpush3.bf16.msra.mxu0 %v1759_v7 }
  0x90   :  { %1520 = vmatprep.subr.bf16.mxu0 %v1760_v14  ;;  %1541 = vmatpush3.bf16.msra.mxu1 %v1775_v28 }
  0x91   :  { %1542 = vmatprep.subr.bf16.mxu1 %v1776_v29 }
  0x93   :  { %1521 = vmatpush3.bf16.msra.mxu0 %v1761_v18 }
  0x94   :  { %1522 = vmatprep.subr.bf16.mxu0 %v1762_v19  ;;  %1543 = vmatpush3.bf16.msra.mxu1 %v1777_v31 }
  0x95   :  { %1544 = vmatprep.subr.bf16.mxu1 %v1778_v32 }
  0x97   :  { %1523 = vmatpush3.bf16.msra.mxu0 %v1763_v22  ;;  %v1479_v22 = vld [vmem:[%s2325_s4] ss:$0 sm:$0xff] }
  0x98   :  { %1524 = vmatprep.subr.bf16.mxu0 %v1764_v23  ;;  %1545 = vmatpush3.bf16.msra.mxu1 %v1779_v33 }
  0x99   :  { %1546 = vmatprep.subr.bf16.mxu1 %v1780_v34 }
  0x9b   :  { %1525 = vmatpush3.bf16.msra.mxu0 %v1765_v26 }
  0x9c   :  { %1526 = vmatprep.subr.bf16.mxu0 %v1766_v27  ;;  %1547 = vmatpush3.bf16.msra.mxu1 %v1781_v35 }
  0x9d   :  { %1548 = vmatprep.subr.bf16.mxu1 %v1782_v36 }
  0x9f   :  { %1527 = vmatpush3.bf16.msra.mxu0 %v1767_v30 }
  0xa0   :  { %1549 = vmatpush3.bf16.msra.mxu1 %v1783_v37 }
 0x102   :  { %v861_v45 = vpop.f32.mrf.mxu0 }
 0x103   :  { %v902_v46 = vpop.f32.mrf.mxu1  ;;  %v862_v47 = vadd.f32 %v861_v45, %v156_v43 }
 0x104   :  { %v863_v48 = vpop.f32.mrf.mxu0 }
 0x105   :  { %v904_v49 = vpop.f32.mrf.mxu1  ;;  %v903_v50 = vadd.f32 %v902_v46, %v862_v47  ;;  %v864_v51 = vadd.f32 %v863_v48, %v160_v44 }
 0x106   :  { %v865_v52 = vpop.f32.mrf.mxu0 }
 0x107   :  { %v906_v53 = vpop.f32.mrf.mxu1  ;;  %v905_v54 = vadd.f32 %v904_v49, %v864_v51  ;;  %v991_v55 = vmax.f32 %v903_v50, 0.0 }
 0x108   :  { %v866_v56 = vpop.f32.mrf.mxu0 }
 0x109   :  { %v907_v57 = vpop.f32.mrf.mxu1  ;;  %v992_v58 = vmax.f32 %v905_v54, 0.0  ;;  %v995_v60 = vpack.c.bf16 %v991_v55, %v991_v55 }
 0x10b   :  { %v996_v59 = vpack.c.bf16 %v992_v58, %v992_v58 }
 0x10d   :  { %1294 = vmatprep.mubr.bf16.mxu0 %v996_v59 }
 0x10e   :  { %1295 = vmatmul.mubr.bf16.vlgmr.msra.gmra.mxu0 %v995_v60 }
 0x142   :  { %v943_v1 = vpop.f32.mrf.mxu0 }
 0x143   :  { %v984_v2 = vpop.f32.mrf.mxu1  ;;  %v944_v3 = vadd.f32 %v943_v1, %v164_v63 }
 0x144   :  { %v945_v4 = vpop.f32.mrf.mxu0 }
 0x145   :  { %v986_v5 = vpop.f32.mrf.mxu1  ;;  %v985_v8 = vadd.f32 %v984_v2, %v944_v3  ;;  %v946_v9 = vadd.f32 %v945_v4, %v168_v0 }
 0x146   :  { %v947_v10 = vpop.f32.mrf.mxu0 }
 0x147   :  { %v988_v11 = vpop.f32.mrf.mxu1  ;;  %v987_v12 = vadd.f32 %v986_v5, %v946_v9  ;;  %v993_v13 = vmax.f32 %v985_v8, 0.0 }
 0x148   :  { %v948_v6 = vpop.f32.mrf.mxu0 }
 0x149   :  { %v989_v7 = vpop.f32.mrf.mxu1  ;;  %v994_v14 = vmax.f32 %v987_v12, 0.0  ;;  %v997_v16 = vpack.c.bf16 %v993_v13, %v993_v13 }
 0x14b   :  { %v998_v15 = vpack.c.bf16 %v994_v14, %v994_v14 }
 0x14d   :  { %1334 = vmatprep.mubr.bf16.mxu1 %v998_v15 }
 0x14e   :  { %1335 = vmatmul.mubr.bf16.vlgmr.msra.gmra.mxu1 %v997_v16 }
 0x1ce   :  { %v1528_v17 = vpop.f32.mrf.mxu0 }
 0x1d0   :  { %v1529_v18 = vpop.f32.mrf.mxu0 }
 0x1d1   :  { %v1530_v21 = vadd.f32 %v1529_v18, %v1528_v17 }
 0x1d2   :  { %v1531_v19 = vpop.f32.mrf.mxu0 }
 0x1d3   :  { %v1297_v25 = vadd.f32 %v1530_v21, %v1479_v22 }
 0x1d4   :  { %v1532_v20 = vpop.f32.mrf.mxu0 }
 0x20e   :  { %v1550_v23 = vpop.f32.mrf.mxu1 }
 0x210   :  { %v1551_v24 = vpop.f32.mrf.mxu1 }
 0x211   :  { %v1552_v26 = vadd.f32 %v1551_v24, %v1550_v23 }
 0x212   :  { %v1553_v27 = vpop.f32.mrf.mxu1 }
 0x213   :  { %v1337_v28 = vadd.f32 %v1552_v26, %v1297_v25 }
 0x214   :  { %v1554_v29 = vpop.f32.mrf.mxu1 }
 0x215   :  { %1342 = vst [vmem:[%s2326_s5] sm:$0xff] %v1337_v28 }

</bundles_post_ra>
